<compile_context>
chip_gen: v6e
topology: v6e:2x2x1
jax: 0.10.0
libtpu: 0.0.40
codegen_flags: <defaults>
</compile_context>

<pallas_src>
import jax
import jax.numpy as jnp
from jax.experimental import pallas as pl
from jax.experimental.pallas import tpu as pltpu

_H1, _H2, _H3 = 1024, 512, 256
_PAD_OUT = 128   # lane-dense padded width for the final (256 -> 1) layer's MXU output
_MAX_TM = 512


def _leaky_relu(x, slope=0.2):
    return jnp.where(x > 0, x, slope * x)


def discriminator_kernel(x_ref,
                         w1_ref, b1_ref,
                         w2_ref, b2_ref,
                         w3_ref, b3_ref,
                         w4_ref, b4_ref,
                         o_ref):
    # In-kernel bf16 cast of the f32 x tile (VPU cast; halves wrapper-side x traffic).
    x = x_ref[...].astype(jnp.bfloat16)
    # Layer 1: (tm, D) @ (D, 1024), f32 accumulate; bias + LeakyReLU in f32.
    h = jnp.dot(x, w1_ref[...], preferred_element_type=jnp.float32) + b1_ref[...]
    h = _leaky_relu(h).astype(jnp.bfloat16)
    # Layer 2: (tm, 1024) @ (1024, 512)
    h = jnp.dot(h, w2_ref[...], preferred_element_type=jnp.float32) + b2_ref[...]
    h = _leaky_relu(h).astype(jnp.bfloat16)
    # Layer 3: (tm, 512) @ (512, 256)
    h = jnp.dot(h, w3_ref[...], preferred_element_type=jnp.float32) + b3_ref[...]
    h = _leaky_relu(h).astype(jnp.bfloat16)
    # Layer 4, padded to 128 output lanes (only column 0 is the real logit) -> MXU-friendly.
    logits = jnp.dot(h, w4_ref[...], preferred_element_type=jnp.float32) + b4_ref[...]
    # Lane-pack the writeback: transpose (tm, 128) -> (128, tm) on the XLU (tm is a multiple
    # of 128 so this is a native tile transpose), keep row 0 = the real logits as (1, tm).
    row = jnp.transpose(logits)[0:1, :]
    # Numerically-stable sigmoid; exp on the EUP, approximate reciprocal on the EUP too.
    e = jnp.exp(-jnp.abs(row))
    r = pl.reciprocal(1.0 + e, approx=True)
    o_ref[...] = jnp.where(row >= 0, r, e * r)


def _round_up(v, m):
    return ((v + m - 1) // m) * m


def _num_tensorcores():
    """Best-effort TensorCore count (v7x has 2 per chip); robust to any query failure."""
    try:
        kind = jax.devices()[0].device_kind.lower()
    except Exception:
        return 1
    return 2 if "v7" in kind else 1


def _pick_tm(batch, n_cores):
    """Batch tile, always a multiple of 128.

    Multiple-of-128 keeps the MXU M dimension full (v5e MXU is 128 wide), keeps bf16 tiles
    sublane-packed, and makes the lane-packed (1, tm) output store unmasked/lane-dense.
    """
    b128 = _round_up(max(batch, 1), 128)
    if n_cores <= 1:
        # v5e / v6e: one TensorCore -> splitting small batches into grid steps is pure
        # per-step overhead. One tile up to _MAX_TM; multiples of 256 beyond that.
        if b128 <= _MAX_TM:
            return b128
        return 512 if batch >= 1024 else 256
    # v7x: 2 TCs. Aim for >= 2 grid steps per core so each core's pipeline still overlaps
    # the x-tile DMA / output writeback with compute.
    steps_wanted = 2 * n_cores
    tm = _round_up(-(-batch // steps_wanted), 128)
    return max(128, min(_MAX_TM, tm))


def init_params(key, input_dim):
    """Deterministic init matching PyTorch nn.Linear shapes (stored transposed, f32)."""
    sizes = [(input_dim, _H1), (_H1, _H2), (_H2, _H3), (_H3, 1)]
    params = {}
    for idx, (fan_in, fan_out) in enumerate(sizes, start=1):
        key, kw, kb = jax.random.split(key, 3)
        bound = 1.0 / jnp.sqrt(fan_in)
        # PyTorch Linear weight is (out, in); we store (in, out) so the kernel does x @ W.
        params[f"w{idx}"] = jax.random.uniform(kw, (fan_in, fan_out), jnp.float32, -bound, bound)
        params[f"b{idx}"] = jax.random.uniform(kb, (1, fan_out), jnp.float32, -bound, bound)
    return params


def prepare_params(params):
    """One-time kernel-side weight prep (do this ONCE, reuse across calls).

    Casts weights to bf16 and pads the degenerate (256 -> 1) layer to 128 lanes so the
    per-call path never re-casts / re-pads ~3.6 MiB of weights in HBM.
    """
    return {
        "w1": params["w1"].astype(jnp.bfloat16),                                   # (D, 1024)
        "w2": params["w2"].astype(jnp.bfloat16),                                   # (1024, 512)
        "w3": params["w3"].astype(jnp.bfloat16),                                   # (512, 256)
        "w4": jnp.pad(params["w4"], ((0, 0), (0, _PAD_OUT - 1))).astype(jnp.bfloat16),  # (256, 128)
        "b1": params["b1"],                                                        # (1, 1024) f32
        "b2": params["b2"],                                                        # (1, 512)  f32
        "b3": params["b3"],                                                        # (1, 256)  f32
        "b4": jnp.pad(params["b4"], ((0, 0), (0, _PAD_OUT - 1))),                  # (1, 128)  f32
    }


def discriminator_forward(x, prep, *, tm=None):
    """x: (B, input_dim) float32. prep: output of prepare_params(). Returns (B, 1) float32."""
    B, D = x.shape
    if tm is None:
        tm = _pick_tm(B, _num_tensorcores())
    if tm % 128 != 0:
        raise ValueError("tm must be a multiple of 128 (lane-dense packed output).")

    num_tiles = pl.cdiv(B, tm)
    npad = num_tiles * tm

    # Only pad x when the batch is smaller than a single tile (tiny copy); for B >= tm the
    # partial tail block is handled by Pallas' out-of-range masking (rows are independent).
    if B < tm:
        x = jnp.pad(x, ((0, tm - B), (0, 0)))

    w1, w2, w3, w4 = prep["w1"], prep["w2"], prep["w3"], prep["w4"]
    b1, b2, b3, b4 = prep["b1"], prep["b2"], prep["b3"], prep["b4"]

    full = lambda arr: pl.BlockSpec(arr.shape, lambda i: (0, 0))  # grid-invariant operand

    flops = 2 * npad * (D * _H1 + _H1 * _H2 + _H2 * _H3 + _H3 * _PAD_OUT)
    bytes_accessed = (npad * D * 4
                      + (w1.size + w2.size + w3.size + w4.size) * 2
                      + (b1.size + b2.size + b3.size + b4.size) * 4
                      + npad * 4)
    cost = pl.CostEstimate(flops=flops, transcendentals=npad, bytes_accessed=bytes_accessed)

    out = pl.pallas_call(
        discriminator_kernel,
        out_shape=jax.ShapeDtypeStruct((1, npad), jnp.float32),
        grid_spec=pltpu.PrefetchScalarGridSpec(
            num_scalar_prefetch=0,
            grid=(num_tiles,),
            in_specs=[
                pl.BlockSpec((tm, D), lambda i: (i, 0)),   # f32 x tile over the batch
                full(w1), full(b1),
                full(w2), full(b2),
                full(w3), full(b3),
                full(w4), full(b4),
            ],
            # Lane-packed logits: grid step i writes lanes [i*tm, (i+1)*tm) of a single row.
            out_specs=pl.BlockSpec((1, tm), lambda i: (0, i)),
        ),
        compiler_params=pltpu.CompilerParams(
            dimension_semantics=("parallel",),
            # Default VMEM limit is ample: bf16 weights (~2 MiB, double-buffered ~4 MiB) plus
            # x/activation tiles stay far below even v7x's 64 MiB; no override needed.
        ),
        cost_estimate=cost,
    )(x, w1, b1, w2, b2, w3, b3, w4, b4)

    # Drop padded lanes / out-of-range rows and restore the (B, 1) shape.
    return out[0, :B].reshape(B, 1)


def reference_forward(x, params):
    """Pure-JAX reference emulating the kernel's bf16-matmul / f32-accumulate precision."""
    h = x.astype(jnp.bfloat16)
    for idx in range(1, 4):
        w = params[f"w{idx}"].astype(jnp.bfloat16)
        h = jnp.dot(h, w, preferred_element_type=jnp.float32) + params[f"b{idx}"]
        h = jnp.where(h > 0, h, 0.2 * h).astype(jnp.bfloat16)
    w4 = params["w4"].astype(jnp.bfloat16)
    logits = jnp.dot(h, w4, preferred_element_type=jnp.float32) + params["b4"]
    return jax.nn.sigmoid(logits)


if __name__ == "__main__":
    key = jax.random.PRNGKey(0)
    k_x, k_p, k_x2, k_x3 = jax.random.split(key, 4)

    input_dim = 256
    params = init_params(k_p, input_dim)
    prep = prepare_params(params)   # one-time weight prep, reused across all calls below

    # Case 1: tiny batch -> single 128-row tile (wrapper pads only these few rows).
    x = jax.random.normal(k_x, (8, input_dim), jnp.float32)
    out = jax.block_until_ready(discriminator_forward(x, prep))
    ref = reference_forward(x, params)
    assert out.shape == (8, 1)
    assert jnp.allclose(out, ref, atol=2e-3, rtol=2e-3), "mismatch vs pure-JAX reference"

    # Case 2: batch not a multiple of 8/128, still a single tile.
    x2 = jax.random.normal(k_x2, (50, input_dim), jnp.float32)
    out2 = jax.block_until_ready(discriminator_forward(x2, prep))
    ref2 = reference_forward(x2, params)
    assert out2.shape == (50, 1)
    assert jnp.allclose(out2, ref2, atol=2e-3, rtol=2e-3), "mismatch (batch 50)"

    # Case 3: multi-step grid with an unpadded partial tail tile (300 rows, tm=128 -> 3 steps).
    x3 = jax.random.normal(k_x3, (300, input_dim), jnp.float32)
    out3 = jax.block_until_ready(discriminator_forward(x3, prep, tm=128))
    ref3 = reference_forward(x3, params)
    assert out3.shape == (300, 1)
    assert jnp.allclose(out3, ref3, atol=2e-3, rtol=2e-3), "mismatch (multi-tile batch)"

    print("KERNEL_OK")
</pallas_src>

<mosaic_0001>
module attributes {stable_mosaic.version = 11 : i64} {
  func.func @discriminator_kernel(%arg0: i32, %arg1: memref<128x256xf32, #tpu.memory_space<vmem>>, %arg2: memref<256x1024xbf16, #tpu.memory_space<vmem>>, %arg3: memref<1x1024xf32, #tpu.memory_space<vmem>>, %arg4: memref<1024x512xbf16, #tpu.memory_space<vmem>>, %arg5: memref<1x512xf32, #tpu.memory_space<vmem>>, %arg6: memref<512x256xbf16, #tpu.memory_space<vmem>>, %arg7: memref<1x256xf32, #tpu.memory_space<vmem>>, %arg8: memref<256x128xbf16, #tpu.memory_space<vmem>>, %arg9: memref<1x128xf32, #tpu.memory_space<vmem>>, %arg10: memref<1x128xf32, #tpu.memory_space<vmem>>) attributes {dimension_semantics = [#tpu.dimension_semantics<parallel>], iteration_bounds = array<i64: 1>, scalar_prefetch = 0 : i64, scratch_operands = 0 : i64, tpu.core_type = #tpu.core_type<tc>, window_params = [{transform_indices = @transform_0, window_bounds = array<i64: 128, 256>}, {pipeline_mode = #tpu.pipeline_mode<synchronous>, transform_indices = @transform_1, window_bounds = array<i64: 256, 1024>}, {pipeline_mode = #tpu.pipeline_mode<synchronous>, transform_indices = @transform_2, window_bounds = array<i64: 1, 1024>}, {pipeline_mode = #tpu.pipeline_mode<synchronous>, transform_indices = @transform_3, window_bounds = array<i64: 1024, 512>}, {pipeline_mode = #tpu.pipeline_mode<synchronous>, transform_indices = @transform_4, window_bounds = array<i64: 1, 512>}, {pipeline_mode = #tpu.pipeline_mode<synchronous>, transform_indices = @transform_5, window_bounds = array<i64: 512, 256>}, {pipeline_mode = #tpu.pipeline_mode<synchronous>, transform_indices = @transform_6, window_bounds = array<i64: 1, 256>}, {pipeline_mode = #tpu.pipeline_mode<synchronous>, transform_indices = @transform_7, window_bounds = array<i64: 256, 128>}, {pipeline_mode = #tpu.pipeline_mode<synchronous>, transform_indices = @transform_8, window_bounds = array<i64: 1, 128>}, {transform_indices = @transform_9, window_bounds = array<i64: 1, 128>}]} {
    %c0 = arith.constant 0 : index
    %c0_0 = arith.constant 0 : index
    %0 = vector.load %arg1[%c0, %c0_0] : memref<128x256xf32, #tpu.memory_space<vmem>>, vector<128x256xf32>
    %1 = arith.truncf %0 : vector<128x256xf32> to vector<128x256xbf16>
    %c0_1 = arith.constant 0 : index
    %c0_2 = arith.constant 0 : index
    %2 = vector.load %arg2[%c0_1, %c0_2] : memref<256x1024xbf16, #tpu.memory_space<vmem>>, vector<256x1024xbf16>
    %cst = arith.constant dense<0.000000e+00> : vector<128x1024xf32>
    %3 = tpu.matmul %1, %2, %cst {dimension_numbers = #tpu.dot_dimension_numbers<[1], [0], [0], [1], [0, 0, 1, 1], [], []>} : vector<128x256xbf16>, vector<256x1024xbf16>, vector<128x1024xf32> -> vector<128x1024xf32>
    %c0_3 = arith.constant 0 : index
    %c0_4 = arith.constant 0 : index
    %4 = vector.load %arg3[%c0_3, %c0_4] : memref<1x1024xf32, #tpu.memory_space<vmem>>, vector<1x1024xf32>
    %5 = vector.broadcast %4 : vector<1x1024xf32> to vector<128x1024xf32>
    %6 = arith.addf %3, %5 : vector<128x1024xf32>
    %cst_5 = arith.constant 0.000000e+00 : f32
    %7 = vector.broadcast %cst_5 : f32 to vector<128x1024xf32>
    %8 = arith.cmpf ogt, %6, %7 : vector<128x1024xf32>
    %cst_6 = arith.constant 2.000000e-01 : f32
    %9 = vector.broadcast %cst_6 : f32 to vector<128x1024xf32>
    %10 = arith.mulf %9, %6 : vector<128x1024xf32>
    %11 = arith.select %8, %6, %10 : vector<128x1024xi1>, vector<128x1024xf32>
    %12 = arith.truncf %11 : vector<128x1024xf32> to vector<128x1024xbf16>
    %c0_7 = arith.constant 0 : index
    %c0_8 = arith.constant 0 : index
    %13 = vector.load %arg4[%c0_7, %c0_8] : memref<1024x512xbf16, #tpu.memory_space<vmem>>, vector<1024x512xbf16>
    %cst_9 = arith.constant dense<0.000000e+00> : vector<128x512xf32>
    %14 = tpu.matmul %12, %13, %cst_9 {dimension_numbers = #tpu.dot_dimension_numbers<[1], [0], [0], [1], [0, 0, 1, 1], [], []>} : vector<128x1024xbf16>, vector<1024x512xbf16>, vector<128x512xf32> -> vector<128x512xf32>
    %c0_10 = arith.constant 0 : index
    %c0_11 = arith.constant 0 : index
    %15 = vector.load %arg5[%c0_10, %c0_11] : memref<1x512xf32, #tpu.memory_space<vmem>>, vector<1x512xf32>
    %16 = vector.broadcast %15 : vector<1x512xf32> to vector<128x512xf32>
    %17 = arith.addf %14, %16 : vector<128x512xf32>
    %cst_12 = arith.constant 0.000000e+00 : f32
    %18 = vector.broadcast %cst_12 : f32 to vector<128x512xf32>
    %19 = arith.cmpf ogt, %17, %18 : vector<128x512xf32>
    %cst_13 = arith.constant 2.000000e-01 : f32
    %20 = vector.broadcast %cst_13 : f32 to vector<128x512xf32>
    %21 = arith.mulf %20, %17 : vector<128x512xf32>
    %22 = arith.select %19, %17, %21 : vector<128x512xi1>, vector<128x512xf32>
    %23 = arith.truncf %22 : vector<128x512xf32> to vector<128x512xbf16>
    %c0_14 = arith.constant 0 : index
    %c0_15 = arith.constant 0 : index
    %24 = vector.load %arg6[%c0_14, %c0_15] : memref<512x256xbf16, #tpu.memory_space<vmem>>, vector<512x256xbf16>
    %cst_16 = arith.constant dense<0.000000e+00> : vector<128x256xf32>
    %25 = tpu.matmul %23, %24, %cst_16 {dimension_numbers = #tpu.dot_dimension_numbers<[1], [0], [0], [1], [0, 0, 1, 1], [], []>} : vector<128x512xbf16>, vector<512x256xbf16>, vector<128x256xf32> -> vector<128x256xf32>
    %c0_17 = arith.constant 0 : index
    %c0_18 = arith.constant 0 : index
    %26 = vector.load %arg7[%c0_17, %c0_18] : memref<1x256xf32, #tpu.memory_space<vmem>>, vector<1x256xf32>
    %27 = vector.broadcast %26 : vector<1x256xf32> to vector<128x256xf32>
    %28 = arith.addf %25, %27 : vector<128x256xf32>
    %cst_19 = arith.constant 0.000000e+00 : f32
    %29 = vector.broadcast %cst_19 : f32 to vector<128x256xf32>
    %30 = arith.cmpf ogt, %28, %29 : vector<128x256xf32>
    %cst_20 = arith.constant 2.000000e-01 : f32
    %31 = vector.broadcast %cst_20 : f32 to vector<128x256xf32>
    %32 = arith.mulf %31, %28 : vector<128x256xf32>
    %33 = arith.select %30, %28, %32 : vector<128x256xi1>, vector<128x256xf32>
    %34 = arith.truncf %33 : vector<128x256xf32> to vector<128x256xbf16>
    %c0_21 = arith.constant 0 : index
    %c0_22 = arith.constant 0 : index
    %35 = vector.load %arg8[%c0_21, %c0_22] : memref<256x128xbf16, #tpu.memory_space<vmem>>, vector<256x128xbf16>
    %cst_23 = arith.constant dense<0.000000e+00> : vector<128x128xf32>
    %36 = tpu.matmul %34, %35, %cst_23 {dimension_numbers = #tpu.dot_dimension_numbers<[1], [0], [0], [1], [0, 0, 1, 1], [], []>} : vector<128x256xbf16>, vector<256x128xbf16>, vector<128x128xf32> -> vector<128x128xf32>
    %c0_24 = arith.constant 0 : index
    %c0_25 = arith.constant 0 : index
    %37 = vector.load %arg9[%c0_24, %c0_25] : memref<1x128xf32, #tpu.memory_space<vmem>>, vector<1x128xf32>
    %38 = vector.broadcast %37 : vector<1x128xf32> to vector<128x128xf32>
    %39 = arith.addf %36, %38 : vector<128x128xf32>
    %40 = tpu.transpose %39, [1, 0] : vector<128x128xf32> -> vector<128x128xf32>
    %41 = vector.extract_strided_slice %40 {offsets = [0, 0], sizes = [1, 128], strides = [1, 1]} : vector<128x128xf32> to vector<1x128xf32>
    %42 = math.absf %41 : vector<1x128xf32>
    %cst_26 = arith.constant 0.000000e+00 : f32
    %43 = vector.broadcast %cst_26 : f32 to vector<1x128xf32>
    %44 = arith.subf %43, %42 : vector<1x128xf32>
    %45 = math.exp %44 : vector<1x128xf32>
    %cst_27 = arith.constant 1.000000e+00 : f32
    %46 = vector.broadcast %cst_27 : f32 to vector<1x128xf32>
    %47 = arith.addf %46, %45 : vector<1x128xf32>
    %48 = tpu.reciprocal %47 {approx = true} : vector<1x128xf32> -> vector<1x128xf32>
    %cst_28 = arith.constant 0.000000e+00 : f32
    %49 = vector.broadcast %cst_28 : f32 to vector<1x128xf32>
    %50 = arith.cmpf oge, %41, %49 : vector<1x128xf32>
    %51 = arith.mulf %45, %48 : vector<1x128xf32>
    %52 = arith.select %50, %48, %51 : vector<1x128xi1>, vector<1x128xf32>
    %c0_29 = arith.constant 0 : index
    %c0_30 = arith.constant 0 : index
    %53 = vector.load %arg10[%c0_29, %c0_30] : memref<1x128xf32, #tpu.memory_space<vmem>>, vector<1x128xf32>
    tpu.vector_store %arg10[%c0_29, %c0_30], %52 {strides = array<i32>} : memref<1x128xf32, #tpu.memory_space<vmem>>, vector<1x128xf32>,
    return
  }
  func.func @transform_0(%arg0: i32) -> (i32, i32) {
    %c0_i32 = arith.constant 0 : i32
    %c0_i32_0 = arith.constant 0 : i32
    return %arg0, %c0_i32 : i32, i32
  }
  func.func @transform_1(%arg0: i32) -> (i32, i32) {
    %c0_i32 = arith.constant 0 : i32
    %c0_i32_0 = arith.constant 0 : i32
    %c0_i32_1 = arith.constant 0 : i32
    return %c0_i32, %c0_i32_0 : i32, i32
  }
  func.func @transform_2(%arg0: i32) -> (i32, i32) {
    %c0_i32 = arith.constant 0 : i32
    %c0_i32_0 = arith.constant 0 : i32
    %c0_i32_1 = arith.constant 0 : i32
    return %c0_i32, %c0_i32_0 : i32, i32
  }
  func.func @transform_3(%arg0: i32) -> (i32, i32) {
    %c0_i32 = arith.constant 0 : i32
    %c0_i32_0 = arith.constant 0 : i32
    %c0_i32_1 = arith.constant 0 : i32
    return %c0_i32, %c0_i32_0 : i32, i32
  }
  func.func @transform_4(%arg0: i32) -> (i32, i32) {
    %c0_i32 = arith.constant 0 : i32
    %c0_i32_0 = arith.constant 0 : i32
    %c0_i32_1 = arith.constant 0 : i32
    return %c0_i32, %c0_i32_0 : i32, i32
  }
  func.func @transform_5(%arg0: i32) -> (i32, i32) {
    %c0_i32 = arith.constant 0 : i32
    %c0_i32_0 = arith.constant 0 : i32
    %c0_i32_1 = arith.constant 0 : i32
    return %c0_i32, %c0_i32_0 : i32, i32
  }
  func.func @transform_6(%arg0: i32) -> (i32, i32) {
    %c0_i32 = arith.constant 0 : i32
    %c0_i32_0 = arith.constant 0 : i32
    %c0_i32_1 = arith.constant 0 : i32
    return %c0_i32, %c0_i32_0 : i32, i32
  }
  func.func @transform_7(%arg0: i32) -> (i32, i32) {
    %c0_i32 = arith.constant 0 : i32
    %c0_i32_0 = arith.constant 0 : i32
    %c0_i32_1 = arith.constant 0 : i32
    return %c0_i32, %c0_i32_0 : i32, i32
  }
  func.func @transform_8(%arg0: i32) -> (i32, i32) {
    %c0_i32 = arith.constant 0 : i32
    %c0_i32_0 = arith.constant 0 : i32
    %c0_i32_1 = arith.constant 0 : i32
    return %c0_i32, %c0_i32_0 : i32, i32
  }
  func.func @transform_9(%arg0: i32) -> (i32, i32) {
    %c0_i32 = arith.constant 0 : i32
    %c0_i32_0 = arith.constant 0 : i32
    return %c0_i32, %arg0 : i32, i32
  }
}

</mosaic_0001>

<bundles_post_ra>
// kernel: tpu_custom_call.1
= control target key start
LH: loop header
LB: loop body
LE: loop exit
PB: predicated region body
PF: predicated region fallthrough
CT: control target
= control target key end

     0   :  { %14 = vsyncpa [#allocation3], 0  ;;  %s8608_s0 = inlined_call_operand.hbm [shape: f32[128,256], index: 0, kind: input, shape index: {}]   ;;  %s8609_s1 = inlined_call_operand.hbm [shape: bf16[256,1024], index: 1, kind: input, shape index: {}]   ;;  %s8610_s2 = inlined_call_operand.hbm [shape: f32[1,1024], index: 2, kind: input, shape index: {}]   ;;  %s8611_s3 = inlined_call_operand.hbm [shape: bf16[1024,512], index: 3, kind: input, shape index: {}]   ;;  %s8612_s4 = inlined_call_operand.vmem [shape: f32[1,512], index: 4, kind: input, shape index: {}]   ;;  %s8613_s5 = inlined_call_operand.hbm [shape: bf16[512,256], index: 5, kind: input, shape index: {}]   ;;  %s8614_s6 = inlined_call_operand.vmem [shape: f32[1,256], index: 6, kind: input, shape index: {}]   ;;  %s8615_s7 = inlined_call_operand.hbm [shape: bf16[256,128], index: 7, kind: input, shape index: {}]   ;;  %s8616_s8 = inlined_call_operand.vmem [shape: f32[1,128], index: 8, kind: input, shape index: {}]   ;;  %s8617_s9 = inlined_call_operand.hbm [shape: f32[1,128], index: 9, kind: output, shape index: {}]  }
   0x1   :  { %15 = vsyncpa [#allocation6], 0 }
   0x2   :  { %16 = vsyncpa [#allocation9], 0 }
   0x3   :  { %17 = vsyncpa [#allocation12], 0 }
   0x4   :  { %18 = vsyncpa [#allocation4], 0  ;;  %s6795_s30 = smov [#allocation5]  }
   0x5   :  { %s36_s10 = sshll.u32 %s6795_s30, 4  ;;  %s37_s10 = int_to_ptr.vmem [resolvable:$true] %s36_s10 }
   0x6   :  { %s6653_s11 = scalar_lea.vmem %s37_s10, 16384  ;;  %p6658_p1 = scmp.lt.s32.totalorder %s37_s10, %s37_s10 }
   0x7   :  { %p6654_p0 = scmp.ne.s32.totalorder %s37_s10, %s6653_s11  ;;  %p6659_p2 = scmp.lt.s32.totalorder %s6653_s11, %s6653_s11 }
   0x9   :  { %p6660_p3 = por %p6659_p2, %p6658_p1 }
   0xb   :  { %p6661_p4 = pnand %p6660_p3, %p6654_p0 }
   0xd   :  { %6664 = shalt.err (!%p6661_p4)
}
   0xe   :  { %s6796_s12 = smov 512   ;;  %s6797_s13 = smov 32  }
   0xf   :  { %42 = dma.hbm_to_vmem [thread:$0]  %s8609_s1, 16384, %s37_s10, [#allocation6], %s6796_s12, %s6796_s12, %s6797_s13  }
  0x10   :  { %s6798_s16 = smov [#allocation8]   ;;  %s6799_s18 = smov [#allocation2]  }
  0x11   :  { %s58_s17 = sshll.u32 %s6798_s16, 4  ;;  %s24_s19 = sshll.u32 %s6799_s18, 4  ;;  %s59_s17 = int_to_ptr.vmem [resolvable:$true] %s58_s17  ;;  %s25_s19 = int_to_ptr.vmem [resolvable:$true] %s24_s19 }
  0x12   :  { %s6673_s20 = scalar_lea.vmem %s59_s17, 32768  ;;  %p6678_p6 = scmp.lt.s32.totalorder %s59_s17, %s59_s17 }
  0x13   :  { %p6674_p5 = scmp.ne.s32.totalorder %s59_s17, %s6673_s20  ;;  %p6679_p7 = scmp.lt.s32.totalorder %s6673_s20, %s6673_s20 }
  0x15   :  { %p6680_p8 = por %p6679_p7, %p6678_p6 }
  0x17   :  { %p6681_p9 = pnand %p6680_p8, %p6674_p5 }
  0x19   :  { %6684 = shalt.err (!%p6681_p9)
}
  0x1a   :  { %s6800_s21 = smov 256   ;;  %s6801_s22 = smov 16  }
  0x1b   :  { %64 = dma.hbm_to_vmem [thread:$0]  %s8611_s3, 32768, %s59_s17, [#allocation9], %s6800_s21, %s6800_s21, %s6801_s22  }
  0x1c   :  { %s6693_s1 = scalar_lea.vmem %s25_s19, 4096  ;;  %p6698_p11 = scmp.lt.s32.totalorder %s25_s19, %s25_s19 }
  0x1d   :  { %p6694_p10 = scmp.ne.s32.totalorder %s25_s19, %s6693_s1  ;;  %p6699_p12 = scmp.lt.s32.totalorder %s6693_s1, %s6693_s1 }
  0x1f   :  { %p6700_p13 = por %p6699_p12, %p6698_p11 }
  0x21   :  { %p6701_p0 = pnand %p6700_p13, %p6694_p10 }
  0x23   :  { %6704 = shalt.err (!%p6701_p0)
}
  0x24   :  { %30 = dma.hbm_to_vmem [thread:$0]  %s8608_s0, 4096, %s25_s19, [#allocation3], %s6800_s21, %s6800_s21, %s6801_s22  }
  0x25   :  { %s6802_s27 = smov [#allocation7]   ;;  %s6803_s29 = smov [#allocation10]  }
  0x26   :  { %s49_s28 = sshll.u32 %s6802_s27, 4  ;;  %s72_s30 = sshll.u32 %s6803_s29, 4  ;;  %s50_s28 = int_to_ptr.vmem [resolvable:$true] %s49_s28  ;;  %s73_s30 = int_to_ptr.vmem [resolvable:$true] %s72_s30 }
  0x27   :  { %s6713_s10 = scalar_lea.vmem %s50_s28, 128  ;;  %p6718_p2 = scmp.lt.s32.totalorder %s50_s28, %s50_s28 }
  0x28   :  { %p6714_p1 = scmp.ne.s32.totalorder %s50_s28, %s6713_s10  ;;  %p6719_p3 = scmp.lt.s32.totalorder %s6713_s10, %s6713_s10 }
  0x2a   :  { %p6720_p4 = por %p6719_p3, %p6718_p2 }
  0x2c   :  { %p6721_p5 = pnand %p6720_p4, %p6714_p1 }
  0x2e   :  { %6724 = shalt.err (!%p6721_p5)
}
  0x2f   :  { %52 = dma.hbm_to_vmem [thread:$0]  %s8610_s2, 128, %s50_s28, [#allocation6]  }
  0x30   :  { %s6733_s12 = scalar_lea.vmem %s73_s30, 8192  ;;  %p6738_p7 = scmp.lt.s32.totalorder %s73_s30, %s73_s30 }
  0x31   :  { %p6734_p6 = scmp.ne.s32.totalorder %s73_s30, %s6733_s12  ;;  %p6739_p8 = scmp.lt.s32.totalorder %s6733_s12, %s6733_s12 }
  0x33   :  { %p6740_p9 = por %p6739_p8, %p6738_p7 }
  0x35   :  { %p6741_p10 = pnand %p6740_p9, %p6734_p6 }
  0x37   :  { %6744 = shalt.err (!%p6741_p10)
}
  0x38   :  { %s6804_s0 = smov 128   ;;  %s6805_s13 = smov 8  }
  0x39   :  { %78 = dma.hbm_to_vmem [thread:$0]  %s8613_s5, 8192, %s73_s30, [#allocation9], %s6804_s0, %s6804_s0, %s6805_s13  }
  0x3a   :  { %s6806_s16 = smov [#allocation11]  }
  0x3b   :  { %s86_s17 = sshll.u32 %s6806_s16, 4  ;;  %s87_s17 = int_to_ptr.vmem [resolvable:$true] %s86_s17 }
  0x3c   :  { %s6753_s18 = scalar_lea.vmem %s87_s17, 2048  ;;  %p6758_p12 = scmp.lt.s32.totalorder %s87_s17, %s87_s17 }
  0x3d   :  { %p6754_p11 = scmp.ne.s32.totalorder %s87_s17, %s6753_s18  ;;  %p6759_p13 = scmp.lt.s32.totalorder %s6753_s18, %s6753_s18 }
  0x3f   :  { %p6760_p0 = por %p6759_p13, %p6758_p12 }
  0x41   :  { %p6761_p1 = pnand %p6760_p0, %p6754_p11 }
  0x43   :  { %6764 = shalt.err (!%p6761_p1)
}
  0x44   :  { %s6807_s2 = smov 64   ;;  %s6808_s19 = smov 4  }
  0x45   :  { %92 = dma.hbm_to_vmem [thread:$0]  %s8615_s7, 2048, %s87_s17, [#allocation12], %s6807_s2, %s6807_s2, %s6808_s19  }
  0x46   :  { %6785 = dma.done.wait [#allocation3], 4096  }
  0x47   :  { %6786 = vsyncadd [#allocation3], 4294963200 }
  0x48   :  { %6787 = dma.done.wait [#allocation6], 16512  }
  0x49   :  { %6788 = vsyncadd [#allocation6], 4294950784 }
  0x4a   :  { %6789 = dma.done.wait [#allocation9], 40960  }
  0x4b   :  { %6790 = vsyncadd [#allocation9], 4294926336 }
  0x4c   :  { %6791 = dma.done.wait [#allocation12], 2048  }
  0x4d   :  { %6792 = vsyncadd [#allocation12], 4294965248  ;;  %v218_v0 = vld [vmem:[#allocation5 + $0x1c0] sm:$0xff]  ;;  %v219_v2 = vld [vmem:[#allocation5 + $0x1c8] sm:$0xff] }
  0x4e   :  { %v222_v1 = vld [vmem:[#allocation5 + $0x1e0] sm:$0xff]  ;;  %v223_v4 = vld [vmem:[#allocation5 + $0x1e8] sm:$0xff]  ;;  %v117_v54 = vld [vmem:[#allocation2 + $0x18] sm:$0xff] }
  0x4f   :  { %v5641_v3 = vcombine.high %v218_v0, %v222_v1  ;;  %v5640_v5 = vcombine.low %v218_v0, %v222_v1  ;;  %v210_v6 = vld [vmem:[#allocation5 + $0x180] sm:$0xff]  ;;  %v5643_v8 = vcombine.high %v219_v2, %v223_v4  ;;  %v5642_v9 = vcombine.low %v219_v2, %v223_v4  ;;  %v211_v11 = vld [vmem:[#allocation5 + $0x188] sm:$0xff] }
  0x50   :  { %v214_v7 = vld [vmem:[#allocation5 + $0x1a0] sm:$0xff]  ;;  %v215_v12 = vld [vmem:[#allocation5 + $0x1a8] sm:$0xff] }
  0x51   :  { %v5633_v10 = vcombine.high %v210_v6, %v214_v7  ;;  %v202_v13 = vld [vmem:[#allocation5 + $0x140] sm:$0xff]  ;;  %972 = vmatprep.subr.bf16.mxu0 %v5641_v3  ;;  %v5635_v14 = vcombine.high %v211_v11, %v215_v12  ;;  %v203_v16 = vld [vmem:[#allocation5 + $0x148] sm:$0xff]  ;;  %1085 = vmatprep.subr.bf16.mxu1 %v5643_v8  ;;  %v5632_v18 = vcombine.low %v210_v6, %v214_v7 }
  0x52   :  { %v206_v15 = vld [vmem:[#allocation5 + $0x160] sm:$0xff]  ;;  %v207_v17 = vld [vmem:[#allocation5 + $0x168] sm:$0xff]  ;;  %973 = vmatpush1.bf16.msra.mxu0 %v5640_v5  ;;  %1086 = vmatpush1.bf16.msra.mxu1 %v5642_v9  ;;  %v5634_v19 = vcombine.low %v211_v11, %v215_v12 }
  0x53   :  { %974 = vmatprep.subr.bf16.mxu0 %v5633_v10  ;;  %v5625_v20 = vcombine.high %v202_v13, %v206_v15  ;;  %1087 = vmatprep.subr.bf16.mxu1 %v5635_v14  ;;  %v5627_v21 = vcombine.high %v203_v16, %v207_v17  ;;  %v194_v22 = vld [vmem:[#allocation5 + $0x100] sm:$0xff]  ;;  %v195_v24 = vld [vmem:[#allocation5 + $0x108] sm:$0xff]  ;;  %v5624_v26 = vcombine.low %v202_v13, %v206_v15 }
  0x54   :  { %v198_v23 = vld [vmem:[#allocation5 + $0x120] sm:$0xff]  ;;  %v199_v25 = vld [vmem:[#allocation5 + $0x128] sm:$0xff]  ;;  %v5626_v27 = vcombine.low %v203_v16, %v207_v17 }
  0x55   :  { %v5617_v28 = vcombine.high %v194_v22, %v198_v23  ;;  %v5619_v29 = vcombine.high %v195_v24, %v199_v25  ;;  %v186_v30 = vld [vmem:[#allocation5 + $0xc0] sm:$0xff]  ;;  %v187_v32 = vld [vmem:[#allocation5 + $0xc8] sm:$0xff]  ;;  %v5616_v34 = vcombine.low %v194_v22, %v198_v23  ;;  %v5618_v35 = vcombine.low %v195_v24, %v199_v25 }
  0x56   :  { %975 = vmatpush1.bf16.msra.mxu0 %v5632_v18  ;;  %1088 = vmatpush1.bf16.msra.mxu1 %v5634_v19  ;;  %v190_v31 = vld [vmem:[#allocation5 + $0xe0] sm:$0xff]  ;;  %v191_v33 = vld [vmem:[#allocation5 + $0xe8] sm:$0xff] }
  0x57   :  { %976 = vmatprep.subr.bf16.mxu0 %v5625_v20  ;;  %1089 = vmatprep.subr.bf16.mxu1 %v5627_v21  ;;  %v5609_v36 = vcombine.high %v186_v30, %v190_v31  ;;  %v5611_v37 = vcombine.high %v187_v32, %v191_v33  ;;  %v178_v38 = vld [vmem:[#allocation5 + $0x80] sm:$0xff]  ;;  %v179_v40 = vld [vmem:[#allocation5 + $0x88] sm:$0xff]  ;;  %v5608_v42 = vcombine.low %v186_v30, %v190_v31 }
  0x58   :  { %v182_v39 = vld [vmem:[#allocation5 + $0xa0] sm:$0xff]  ;;  %v183_v41 = vld [vmem:[#allocation5 + $0xa8] sm:$0xff]  ;;  %v5610_v43 = vcombine.low %v187_v32, %v191_v33 }
  0x59   :  { %v5601_v44 = vcombine.high %v178_v38, %v182_v39  ;;  %v5603_v45 = vcombine.high %v179_v40, %v183_v41  ;;  %v170_v46 = vld [vmem:[#allocation5 + $0x40] sm:$0xff]  ;;  %v171_v48 = vld [vmem:[#allocation5 + $0x48] sm:$0xff]  ;;  %v5600_v50 = vcombine.low %v178_v38, %v182_v39  ;;  %v5602_v51 = vcombine.low %v179_v40, %v183_v41 }
  0x5a   :  { %977 = vmatpush1.bf16.msra.mxu0 %v5624_v26  ;;  %1090 = vmatpush1.bf16.msra.mxu1 %v5626_v27  ;;  %v174_v47 = vld [vmem:[#allocation5 + $0x60] sm:$0xff]  ;;  %v175_v49 = vld [vmem:[#allocation5 + $0x68] sm:$0xff] }
  0x5b   :  { %978 = vmatprep.subr.bf16.mxu0 %v5617_v28  ;;  %1091 = vmatprep.subr.bf16.mxu1 %v5619_v29  ;;  %v5593_v52 = vcombine.high %v170_v46, %v174_v47  ;;  %v115_v53 = vld [vmem:[#allocation2 + $0x8] sm:$0xff]  ;;  %v5595_v55 = vcombine.high %v171_v48, %v175_v49  ;;  %v162_v56 = vld [vmem:[#allocation5] sm:$0xff]  ;;  %v5592_v61 = vcombine.low %v170_v46, %v174_v47 }
  0x5c   :  { %v166_v57 = vld [vmem:[#allocation5 + $0x20] sm:$0xff]  ;;  %v6878_v58 = vpack.c.bf16 %v117_v54, %v115_v53  ;;  %v163_v59 = vld [vmem:[#allocation5 + $0x8] sm:$0xff]  ;;  %v5594_v62 = vcombine.low %v171_v48, %v175_v49 }
  0x5d   :  { %v167_v60 = vld [vmem:[#allocation5 + $0x28] sm:$0xff]  ;;  %v5585_v63 = vcombine.high %v162_v56, %v166_v57  ;;  %v282_v1 = vld [vmem:[#allocation5 + $0x3c0] sm:$0xff]  ;;  %v5584_v5 = vcombine.low %v162_v56, %v166_v57 }
  0x5e   :  { %979 = vmatpush1.bf16.msra.mxu0 %v5616_v34  ;;  %1092 = vmatpush1.bf16.msra.mxu1 %v5618_v35  ;;  %v5587_v0 = vcombine.high %v163_v59, %v167_v60  ;;  %v286_v2 = vld [vmem:[#allocation5 + $0x3e0] sm:$0xff]  ;;  %v283_v3 = vld [vmem:[#allocation5 + $0x3c8] sm:$0xff]  ;;  %v5586_v6 = vcombine.low %v163_v59, %v167_v60 }
  0x5f   :  { %980 = vmatprep.subr.bf16.mxu0 %v5609_v36  ;;  %1093 = vmatprep.subr.bf16.mxu1 %v5611_v37  ;;  %v287_v4 = vld [vmem:[#allocation5 + $0x3e8] sm:$0xff]  ;;  %v5705_v7 = vcombine.high %v282_v1, %v286_v2  ;;  %v274_v9 = vld [vmem:[#allocation5 + $0x380] sm:$0xff]  ;;  %v5704_v13 = vcombine.low %v282_v1, %v286_v2 }
  0x60   :  { %1004 = vmatprep.mubr.bf16.mxu0 %v6878_v58  ;;  %1117 = vmatprep.mubr.bf16.mxu1 %v6878_v58  ;;  %v5707_v8 = vcombine.high %v283_v3, %v287_v4  ;;  %v278_v10 = vld [vmem:[#allocation5 + $0x3a0] sm:$0xff]  ;;  %v275_v11 = vld [vmem:[#allocation5 + $0x388] sm:$0xff]  ;;  %v5706_v14 = vcombine.low %v283_v3, %v287_v4  ;;  %v221_v3 = vld [vmem:[#allocation5 + $0x1d8] sm:$0xff] }
  0x61   :  { %v279_v12 = vld [vmem:[#allocation5 + $0x3a8] sm:$0xff]  ;;  %v5697_v15 = vcombine.high %v274_v9, %v278_v10  ;;  %v266_v17 = vld [vmem:[#allocation5 + $0x340] sm:$0xff]  ;;  %v5696_v21 = vcombine.low %v274_v9, %v278_v10  ;;  %v225_v4 = vld [vmem:[#allocation5 + $0x1f8] sm:$0xff] }
  0x62   :  { %981 = vmatpush1.bf16.msra.mxu0 %v5608_v42  ;;  %1094 = vmatpush1.bf16.msra.mxu1 %v5610_v43  ;;  %v5699_v16 = vcombine.high %v275_v11, %v279_v12  ;;  %v270_v18 = vld [vmem:[#allocation5 + $0x360] sm:$0xff]  ;;  %v267_v19 = vld [vmem:[#allocation5 + $0x348] sm:$0xff]  ;;  %v5698_v22 = vcombine.low %v275_v11, %v279_v12  ;;  %v5647_v11 = vcombine.high %v221_v3, %v225_v4  ;;  %v212_v12 = vld [vmem:[#allocation5 + $0x190] sm:$0xff] }
  0x63   :  { %982 = vmatprep.subr.bf16.mxu0 %v5601_v44  ;;  %1095 = vmatprep.subr.bf16.mxu1 %v5603_v45  ;;  %v271_v20 = vld [vmem:[#allocation5 + $0x368] sm:$0xff]  ;;  %v5689_v23 = vcombine.high %v266_v17, %v270_v18  ;;  %v258_v25 = vld [vmem:[#allocation5 + $0x300] sm:$0xff]  ;;  %v5688_v29 = vcombine.low %v266_v17, %v270_v18  ;;  %v121_v18 = vld [vmem:[#allocation2 + $0x38] sm:$0xff] }
  0x64   :  { %v5691_v24 = vcombine.high %v267_v19, %v271_v20  ;;  %v262_v26 = vld [vmem:[#allocation5 + $0x320] sm:$0xff]  ;;  %v259_v27 = vld [vmem:[#allocation5 + $0x308] sm:$0xff]  ;;  %v5690_v30 = vcombine.low %v267_v19, %v271_v20  ;;  %v5646_v20 = vcombine.low %v221_v3, %v225_v4 }
  0x65   :  { %v263_v28 = vld [vmem:[#allocation5 + $0x328] sm:$0xff]  ;;  %v5681_v31 = vcombine.high %v258_v25, %v262_v26  ;;  %v250_v33 = vld [vmem:[#allocation5 + $0x2c0] sm:$0xff]  ;;  %v5680_v37 = vcombine.low %v258_v25, %v262_v26  ;;  %v120_v25 = vld [vmem:[#allocation2 + $0x30] sm:$0xff] }
  0x66   :  { %983 = vmatpush1.bf16.msra.mxu0 %v5600_v50  ;;  %1096 = vmatpush1.bf16.msra.mxu1 %v5602_v51  ;;  %v5683_v32 = vcombine.high %v259_v27, %v263_v28  ;;  %v254_v34 = vld [vmem:[#allocation5 + $0x2e0] sm:$0xff]  ;;  %v251_v35 = vld [vmem:[#allocation5 + $0x2c8] sm:$0xff]  ;;  %v5682_v38 = vcombine.low %v259_v27, %v263_v28  ;;  %v204_v26 = vld [vmem:[#allocation5 + $0x150] sm:$0xff] }
  0x67   :  { %984 = vmatprep.subr.bf16.mxu0 %v5593_v52  ;;  %1097 = vmatprep.subr.bf16.mxu1 %v5595_v55  ;;  %v255_v36 = vld [vmem:[#allocation5 + $0x2e8] sm:$0xff]  ;;  %v5673_v39 = vcombine.high %v250_v33, %v254_v34  ;;  %v242_v41 = vld [vmem:[#allocation5 + $0x280] sm:$0xff]  ;;  %v5672_v45 = vcombine.low %v250_v33, %v254_v34  ;;  %v208_v27 = vld [vmem:[#allocation5 + $0x170] sm:$0xff] }
  0x68   :  { %v5675_v40 = vcombine.high %v251_v35, %v255_v36  ;;  %v246_v42 = vld [vmem:[#allocation5 + $0x2a0] sm:$0xff]  ;;  %v243_v43 = vld [vmem:[#allocation5 + $0x288] sm:$0xff]  ;;  %v5674_v46 = vcombine.low %v251_v35, %v255_v36  ;;  %v205_v28 = vld [vmem:[#allocation5 + $0x158] sm:$0xff]  ;;  %v5629_v33 = vcombine.high %v204_v26, %v208_v27 }
  0x69   :  { %v247_v44 = vld [vmem:[#allocation5 + $0x2a8] sm:$0xff]  ;;  %v5665_v47 = vcombine.high %v242_v41, %v246_v42  ;;  %v234_v49 = vld [vmem:[#allocation5 + $0x240] sm:$0xff]  ;;  %v5664_v53 = vcombine.low %v242_v41, %v246_v42  ;;  %v200_v34 = vld [vmem:[#allocation5 + $0x130] sm:$0xff]  ;;  %v5628_v41 = vcombine.low %v204_v26, %v208_v27 }
  0x6a   :  { %985 = vmatpush1.bf16.msra.mxu0 %v5592_v61  ;;  %1098 = vmatpush1.bf16.msra.mxu1 %v5594_v62  ;;  %v5667_v48 = vcombine.high %v243_v43, %v247_v44  ;;  %v238_v50 = vld [vmem:[#allocation5 + $0x260] sm:$0xff]  ;;  %v235_v51 = vld [vmem:[#allocation5 + $0x248] sm:$0xff]  ;;  %v5666_v56 = vcombine.low %v243_v43, %v247_v44  ;;  %v197_v36 = vld [vmem:[#allocation5 + $0x118] sm:$0xff] }
  0x6b   :  { %986 = vmatprep.subr.bf16.mxu0 %v5585_v63  ;;  %1099 = vmatprep.subr.bf16.mxu1 %v5587_v0  ;;  %v239_v52 = vld [vmem:[#allocation5 + $0x268] sm:$0xff]  ;;  %v226_v54 = vld [vmem:[#allocation5 + $0x200] sm:$0xff]  ;;  %v5657_v57 = vcombine.high %v234_v49, %v238_v50  ;;  %v5656_v62 = vcombine.low %v234_v49, %v238_v50  ;;  %v220_v63 = vld [vmem:[#allocation5 + $0x1d0] sm:$0xff] }
  0x6c   :  { %v230_v55 = vld [vmem:[#allocation5 + $0x220] sm:$0xff]  ;;  %v227_v59 = vld [vmem:[#allocation5 + $0x208] sm:$0xff]  ;;  %v5659_v61 = vcombine.high %v235_v51, %v239_v52  ;;  %v224_v0 = vld [vmem:[#allocation5 + $0x1f0] sm:$0xff]  ;;  %v5658_v1 = vcombine.low %v235_v51, %v239_v52 }
  0x6d   :  { %v231_v60 = vld [vmem:[#allocation5 + $0x228] sm:$0xff]  ;;  %v5649_v2 = vcombine.high %v226_v54, %v230_v55  ;;  %v5645_v10 = vcombine.high %v220_v63, %v224_v0  ;;  %v5644_v19 = vcombine.low %v220_v63, %v224_v0  ;;  %v192_v49 = vld [vmem:[#allocation5 + $0xf0] sm:$0xff]  ;;  %v189_v50 = vld [vmem:[#allocation5 + $0xd8] sm:$0xff] }
  0x6e   :  { %987 = vmatpush1.bf16.msra.mxu0 %v5584_v5  ;;  %1100 = vmatpush1.bf16.msra.mxu1 %v5586_v6  ;;  %v5651_v5 = vcombine.high %v227_v59, %v231_v60  ;;  %v5648_v6 = vcombine.low %v226_v54, %v230_v55  ;;  %v5650_v9 = vcombine.low %v227_v59, %v231_v60  ;;  %v119_v17 = vld [vmem:[#allocation2 + $0x28] sm:$0xff]  ;;  %v193_v51 = vld [vmem:[#allocation5 + $0xf8] sm:$0xff]  ;;  %v288_v26 = vld [vmem:[#allocation5 + $0x3f0] sm:$0xff] }
  0x6f   :  { %988 = vmatprep.subr.bf16.mxu0 %v5705_v7  ;;  %1101 = vmatprep.subr.bf16.mxu1 %v5707_v8  ;;  %v114_v7 = vld [vmem:[#allocation2] sm:$0xff]  ;;  %v116_v8 = vld [vmem:[#allocation2 + $0x10] sm:$0xff]  ;;  %v181_v59 = vld [vmem:[#allocation5 + $0x98] sm:$0xff] }
  0x70   :  { %v185_v60 = vld [vmem:[#allocation5 + $0xb8] sm:$0xff] }
  0x71   :  { %v129_v63 = vld [vmem:[#allocation2 + $0x78] sm:$0xff]  ;;  %v5607_v3 = vcombine.high %v181_v59, %v185_v60 }
  0x72   :  { %989 = vmatpush2.bf16.msra.mxu0 %v5704_v13  ;;  %1102 = vmatpush2.bf16.msra.mxu1 %v5706_v14  ;;  %v216_v13 = vld [vmem:[#allocation5 + $0x1b0] sm:$0xff]  ;;  %v213_v14 = vld [vmem:[#allocation5 + $0x198] sm:$0xff] }
  0x73   :  { %990 = vmatprep.subr.bf16.mxu0 %v5697_v15  ;;  %1103 = vmatprep.subr.bf16.mxu1 %v5699_v16  ;;  %v6882_v15 = vpack.c.bf16 %v116_v8, %v114_v7  ;;  %v217_v16 = vld [vmem:[#allocation5 + $0x1b8] sm:$0xff]  ;;  %v172_v7 = vld [vmem:[#allocation5 + $0x50] sm:$0xff] }
  0x74   :  { %v176_v8 = vld [vmem:[#allocation5 + $0x70] sm:$0xff] }
  0x76   :  { %991 = vmatpush2.bf16.msra.mxu0 %v5696_v21  ;;  %1104 = vmatpush2.bf16.msra.mxu1 %v5698_v22  ;;  %v5637_v21 = vcombine.high %v212_v12, %v216_v13  ;;  %v5639_v22 = vcombine.high %v213_v14, %v217_v16 }
  0x77   :  { %992 = vmatprep.subr.bf16.mxu0 %v5689_v23  ;;  %1105 = vmatprep.subr.bf16.mxu1 %v5691_v24  ;;  %v6884_v23 = vpack.c.bf16 %v121_v18, %v119_v17  ;;  %v118_v24 = vld [vmem:[#allocation2 + $0x20] sm:$0xff]  ;;  %v165_v18 = vld [vmem:[#allocation5 + $0x18] sm:$0xff] }
  0x7a   :  { %993 = vmatpush2.bf16.msra.mxu0 %v5688_v29  ;;  %1106 = vmatpush2.bf16.msra.mxu1 %v5690_v30  ;;  %v209_v29 = vld [vmem:[#allocation5 + $0x178] sm:$0xff]  ;;  %v5636_v30 = vcombine.low %v212_v12, %v216_v13  ;;  %v164_v12 = vld [vmem:[#allocation5 + $0x10] sm:$0xff]  ;;  %v5606_v13 = vcombine.low %v181_v59, %v185_v60 }
  0x7b   :  { %994 = vmatprep.subr.bf16.mxu0 %v5681_v31  ;;  %1107 = vmatprep.subr.bf16.mxu1 %v5683_v32  ;;  %v196_v31 = vld [vmem:[#allocation5 + $0x110] sm:$0xff]  ;;  %v5638_v32 = vcombine.low %v213_v14, %v217_v16  ;;  %v5631_v35 = vcombine.high %v205_v28, %v209_v29  ;;  %v5630_v42 = vcombine.low %v205_v28, %v209_v29  ;;  %v285_v29 = vld [vmem:[#allocation5 + $0x3d8] sm:$0xff] }
  0x7c   :  { %v5621_v43 = vcombine.high %v196_v31, %v200_v34  ;;  %v5620_v52 = vcombine.low %v196_v31, %v200_v34  ;;  %v5597_v14 = vcombine.high %v172_v7, %v176_v8  ;;  %v168_v16 = vld [vmem:[#allocation5 + $0x30] sm:$0xff] }
  0x7d   :  { %v5589_v28 = vcombine.high %v164_v12, %v168_v16  ;;  %v132_v34 = vld [vmem:[#allocation2 + $0x90] sm:$0xff] }
  0x7e   :  { %995 = vmatpush2.bf16.msra.mxu0 %v5680_v37  ;;  %1108 = vmatpush2.bf16.msra.mxu1 %v5682_v38  ;;  %v201_v37 = vld [vmem:[#allocation5 + $0x138] sm:$0xff]  ;;  %v6890_v38 = vpack.c.bf16 %v120_v25, %v118_v24  ;;  %v5596_v24 = vcombine.low %v172_v7, %v176_v8  ;;  %v284_v25 = vld [vmem:[#allocation5 + $0x3d0] sm:$0xff] }
  0x7f   :  { %996 = vmatprep.subr.bf16.mxu0 %v5673_v39  ;;  %1109 = vmatprep.subr.bf16.mxu1 %v5675_v40  ;;  %v123_v39 = vld [vmem:[#allocation2 + $0x48] sm:$0xff]  ;;  %v125_v40 = vld [vmem:[#allocation2 + $0x58] sm:$0xff]  ;;  %v5623_v44 = vcombine.high %v197_v36, %v201_v37  ;;  %v5622_v54 = vcombine.low %v197_v36, %v201_v37  ;;  %v276_v36 = vld [vmem:[#allocation5 + $0x390] sm:$0xff] }
  0x80   :  { %v280_v37 = vld [vmem:[#allocation5 + $0x3b0] sm:$0xff] }
  0x81   :  { %v136_v59 = vld [vmem:[#allocation2 + $0xb0] sm:$0xff]  ;;  %v5700_v60 = vcombine.low %v276_v36, %v280_v37 }
  0x82   :  { %997 = vmatpush2.bf16.msra.mxu0 %v5672_v45  ;;  %1110 = vmatpush2.bf16.msra.mxu1 %v5674_v46  ;;  %v6892_v45 = vpack.c.bf16 %v125_v40, %v123_v39  ;;  %v122_v46 = vld [vmem:[#allocation2 + $0x40] sm:$0xff]  ;;  %v5709_v40 = vcombine.high %v284_v25, %v288_v26 }
  0x83   :  { %998 = vmatprep.subr.bf16.mxu0 %v5665_v47  ;;  %1111 = vmatprep.subr.bf16.mxu1 %v5667_v48  ;;  %v124_v47 = vld [vmem:[#allocation2 + $0x50] sm:$0xff] }
  0x84   :  { %v188_v48 = vld [vmem:[#allocation5 + $0xd0] sm:$0xff] }
  0x85   :  { %v5613_v55 = vcombine.high %v188_v48, %v192_v49  ;;  %v5612_v0 = vcombine.low %v188_v48, %v192_v49  ;;  %v5708_v48 = vcombine.low %v284_v25, %v288_v26  ;;  %v268_v49 = vld [vmem:[#allocation5 + $0x350] sm:$0xff] }
  0x86   :  { %999 = vmatpush2.bf16.msra.mxu0 %v5664_v53  ;;  %1112 = vmatpush2.bf16.msra.mxu1 %v5666_v56  ;;  %v180_v53 = vld [vmem:[#allocation5 + $0x90] sm:$0xff] }
  0x87   :  { %1000 = vmatprep.subr.bf16.mxu0 %v5657_v57  ;;  %1113 = vmatprep.subr.bf16.mxu1 %v5659_v61  ;;  %v184_v56 = vld [vmem:[#allocation5 + $0xb0] sm:$0xff]  ;;  %v5615_v57 = vcombine.high %v189_v50, %v193_v51  ;;  %v6898_v61 = vpack.c.bf16 %v124_v47, %v122_v46 }
  0x88   :  { %v248_v25 = vld [vmem:[#allocation5 + $0x2b0] sm:$0xff] }
  0x8a   :  { %1001 = vmatpush2.bf16.msra.mxu0 %v5656_v62  ;;  %1114 = vmatpush2.bf16.msra.mxu1 %v5658_v1  ;;  %v127_v62 = vld [vmem:[#allocation2 + $0x68] sm:$0xff]  ;;  %v5614_v1 = vcombine.low %v189_v50, %v193_v51  ;;  %v272_v50 = vld [vmem:[#allocation5 + $0x370] sm:$0xff] }
  0x8b   :  { %1002 = vmatprep.subr.bf16.mxu0 %v5649_v2  ;;  %1115 = vmatprep.subr.bf16.mxu1 %v5651_v5  ;;  %v5605_v2 = vcombine.high %v180_v53, %v184_v56  ;;  %v6900_v4 = vpack.c.bf16 %v129_v63, %v127_v62  ;;  %v126_v5 = vld [vmem:[#allocation2 + $0x60] sm:$0xff]  ;;  %v260_v62 = vld [vmem:[#allocation5 + $0x310] sm:$0xff] }
  0x8c   :  { %v264_v63 = vld [vmem:[#allocation5 + $0x330] sm:$0xff] }
  0x8e   :  { %1003 = vmatpush2.bf16.msra.mxu0 %v5648_v6  ;;  %1116 = vmatpush2.bf16.msra.mxu1 %v5650_v9  ;;  %v128_v6 = vld [vmem:[#allocation2 + $0x70] sm:$0xff]  ;;  %v173_v9 = vld [vmem:[#allocation5 + $0x58] sm:$0xff] }
  0x8f   :  { %1198 = vmatprep.subr.bf16.mxu0 %v5645_v10  ;;  %1311 = vmatprep.subr.bf16.mxu1 %v5647_v11  ;;  %v177_v10 = vld [vmem:[#allocation5 + $0x78] sm:$0xff]  ;;  %v5604_v11 = vcombine.low %v180_v53, %v184_v56 }
  0x90   :  { %v5599_v17 = vcombine.high %v173_v9, %v177_v10  ;;  %v5598_v27 = vcombine.low %v173_v9, %v177_v10  ;;  %v269_v53 = vld [vmem:[#allocation5 + $0x358] sm:$0xff]  ;;  %v5692_v9 = vcombine.low %v268_v49, %v272_v50  ;;  %v252_v10 = vld [vmem:[#allocation5 + $0x2d0] sm:$0xff] }
  0x91   :  { %1005 = vmatmul.mubr.bf16.vlgmr.msra.gmra.mxu0 %v6882_v15  ;;  %1118 = vmatmul.mubr.bf16.vlgmr.msra.gmra.mxu1 %v6882_v15 }
  0x92   :  { %1199 = vmatpush1.bf16.msra.mxu0 %v5644_v19  ;;  %1312 = vmatpush1.bf16.msra.mxu1 %v5646_v20  ;;  %v169_v19 = vld [vmem:[#allocation5 + $0x38] sm:$0xff]  ;;  %v6906_v20 = vpack.c.bf16 %v128_v6, %v126_v5  ;;  %v139_v5 = vld [vmem:[#allocation2 + $0xc8] sm:$0xff] }
  0x93   :  { %1200 = vmatprep.subr.bf16.mxu0 %v5637_v21  ;;  %1313 = vmatprep.subr.bf16.mxu1 %v5639_v22  ;;  %v131_v21 = vld [vmem:[#allocation2 + $0x88] sm:$0xff]  ;;  %v133_v22 = vld [vmem:[#allocation2 + $0x98] sm:$0xff]  ;;  %v5591_v31 = vcombine.high %v165_v18, %v169_v19  ;;  %v5590_v39 = vcombine.low %v165_v18, %v169_v19  ;;  %v138_v19 = vld [vmem:[#allocation2 + $0xc0] sm:$0xff] }
  0x94   :  { %1014 = vmatprep.mubr.bf16.mxu0 %v6884_v23  ;;  %1127 = vmatprep.mubr.bf16.mxu1 %v6884_v23  ;;  %v141_v6 = vld [vmem:[#allocation2 + $0xd8] sm:$0xff] }
  0x95   :  { %v6924_v18 = vpack.c.bf16 %v141_v6, %v139_v5  ;;  %v6144_v6 = vld [vmem:[#allocation8 + $0xe0] ss:$16 sps:$4 sm:$0xff]  }
  0x96   :  { %1201 = vmatpush1.bf16.msra.mxu0 %v5636_v30  ;;  %1314 = vmatpush1.bf16.msra.mxu1 %v5638_v32  ;;  %v289_v30 = vld [vmem:[#allocation5 + $0x3f8] sm:$0xff]  ;;  %v6908_v32 = vpack.c.bf16 %v133_v22, %v131_v21  ;;  %v140_v21 = vld [vmem:[#allocation2 + $0xd0] sm:$0xff]  ;;  %v5684_v22 = vcombine.low %v260_v62, %v264_v63 }
  0x97   :  { %1202 = vmatprep.subr.bf16.mxu0 %v5629_v33  ;;  %1315 = vmatprep.subr.bf16.mxu1 %v5631_v35  ;;  %v130_v33 = vld [vmem:[#allocation2 + $0x80] sm:$0xff]  ;;  %v5588_v35 = vcombine.low %v164_v12, %v168_v16  ;;  %v5711_v46 = vcombine.high %v285_v29, %v289_v30  ;;  %v5710_v51 = vcombine.low %v285_v29, %v289_v30  ;;  %v257_v16 = vld [vmem:[#allocation5 + $0x2f8] sm:$0xff]  ;;  %v143_v30 = vld [vmem:[#allocation2 + $0xe8] sm:$0xff] }
  0x98   :  { %v6914_v47 = vpack.c.bf16 %v132_v34, %v130_v33  ;;  %v249_v29 = vld [vmem:[#allocation5 + $0x2b8] sm:$0xff]  ;;  %v6930_v34 = vpack.c.bf16 %v140_v21, %v138_v19 }
  0x99   :  { %1015 = vmatmul.mubr.bf16.gmra.mxu0 %v6890_v38  ;;  %1128 = vmatmul.mubr.bf16.gmra.mxu1 %v6890_v38  ;;  %v6167_v19 = vld [vmem:[#allocation8 + $0x284] ss:$16 sps:$4 sm:$0xff]  }
  0x9a   :  { %1203 = vmatpush1.bf16.msra.mxu0 %v5628_v41  ;;  %1316 = vmatpush1.bf16.msra.mxu1 %v5630_v42  ;;  %v277_v41 = vld [vmem:[#allocation5 + $0x398] sm:$0xff] }
  0x9b   :  { %1204 = vmatprep.subr.bf16.mxu0 %v5621_v43  ;;  %1317 = vmatprep.subr.bf16.mxu1 %v5623_v44  ;;  %v281_v42 = vld [vmem:[#allocation5 + $0x3b8] sm:$0xff]  ;;  %v135_v43 = vld [vmem:[#allocation2 + $0xa8] sm:$0xff] }
  0x9c   :  { %1024 = vmatprep.mubr.bf16.mxu0 %v6892_v45  ;;  %1137 = vmatprep.mubr.bf16.mxu1 %v6892_v45  ;;  %v137_v44 = vld [vmem:[#allocation2 + $0xb8] sm:$0xff] }
  0x9d   :  { %v6916_v56 = vpack.c.bf16 %v137_v44, %v135_v43  ;;  %v6170_v21 = vld [vmem:[#allocation8 + $0x64] ss:$16 sps:$4 sm:$0xff]  }
  0x9e   :  { %1205 = vmatpush1.bf16.msra.mxu0 %v5620_v52  ;;  %1318 = vmatpush1.bf16.msra.mxu1 %v5622_v54  ;;  %v5701_v52 = vcombine.high %v276_v36, %v280_v37  ;;  %v273_v54 = vld [vmem:[#allocation5 + $0x378] sm:$0xff]  ;;  %v236_v36 = vld [vmem:[#allocation5 + $0x250] sm:$0xff] }
  0x9f   :  { %1206 = vmatprep.subr.bf16.mxu0 %v5613_v55  ;;  %1319 = vmatprep.subr.bf16.mxu1 %v5615_v57  ;;  %v5703_v55 = vcombine.high %v277_v41, %v281_v42  ;;  %v134_v57 = vld [vmem:[#allocation2 + $0xa0] sm:$0xff]  ;;  %v5695_v7 = vcombine.high %v269_v53, %v273_v54  ;;  %v5694_v12 = vcombine.low %v269_v53, %v273_v54  ;;  %v240_v37 = vld [vmem:[#allocation5 + $0x270] sm:$0xff]  ;;  %v229_v54 = vld [vmem:[#allocation5 + $0x218] sm:$0xff] }
  0xa0   :  { %v6922_v8 = vpack.c.bf16 %v136_v59, %v134_v57  ;;  %v5661_v53 = vcombine.high %v236_v36, %v240_v37 }
  0xa1   :  { %1025 = vmatmul.mubr.bf16.gmra.mxu0 %v6898_v61  ;;  %1138 = vmatmul.mubr.bf16.gmra.mxu1 %v6898_v61 }
  0xa2   :  { %1207 = vmatpush1.bf16.msra.mxu0 %v5612_v0  ;;  %1320 = vmatpush1.bf16.msra.mxu1 %v5614_v1  ;;  %v5702_v0 = vcombine.low %v277_v41, %v281_v42  ;;  %v5693_v1 = vcombine.high %v268_v49, %v272_v50  ;;  %v237_v41 = vld [vmem:[#allocation5 + $0x258] sm:$0xff]  ;;  %v228_v50 = vld [vmem:[#allocation5 + $0x210] sm:$0xff] }
  0xa3   :  { %1208 = vmatprep.subr.bf16.mxu0 %v5605_v2  ;;  %1321 = vmatprep.subr.bf16.mxu1 %v5607_v3  ;;  %v261_v2 = vld [vmem:[#allocation5 + $0x318] sm:$0xff] }
  0xa4   :  { %1034 = vmatprep.mubr.bf16.mxu0 %v6900_v4  ;;  %1147 = vmatprep.mubr.bf16.mxu1 %v6900_v4  ;;  %v265_v3 = vld [vmem:[#allocation5 + $0x338] sm:$0xff] }
  0xa5   :  { %v5686_v26 = vcombine.low %v261_v2, %v265_v3  ;;  %v241_v42 = vld [vmem:[#allocation5 + $0x278] sm:$0xff] }
  0xa6   :  { %1209 = vmatpush1.bf16.msra.mxu0 %v5604_v11  ;;  %1322 = vmatpush1.bf16.msra.mxu1 %v5606_v13  ;;  %v256_v11 = vld [vmem:[#allocation5 + $0x2f0] sm:$0xff]  ;;  %v5685_v13 = vcombine.high %v260_v62, %v264_v63  ;;  %v5663_v57 = vcombine.high %v237_v41, %v241_v42  ;;  %v5662_v62 = vcombine.low %v237_v41, %v241_v42  ;;  %v6200_v41 = vld [vmem:[#allocation8 + $0x1c4] ss:$16 sps:$4 sm:$0xff]  }
  0xa7   :  { %1210 = vmatprep.subr.bf16.mxu0 %v5597_v14  ;;  %1323 = vmatprep.subr.bf16.mxu1 %v5599_v17  ;;  %v253_v14 = vld [vmem:[#allocation5 + $0x2d8] sm:$0xff]  ;;  %v5687_v17 = vcombine.high %v261_v2, %v265_v3 }
  0xa8   :  { %v5679_v33 = vcombine.high %v253_v14, %v257_v16  ;;  %v6149_v3 = vld [vmem:[#allocation8 + $0x2e4] ss:$16 sps:$4 sm:$0xff]  }
  0xa9   :  { %1035 = vmatmul.mubr.bf16.gmra.mxu0 %v6906_v20  ;;  %1148 = vmatmul.mubr.bf16.gmra.mxu1 %v6906_v20  ;;  %v6203_v42 = vld [vmem:[#allocation8 + $0x3c4] ss:$16 sps:$4 sm:$0xff]  }
  0xaa   :  { %1211 = vmatpush1.bf16.msra.mxu0 %v5596_v24  ;;  %1324 = vmatpush1.bf16.msra.mxu1 %v5598_v27  ;;  %v244_v24 = vld [vmem:[#allocation5 + $0x290] sm:$0xff]  ;;  %v5677_v27 = vcombine.high %v252_v10, %v256_v11 }
  0xab   :  { %1212 = vmatprep.subr.bf16.mxu0 %v5589_v28  ;;  %1325 = vmatprep.subr.bf16.mxu1 %v5591_v31  ;;  %v245_v28 = vld [vmem:[#allocation5 + $0x298] sm:$0xff]  ;;  %v5668_v49 = vcombine.low %v244_v24, %v248_v25 }
  0xac   :  { %1044 = vmatprep.mubr.bf16.mxu0 %v6908_v32  ;;  %1157 = vmatprep.mubr.bf16.mxu1 %v6908_v32  ;;  %v145_v31 = vld [vmem:[#allocation2 + $0xf8] sm:$0xff]  ;;  %v5671_v43 = vcombine.high %v245_v28, %v249_v29 }
  0xad   :  { %v6932_v44 = vpack.c.bf16 %v145_v31, %v143_v30  ;;  %v6180_v30 = vld [vmem:[#allocation8 + $0x20] ss:$16 sps:$4 sm:$0xff]  }
  0xae   :  { %1213 = vmatpush1.bf16.msra.mxu0 %v5588_v35  ;;  %1326 = vmatpush1.bf16.msra.mxu1 %v5590_v39  ;;  %v5676_v35 = vcombine.low %v252_v10, %v256_v11  ;;  %v5678_v39 = vcombine.low %v253_v14, %v257_v16  ;;  %v6155_v10 = vld [vmem:[#allocation8 + $0x2c4] ss:$16 sps:$4 sm:$0xff]   ;;  %v6150_v11 = vld [vmem:[#allocation8 + $0xc0] ss:$16 sps:$4 sm:$0xff]  }
  0xaf   :  { %1214 = vmatprep.subr.bf16.mxu0 %v5709_v40  ;;  %1327 = vmatprep.subr.bf16.mxu1 %v5711_v46  ;;  %v5669_v40 = vcombine.high %v244_v24, %v248_v25  ;;  %v142_v46 = vld [vmem:[#allocation2 + $0xe0] sm:$0xff]  ;;  %v6156_v14 = vld [vmem:[#allocation8 + $0xa0] ss:$16 sps:$4 sm:$0xff]   ;;  %v6173_v24 = vld [vmem:[#allocation8 + $0x264] ss:$16 sps:$4 sm:$0xff]  }
  0xb0   :  { %v6159_v16 = vld [vmem:[#allocation8 + $0x2a0] ss:$16 sps:$4 sm:$0xff]  }
  0xb1   :  { %1045 = vmatmul.mubr.bf16.gmra.mxu0 %v6914_v47  ;;  %1158 = vmatmul.mubr.bf16.gmra.mxu1 %v6914_v47  ;;  %v6171_v25 = vld [vmem:[#allocation8 + $0x260] ss:$16 sps:$4 sm:$0xff]  }
  0xb2   :  { %1215 = vmatpush2.bf16.msra.mxu0 %v5708_v48  ;;  %1328 = vmatpush2.bf16.msra.mxu1 %v5710_v51  ;;  %v144_v48 = vld [vmem:[#allocation2 + $0xf0] sm:$0xff]  ;;  %v6183_v31 = vld [vmem:[#allocation8 + $0x220] ss:$16 sps:$4 sm:$0xff]  }
  0xb3   :  { %1216 = vmatprep.subr.bf16.mxu0 %v5701_v52  ;;  %1329 = vmatprep.subr.bf16.mxu1 %v5703_v55  ;;  %v232_v51 = vld [vmem:[#allocation5 + $0x230] sm:$0xff]  ;;  %v5670_v52 = vcombine.low %v245_v28, %v249_v29  ;;  %v233_v55 = vld [vmem:[#allocation5 + $0x238] sm:$0xff]  ;;  %v6938_v59 = vpack.c.bf16 %v144_v48, %v142_v46 }
  0xb4   :  { %1054 = vmatprep.mubr.bf16.mxu0 %v6916_v56  ;;  %1167 = vmatprep.mubr.bf16.mxu1 %v6916_v56  ;;  %v5653_v63 = vcombine.high %v228_v50, %v232_v51  ;;  %v5652_v2 = vcombine.low %v228_v50, %v232_v51  ;;  %v5654_v5 = vcombine.low %v229_v54, %v233_v55  ;;  %v6182_v28 = vld [vmem:[#allocation8 + $0x24] ss:$16 sps:$4 sm:$0xff]   ;;  %v6204_v48 = vld [vmem:[#allocation8 + $0x1a0] ss:$16 sps:$4 sm:$0xff]  }
  0xb5   :  { %v6185_v29 = vld [vmem:[#allocation8 + $0x224] ss:$16 sps:$4 sm:$0xff]  }
  0xb6   :  { %1217 = vmatpush2.bf16.msra.mxu0 %v5700_v60  ;;  %1330 = vmatpush2.bf16.msra.mxu1 %v5702_v0  ;;  %v5660_v60 = vcombine.low %v236_v36, %v240_v37  ;;  %v5655_v0 = vcombine.high %v229_v54, %v233_v55  ;;  %v6194_v36 = vld [vmem:[#allocation8 + $0x1e4] ss:$16 sps:$4 sm:$0xff]   ;;  %v6216_v54 = vld [vmem:[#allocation8 + $0x160] ss:$16 sps:$4 sm:$0xff]  }
  0xb7   :  { %1218 = vmatprep.subr.bf16.mxu0 %v5693_v1  ;;  %1331 = vmatprep.subr.bf16.mxu1 %v5695_v7  ;;  %v6146_v1 = vld [vmem:[#allocation8 + $0xe4] ss:$16 sps:$4 sm:$0xff]   ;;  %v6147_v7 = vld [vmem:[#allocation8 + $0x2e0] ss:$16 sps:$4 sm:$0xff]  }
  0xb8   :  { %v6197_v37 = vld [vmem:[#allocation8 + $0x3e4] ss:$16 sps:$4 sm:$0xff]   ;;  %v6219_v55 = vld [vmem:[#allocation8 + $0x360] ss:$16 sps:$4 sm:$0xff]  }
  0xb9   :  { %1055 = vmatmul.mubr.bf16.gmra.mxu0 %v6922_v8  ;;  %1168 = vmatmul.mubr.bf16.gmra.mxu1 %v6922_v8  ;;  %v6209_v46 = vld [vmem:[#allocation8 + $0x3a4] ss:$16 sps:$4 sm:$0xff]  }
  0xba   :  { %1219 = vmatpush2.bf16.msra.mxu0 %v5692_v9  ;;  %1332 = vmatpush2.bf16.msra.mxu1 %v5694_v12  ;;  %v6152_v9 = vld [vmem:[#allocation8 + $0xc4] ss:$16 sps:$4 sm:$0xff]   ;;  %v6153_v12 = vld [vmem:[#allocation8 + $0x2c0] ss:$16 sps:$4 sm:$0xff]  }
  0xbb   :  { %1220 = vmatprep.subr.bf16.mxu0 %v5685_v13  ;;  %1333 = vmatprep.subr.bf16.mxu1 %v5687_v17  ;;  %v6161_v13 = vld [vmem:[#allocation8 + $0x2a4] ss:$16 sps:$4 sm:$0xff]  }
  0xbc   :  { %1064 = vmatprep.mubr.bf16.mxu0 %v6924_v18  ;;  %1177 = vmatprep.mubr.bf16.mxu1 %v6924_v18  ;;  %v6164_v17 = vld [vmem:[#allocation8 + $0x84] ss:$16 sps:$4 sm:$0xff]  }
  0xbd   :  { %v6212_v50 = vld [vmem:[#allocation8 + $0x184] ss:$16 sps:$4 sm:$0xff]  }
  0xbe   :  { %1221 = vmatpush2.bf16.msra.mxu0 %v5684_v22  ;;  %1334 = vmatpush2.bf16.msra.mxu1 %v5686_v26  ;;  %v6168_v22 = vld [vmem:[#allocation8 + $0x60] ss:$16 sps:$4 sm:$0xff]   ;;  %v6176_v26 = vld [vmem:[#allocation8 + $0x44] ss:$16 sps:$4 sm:$0xff]  }
  0xbf   :  { %1222 = vmatprep.subr.bf16.mxu0 %v5677_v27  ;;  %1335 = vmatprep.subr.bf16.mxu1 %v5679_v33  ;;  %v6179_v27 = vld [vmem:[#allocation8 + $0x244] ss:$16 sps:$4 sm:$0xff]  }
  0xc0   :  { %v6188_v33 = vld [vmem:[#allocation8 + $0x4] ss:$16 sps:$4 sm:$0xff]  }
  0xc1   :  { %1065 = vmatmul.mubr.bf16.gmra.mxu0 %v6930_v34  ;;  %1178 = vmatmul.mubr.bf16.gmra.mxu1 %v6930_v34  ;;  %v6215_v51 = vld [vmem:[#allocation8 + $0x384] ss:$16 sps:$4 sm:$0xff]  }
  0xc2   :  { %1223 = vmatpush2.bf16.msra.mxu0 %v5676_v35  ;;  %1336 = vmatpush2.bf16.msra.mxu1 %v5678_v39  ;;  %v6191_v35 = vld [vmem:[#allocation8 + $0x204] ss:$16 sps:$4 sm:$0xff]   ;;  %v6192_v39 = vld [vmem:[#allocation8 + $0x1e0] ss:$16 sps:$4 sm:$0xff]  }
  0xc3   :  { %1224 = vmatprep.subr.bf16.mxu0 %v5669_v40  ;;  %1337 = vmatprep.subr.bf16.mxu1 %v5671_v43  ;;  %v6195_v40 = vld [vmem:[#allocation8 + $0x3e0] ss:$16 sps:$4 sm:$0xff]   ;;  %v6206_v43 = vld [vmem:[#allocation8 + $0x1a4] ss:$16 sps:$4 sm:$0xff]  }
  0xc4   :  { %1074 = vmatprep.mubr.bf16.mxu0 %v6932_v44  ;;  %1187 = vmatprep.mubr.bf16.mxu1 %v6932_v44 }
  0xc6   :  { %1225 = vmatpush2.bf16.msra.mxu0 %v5668_v49  ;;  %1338 = vmatpush2.bf16.msra.mxu1 %v5670_v52  ;;  %v6207_v49 = vld [vmem:[#allocation8 + $0x3a0] ss:$16 sps:$4 sm:$0xff]   ;;  %v6218_v52 = vld [vmem:[#allocation8 + $0x164] ss:$16 sps:$4 sm:$0xff]  }
  0xc7   :  { %1226 = vmatprep.subr.bf16.mxu0 %v5661_v53  ;;  %1339 = vmatprep.subr.bf16.mxu1 %v5663_v57  ;;  %v6221_v53 = vld [vmem:[#allocation8 + $0x364] ss:$16 sps:$4 sm:$0xff]  }
  0xc8   :  { %v6224_v57 = vld [vmem:[#allocation8 + $0x144] ss:$16 sps:$4 sm:$0xff]  }
  0xc9   :  { %1075 = vmatmul.mubr.bf16.gmra.mxu0 %v6938_v59  ;;  %1188 = vmatmul.mubr.bf16.gmra.mxu1 %v6938_v59 }
  0xca   :  { %1227 = vmatpush2.bf16.msra.mxu0 %v5660_v60  ;;  %1340 = vmatpush2.bf16.msra.mxu1 %v5662_v62  ;;  %v6225_v60 = vld [vmem:[#allocation8 + $0x340] ss:$16 sps:$4 sm:$0xff]   ;;  %v6230_v62 = vld [vmem:[#allocation8 + $0x124] ss:$16 sps:$4 sm:$0xff]  }
  0xcb   :  { %1228 = vmatprep.subr.bf16.mxu0 %v5653_v63  ;;  %1341 = vmatprep.subr.bf16.mxu1 %v5655_v0  ;;  %v6233_v63 = vld [vmem:[#allocation8 + $0x324] ss:$16 sps:$4 sm:$0xff]   ;;  %v6228_v0 = vld [vmem:[#allocation8 + $0x120] ss:$16 sps:$4 sm:$0xff]  }
  0xcc   :  { %1230 = vmatprep.mubr.bf16.mxu0 %v6878_v58  ;;  %1343 = vmatprep.mubr.bf16.mxu1 %v6878_v58  ;;  %v6158_v58 = vld [vmem:[#allocation8 + $0xa4] ss:$16 sps:$4 sm:$0xff]  }
  0xce   :  { %1229 = vmatpush2.bf16.msra.mxu0 %v5652_v2  ;;  %1342 = vmatpush2.bf16.msra.mxu1 %v5654_v5  ;;  %v6236_v2 = vld [vmem:[#allocation8 + $0x104] ss:$16 sps:$4 sm:$0xff]  }
  0xcf   :  { %3430 = vmatprep.subr.bf16.mxu0 %v6146_v1  ;;  %3543 = vmatprep.subr.bf16.mxu1 %v6149_v3  ;;  %v6231_v1 = vld [vmem:[#allocation8 + $0x320] ss:$16 sps:$4 sm:$0xff]   ;;  %v6239_v3 = vld [vmem:[#allocation8 + $0x304] ss:$16 sps:$4 sm:$0xff]  }
  0xd0   :  { %v6242_v5 = vld [vmem:[#allocation8 + $0x4e4] ss:$16 sps:$4 sm:$0xff]  }
  0xd1   :  { %1231 = vmatmul.mubr.bf16.vlgmr.msra.gmra.mxu0 %v6882_v15  ;;  %1344 = vmatmul.mubr.bf16.vlgmr.msra.gmra.mxu1 %v6882_v15  ;;  %v6162_v15 = vld [vmem:[#allocation8 + $0x80] ss:$16 sps:$4 sm:$0xff]  }
  0xd2   :  { %1240 = vmatprep.mubr.bf16.mxu0 %v6884_v23  ;;  %1353 = vmatprep.mubr.bf16.mxu1 %v6884_v23  ;;  %v6165_v23 = vld [vmem:[#allocation8 + $0x280] ss:$16 sps:$4 sm:$0xff]  }
  0xd3   :  { %3431 = vmatpush1.bf16.msra.mxu0 %v6144_v6  ;;  %3544 = vmatpush1.bf16.msra.mxu1 %v6147_v7  ;;  %v6245_v6 = vld [vmem:[#allocation8 + $0x6e4] ss:$16 sps:$4 sm:$0xff]   ;;  %v292_v7 = vlaneseq }
  0xd4   :  { %3432 = vmatprep.subr.bf16.mxu0 %v6152_v9  ;;  %3545 = vmatprep.subr.bf16.mxu1 %v6155_v10 }
  0xd5   :  { %v6974_v9 = vshrl.u32 %v292_v7, 7 }
  0xd7   :  { %3433 = vmatpush1.bf16.msra.mxu0 %v6150_v11  ;;  %3546 = vmatpush1.bf16.msra.mxu1 %v6153_v12  ;;  %8657 = vst [vmem:[#allocation19_spill] sm:$0xff] %v6974_v9  ;;  %v6977_v10 = vsub.s32 0, %v6974_v9  ;;  %v6980_v11 = vld [vmem:[#allocation7] sm:$0xff]  ;;  %v6983_v12 = vsub.s32 1, %v6974_v9 }
  0xd8   :  { %3434 = vmatprep.subr.bf16.mxu0 %v6158_v58  ;;  %3547 = vmatprep.subr.bf16.mxu1 %v6161_v13  ;;  %v8618_v58 = vsub.s32 3, %v6974_v9 }
  0xd9   :  { %1241 = vmatmul.mubr.bf16.gmra.mxu0 %v6890_v38  ;;  %1354 = vmatmul.mubr.bf16.gmra.mxu1 %v6890_v38  ;;  %v6174_v38 = vld [vmem:[#allocation8 + $0x40] ss:$16 sps:$4 sm:$0xff]   ;;  %8658 = vst [vmem:[#allocation20_spill] sm:$0xff] %v6977_v10  ;;  %8659 = vst [vmem:[#allocation21_spill] sm:$0xff] %v6983_v12  ;;  %v6988_v13 = vrot.slane %v6980_v11, %v6977_v10 }
  0xda   :  { %1250 = vmatprep.mubr.bf16.mxu0 %v6892_v45  ;;  %1363 = vmatprep.mubr.bf16.mxu1 %v6892_v45  ;;  %v6177_v45 = vld [vmem:[#allocation8 + $0x240] ss:$16 sps:$4 sm:$0xff]  }
  0xdb   :  { %3435 = vmatpush1.bf16.msra.mxu0 %v6156_v14  ;;  %3548 = vmatpush1.bf16.msra.mxu1 %v6159_v16 }
  0xdc   :  { %3436 = vmatprep.subr.bf16.mxu0 %v6164_v17  ;;  %3549 = vmatprep.subr.bf16.mxu1 %v6167_v19  ;;  %v6997_v17 = vrot.slane %v6980_v11, %v6983_v12 }
  0xdf   :  { %3437 = vmatpush1.bf16.msra.mxu0 %v6162_v15  ;;  %3550 = vmatpush1.bf16.msra.mxu1 %v6165_v23  ;;  %v7002_v23 = vrot.slane %v6980_v11, %v8618_v58  ;;  %v6296_v58 = vld [vmem:[#allocation8 + $0x5c4] ss:$16 sps:$4 sm:$0xff]  }
  0xe0   :  { %3438 = vmatprep.subr.bf16.mxu0 %v6170_v21  ;;  %3551 = vmatprep.subr.bf16.mxu1 %v6173_v24 }
  0xe1   :  { %1251 = vmatmul.mubr.bf16.gmra.mxu0 %v6898_v61  ;;  %1364 = vmatmul.mubr.bf16.gmra.mxu1 %v6898_v61  ;;  %v6186_v61 = vld [vmem:[#allocation8] ss:$16 sps:$4 sm:$0xff]  }
  0xe2   :  { %1260 = vmatprep.mubr.bf16.mxu0 %v6900_v4  ;;  %1373 = vmatprep.mubr.bf16.mxu1 %v6900_v4  ;;  %v6189_v4 = vld [vmem:[#allocation8 + $0x200] ss:$16 sps:$4 sm:$0xff]  }
  0xe3   :  { %3439 = vmatpush1.bf16.msra.mxu0 %v6168_v22  ;;  %3552 = vmatpush1.bf16.msra.mxu1 %v6171_v25 }
  0xe4   :  { %3440 = vmatprep.subr.bf16.mxu0 %v6176_v26  ;;  %3553 = vmatprep.subr.bf16.mxu1 %v6179_v27 }
  0xe7   :  { %3441 = vmatpush1.bf16.msra.mxu0 %v6174_v38  ;;  %3554 = vmatpush1.bf16.msra.mxu1 %v6177_v45 }
  0xe8   :  { %3442 = vmatprep.subr.bf16.mxu0 %v6182_v28  ;;  %3555 = vmatprep.subr.bf16.mxu1 %v6185_v29 }
  0xe9   :  { %1261 = vmatmul.mubr.bf16.gmra.mxu0 %v6906_v20  ;;  %1374 = vmatmul.mubr.bf16.gmra.mxu1 %v6906_v20  ;;  %v6198_v20 = vld [vmem:[#allocation8 + $0x1c0] ss:$16 sps:$4 sm:$0xff]  }
  0xea   :  { %1270 = vmatprep.mubr.bf16.mxu0 %v6908_v32  ;;  %1383 = vmatprep.mubr.bf16.mxu1 %v6908_v32  ;;  %v6201_v32 = vld [vmem:[#allocation8 + $0x3c0] ss:$16 sps:$4 sm:$0xff]  }
  0xeb   :  { %3443 = vmatpush1.bf16.msra.mxu0 %v6180_v30  ;;  %3556 = vmatpush1.bf16.msra.mxu1 %v6183_v31 }
  0xec   :  { %3444 = vmatprep.subr.bf16.mxu0 %v6188_v33  ;;  %3557 = vmatprep.subr.bf16.mxu1 %v6191_v35 }
  0xef   :  { %3445 = vmatpush1.bf16.msra.mxu0 %v6186_v61  ;;  %3558 = vmatpush1.bf16.msra.mxu1 %v6189_v4 }
  0xf0   :  { %3446 = vmatprep.subr.bf16.mxu0 %v6194_v36  ;;  %3559 = vmatprep.subr.bf16.mxu1 %v6197_v37 }
  0xf1   :  { %1271 = vmatmul.mubr.bf16.gmra.mxu0 %v6914_v47  ;;  %1384 = vmatmul.mubr.bf16.gmra.mxu1 %v6914_v47  ;;  %v6210_v47 = vld [vmem:[#allocation8 + $0x180] ss:$16 sps:$4 sm:$0xff]  }
  0xf2   :  { %1280 = vmatprep.mubr.bf16.mxu0 %v6916_v56  ;;  %1393 = vmatprep.mubr.bf16.mxu1 %v6916_v56  ;;  %v6213_v56 = vld [vmem:[#allocation8 + $0x380] ss:$16 sps:$4 sm:$0xff]  }
  0xf3   :  { %3447 = vmatpush2.bf16.msra.mxu0 %v6192_v39  ;;  %3560 = vmatpush2.bf16.msra.mxu1 %v6195_v40 }
  0xf4   :  { %3448 = vmatprep.subr.bf16.mxu0 %v6200_v41  ;;  %3561 = vmatprep.subr.bf16.mxu1 %v6203_v42 }
  0xf7   :  { %3449 = vmatpush2.bf16.msra.mxu0 %v6198_v20  ;;  %3562 = vmatpush2.bf16.msra.mxu1 %v6201_v32 }
  0xf8   :  { %3450 = vmatprep.subr.bf16.mxu0 %v6206_v43  ;;  %3563 = vmatprep.subr.bf16.mxu1 %v6209_v46 }
  0xf9   :  { %1281 = vmatmul.mubr.bf16.gmra.mxu0 %v6922_v8  ;;  %1394 = vmatmul.mubr.bf16.gmra.mxu1 %v6922_v8  ;;  %v6227_v8 = vld [vmem:[#allocation8 + $0x344] ss:$16 sps:$4 sm:$0xff]  }
  0xfa   :  { %1290 = vmatprep.mubr.bf16.mxu0 %v6924_v18  ;;  %1403 = vmatprep.mubr.bf16.mxu1 %v6924_v18  ;;  %v6222_v18 = vld [vmem:[#allocation8 + $0x140] ss:$16 sps:$4 sm:$0xff]  }
  0xfb   :  { %3451 = vmatpush2.bf16.msra.mxu0 %v6204_v48  ;;  %3564 = vmatpush2.bf16.msra.mxu1 %v6207_v49 }
  0xfc   :  { %3452 = vmatprep.subr.bf16.mxu0 %v6212_v50  ;;  %3565 = vmatprep.subr.bf16.mxu1 %v6215_v51 }
  0xff   :  { %3453 = vmatpush2.bf16.msra.mxu0 %v6210_v47  ;;  %3566 = vmatpush2.bf16.msra.mxu1 %v6213_v56 }
 0x100   :  { %3454 = vmatprep.subr.bf16.mxu0 %v6218_v52  ;;  %3567 = vmatprep.subr.bf16.mxu1 %v6221_v53 }
 0x101   :  { %1291 = vmatmul.mubr.bf16.gmra.mxu0 %v6930_v34  ;;  %1404 = vmatmul.mubr.bf16.gmra.mxu1 %v6930_v34  ;;  %v6234_v34 = vld [vmem:[#allocation8 + $0x100] ss:$16 sps:$4 sm:$0xff]  }
 0x102   :  { %1300 = vmatprep.mubr.bf16.mxu0 %v6932_v44  ;;  %1413 = vmatprep.mubr.bf16.mxu1 %v6932_v44  ;;  %v6237_v44 = vld [vmem:[#allocation8 + $0x300] ss:$16 sps:$4 sm:$0xff]  }
 0x103   :  { %3455 = vmatpush2.bf16.msra.mxu0 %v6216_v54  ;;  %3568 = vmatpush2.bf16.msra.mxu1 %v6219_v55 }
 0x104   :  { %3456 = vmatprep.subr.bf16.mxu0 %v6224_v57  ;;  %3569 = vmatprep.subr.bf16.mxu1 %v6227_v8  ;;  %v6240_v57 = vld [vmem:[#allocation8 + $0x4e0] ss:$16 sps:$4 sm:$0xff]  }
 0x107   :  { %3457 = vmatpush2.bf16.msra.mxu0 %v6222_v18  ;;  %3570 = vmatpush2.bf16.msra.mxu1 %v6225_v60 }
 0x108   :  { %3458 = vmatprep.subr.bf16.mxu0 %v6230_v62  ;;  %3571 = vmatprep.subr.bf16.mxu1 %v6233_v63 }
 0x109   :  { %1301 = vmatmul.mubr.bf16.gmra.mxu0 %v6938_v59  ;;  %1414 = vmatmul.mubr.bf16.gmra.mxu1 %v6938_v59  ;;  %v8619_v59 = vsub.s32 2, %v6974_v9 }
 0x10b   :  { %3459 = vmatpush2.bf16.msra.mxu0 %v6228_v0  ;;  %3572 = vmatpush2.bf16.msra.mxu1 %v6231_v1  ;;  %v6993_v14 = vrot.slane %v6980_v11, %v8619_v59  ;;  %v6248_v0 = vld [vmem:[#allocation8 + $0x4c4] ss:$16 sps:$4 sm:$0xff]  }
 0x10c   :  { %3460 = vmatprep.subr.bf16.mxu0 %v6236_v2  ;;  %3573 = vmatprep.subr.bf16.mxu1 %v6239_v3 }
 0x10f   :  { %3461 = vmatpush2.bf16.msra.mxu0 %v6234_v34  ;;  %3574 = vmatpush2.bf16.msra.mxu1 %v6237_v44 }
 0x110   :  { %3656 = vmatprep.subr.bf16.mxu0 %v6242_v5  ;;  %3769 = vmatprep.subr.bf16.mxu1 %v6245_v6  ;;  %v6243_v5 = vld [vmem:[#allocation8 + $0x6e0] ss:$16 sps:$4 sm:$0xff]   ;;  %v6251_v6 = vld [vmem:[#allocation8 + $0x6c4] ss:$16 sps:$4 sm:$0xff]  }
 0x151   :  { %v1006_v16 = vpop.f32.mrf.mxu0  ;;  %v1119_v19 = vpop.f32.mrf.mxu1 }
 0x152   :  { %v1007_v21 = vadd.f32 %v1006_v16, %v6988_v13  ;;  %v1120_v22 = vadd.f32 %v1119_v19, %v6993_v14 }
 0x153   :  { %v1008_v15 = vpop.f32.mrf.mxu0  ;;  %v1121_v24 = vpop.f32.mrf.mxu1 }
 0x154   :  { %v1009_v25 = vadd.f32 %v1008_v15, %v6997_v17  ;;  %v1122_v45 = vadd.f32 %v1121_v24, %v7002_v23  ;;  %v1552_v30 = vmul.f32 0.2, %v1007_v21  ;;  %v1554_v31 = vmul.f32 0.2, %v1120_v22 }
 0x155   :  { %v1010_v26 = vpop.f32.mrf.mxu0  ;;  %v1123_v38 = vpop.f32.mrf.mxu1  ;;  %vm1424_vm4 = vcmp.gt.f32.partialorder %v1007_v21, 0.0  ;;  %vm1426_vm6 = vcmp.gt.f32.partialorder %v1120_v22, 0.0 }
 0x156   :  { %v1011_v27 = vadd.f32 %v1010_v26, %v6988_v13  ;;  %v1124_v28 = vadd.f32 %v1123_v38, %v6993_v14  ;;  %v1553_v4 = vmul.f32 0.2, %v1009_v25  ;;  %vm1425_vm1 = vcmp.gt.f32.partialorder %v1009_v25, 0.0 }
 0x157   :  { %v1012_v29 = vpop.f32.mrf.mxu0  ;;  %v1125_v61 = vpop.f32.mrf.mxu1  ;;  %v1555_v42 = vmul.f32 0.2, %v1122_v45  ;;  %vm1427_vm7 = vcmp.gt.f32.partialorder %v1122_v45, 0.0  ;;  %v1680_v56 = vsel %vm1424_vm4, %v1007_v21, %v1552_v30  ;;  %v1682_v8 = vsel %vm1426_vm6, %v1120_v22, %v1554_v31  ;;  %v6246_v22 = vld [vmem:[#allocation8 + $0x4c0] ss:$16 sps:$4 sm:$0xff]  }
 0x158   :  { %v1560_v33 = vmul.f32 0.2, %v1011_v27  ;;  %v1013_v35 = vadd.f32 %v1012_v29, %v6997_v17  ;;  %vm1432_vm0 = vcmp.gt.f32.partialorder %v1011_v27, 0.0  ;;  %v1562_v36 = vmul.f32 0.2, %v1124_v28 }
 0x159   :  { %v1126_v37 = vadd.f32 %v1125_v61, %v7002_v23  ;;  %v1016_v39 = vpop.f32.mrf.mxu0  ;;  %vm1434_vm2 = vcmp.gt.f32.partialorder %v1124_v28, 0.0  ;;  %v1129_v41 = vpop.f32.mrf.mxu1  ;;  %v1681_v47 = vsel %vm1425_vm1, %v1009_v25, %v1553_v4  ;;  %v1683_v63 = vsel %vm1427_vm7, %v1122_v45, %v1555_v42 }
 0x15a   :  { %vm1433_vm3 = vcmp.gt.f32.partialorder %v1013_v35, 0.0  ;;  %v1561_v40 = vmul.f32 0.2, %v1013_v35  ;;  %v1688_v43 = vsel %vm1432_vm0, %v1011_v27, %v1560_v33  ;;  %v1690_v48 = vsel %vm1434_vm2, %v1124_v28, %v1562_v36  ;;  %v6254_v27 = vld [vmem:[#allocation8 + $0x4a4] ss:$16 sps:$4 sm:$0xff]  }
 0x15b   :  { %vm1435_vm5 = vcmp.gt.f32.partialorder %v1126_v37, 0.0  ;;  %v1563_v20 = vmul.f32 0.2, %v1126_v37  ;;  %v1018_v32 = vpop.f32.mrf.mxu0  ;;  %v1131_v46 = vpop.f32.mrf.mxu1  ;;  %v7020_v18 = vpack.c.bf16 %v1688_v43, %v1680_v56  ;;  %v1017_v60 = vadd.f32 %v1016_v39, %v6988_v13  ;;  %v6249_v33 = vld [vmem:[#allocation8 + $0x6c0] ss:$16 sps:$4 sm:$0xff]  }
 0x15c   :  { %v1019_v49 = vadd.f32 %v1018_v32, %v6997_v17  ;;  %v1689_v51 = vsel %vm1433_vm3, %v1013_v35, %v1561_v40  ;;  %v7024_v1 = vpack.c.bf16 %v1690_v48, %v1682_v8  ;;  %v7027_v2 = vadd.f32 %v1129_v41, %v6993_v14  ;;  %v6257_v41 = vld [vmem:[#allocation8 + $0x6a4] ss:$16 sps:$4 sm:$0xff]  }
 0x15d   :  { %v1020_v50 = vpop.f32.mrf.mxu0  ;;  %v1133_v53 = vpop.f32.mrf.mxu1  ;;  %v7017_v54 = vpack.c.bf16 %v1689_v51, %v1681_v47  ;;  %v1691_v55 = vsel %vm1435_vm5, %v1126_v37, %v1563_v20  ;;  %v1132_v3 = vadd.f32 %v1131_v46, %v7002_v23  ;;  %v1568_v38 = vmul.f32 0.2, %v1017_v60  ;;  %v6252_v46 = vld [vmem:[#allocation8 + $0x4a0] ss:$16 sps:$4 sm:$0xff]  }
 0x15e   :  { %v1021_v52 = vadd.f32 %v1020_v50, %v6988_v13  ;;  %v1569_v7 = vmul.f32 0.2, %v1019_v49  ;;  %v7033_v15 = vpack.c.bf16 %v1691_v55, %v1683_v63  ;;  %v1134_v24 = vadd.f32 %v1133_v53, %v6993_v14  ;;  %v6260_v55 = vld [vmem:[#allocation8 + $0x484] ss:$16 sps:$4 sm:$0xff]  }
 0x15f   :  { %v1022_v62 = vpop.f32.mrf.mxu0  ;;  %v1135_v44 = vpop.f32.mrf.mxu1  ;;  %3462 = vmatprep.mubr.bf16.mxu0 %v7017_v54  ;;  %vm1441_vm10 = vcmp.gt.f32.partialorder %v1019_v49, 0.0  ;;  %vm1440_vm11 = vcmp.gt.f32.partialorder %v1017_v60, 0.0  ;;  %v1571_v29 = vmul.f32 0.2, %v1132_v3  ;;  %vm1443_vm13 = vcmp.gt.f32.partialorder %v1132_v3, 0.0 }
 0x160   :  { %v1023_v34 = vadd.f32 %v1022_v62, %v6997_v17  ;;  %v1576_v16 = vmul.f32 0.2, %v1021_v52  ;;  %v1136_v19 = vadd.f32 %v1135_v44, %v7002_v23  ;;  %3463 = vmatmul.mubr.bf16.vlgmr.msra.gmra.mxu0 %v7020_v18  ;;  %vm1448_vm8 = vcmp.gt.f32.partialorder %v1021_v52, 0.0  ;;  %3575 = vmatprep.mubr.bf16.mxu1 %v7033_v15 }
 0x161   :  { %v1026_v21 = vpop.f32.mrf.mxu0  ;;  %v1139_v26 = vpop.f32.mrf.mxu1  ;;  %3657 = vmatpush1.bf16.msra.mxu0 %v6240_v57  ;;  %3576 = vmatmul.mubr.bf16.vlgmr.msra.gmra.mxu1 %v7024_v1  ;;  %v1570_v4 = vmul.f32 0.2, %v7027_v2  ;;  %v1578_v36 = vmul.f32 0.2, %v1134_v24  ;;  %v1697_v40 = vsel %vm1441_vm10, %v1019_v49, %v1569_v7  ;;  %vm1450_vm14 = vcmp.gt.f32.partialorder %v1134_v24, 0.0 }
 0x162   :  { %vm1449_vm9 = vcmp.gt.f32.partialorder %v1023_v34, 0.0  ;;  %v1577_v25 = vmul.f32 0.2, %v1023_v34  ;;  %v1579_v45 = vmul.f32 0.2, %v1136_v19  ;;  %3658 = vmatprep.subr.bf16.mxu0 %v6248_v0  ;;  %vm1451_vm12 = vcmp.gt.f32.partialorder %v1136_v19, 0.0  ;;  %3770 = vmatpush1.bf16.msra.mxu1 %v6243_v5 }
 0x163   :  { %v1028_v28 = vpop.f32.mrf.mxu0  ;;  %v1141_v30 = vpop.f32.mrf.mxu1  ;;  %v1704_v61 = vsel %vm1448_vm8, %v1021_v52, %v1576_v16  ;;  %3771 = vmatprep.subr.bf16.mxu1 %v6251_v6  ;;  %v1696_v43 = vsel %vm1440_vm11, %v1017_v60, %v1568_v38  ;;  %vm1442_vm15 = vcmp.gt.f32.partialorder %v7027_v2, 0.0  ;;  %v1699_v50 = vsel %vm1443_vm13, %v1132_v3, %v1571_v29  ;;  %v6255_v52 = vld [vmem:[#allocation8 + $0x6a0] ss:$16 sps:$4 sm:$0xff]   ;;  %v6263_v0 = vld [vmem:[#allocation8 + $0x684] ss:$16 sps:$4 sm:$0xff]  }
 0x164   :  { %v1705_v31 = vsel %vm1449_vm9, %v1023_v34, %v1577_v25  ;;  %v7043_v37 = vadd.f32 %v1028_v28, %v6997_v17  ;;  %v1707_v32 = vsel %vm1451_vm12, %v1136_v19, %v1579_v45  ;;  %v7052_v47 = vpack.c.bf16 %v1704_v61, %v1696_v43  ;;  %v6258_v6 = vld [vmem:[#allocation8 + $0x480] ss:$16 sps:$4 sm:$0xff]   ;;  %v6269_v38 = vld [vmem:[#allocation8 + $0x664] ss:$16 sps:$4 sm:$0xff]  }
 0x165   :  { %v1030_v35 = vpop.f32.mrf.mxu0  ;;  %v1143_v39 = vpop.f32.mrf.mxu1  ;;  %3659 = vmatpush1.bf16.msra.mxu0 %v6246_v22  ;;  %v7046_v20 = vpack.c.bf16 %v1705_v31, %v1697_v40  ;;  %v7055_v49 = vadd.f32 %v1026_v21, %v6988_v13  ;;  %v7061_v57 = vadd.f32 %v1139_v26, %v6993_v14  ;;  %v7064_v60 = vpack.c.bf16 %v1707_v32, %v1699_v50  ;;  %v6261_v22 = vld [vmem:[#allocation8 + $0x680] ss:$16 sps:$4 sm:$0xff]   ;;  %v6272_v31 = vld [vmem:[#allocation8 + $0x444] ss:$16 sps:$4 sm:$0xff]  }
 0x166   :  { %3660 = vmatprep.subr.bf16.mxu0 %v6254_v27  ;;  %3772 = vmatpush1.bf16.msra.mxu1 %v6249_v33  ;;  %v1585_v8 = vmul.f32 0.2, %v7043_v37  ;;  %v1706_v62 = vsel %vm1450_vm14, %v1134_v24, %v1578_v36  ;;  %v1142_v3 = vadd.f32 %v1141_v30, %v7002_v23  ;;  %v1698_v44 = vsel %vm1442_vm15, %v7027_v2, %v1570_v4  ;;  %v6266_v24 = vld [vmem:[#allocation8 + $0x464] ss:$16 sps:$4 sm:$0xff]   ;;  %v6264_v27 = vld [vmem:[#allocation8 + $0x460] ss:$16 sps:$4 sm:$0xff]  }
 0x167   :  { %v1032_v42 = vpop.f32.mrf.mxu0  ;;  %v1145_v48 = vpop.f32.mrf.mxu1  ;;  %3472 = vmatprep.mubr.bf16.mxu0 %v7046_v20  ;;  %3773 = vmatprep.subr.bf16.mxu1 %v6257_v41  ;;  %vm1457_vm1 = vcmp.gt.f32.partialorder %v7043_v37, 0.0  ;;  %v1031_v7 = vadd.f32 %v1030_v35, %v6988_v13  ;;  %v1144_v16 = vadd.f32 %v1143_v39, %v6993_v14  ;;  %v7076_v19 = vpack.c.bf16 %v1706_v62, %v1698_v44 }
 0x168   :  { %v1033_v51 = vadd.f32 %v1032_v42, %v6997_v17  ;;  %v1146_v56 = vadd.f32 %v1145_v48, %v7002_v23  ;;  %3473 = vmatmul.mubr.bf16.gmra.mxu0 %v7052_v47  ;;  %3585 = vmatprep.mubr.bf16.mxu1 %v7064_v60  ;;  %v310_v45 = vsub.s32 4, %v6974_v9  ;;  %v318_v28 = vsub.s32 6, %v6974_v9 }
 0x169   :  { %v1036_v53 = vpop.f32.mrf.mxu0  ;;  %v1149_v63 = vpop.f32.mrf.mxu1  ;;  %3661 = vmatpush1.bf16.msra.mxu0 %v6252_v46  ;;  %vm1456_vm2 = vcmp.gt.f32.partialorder %v7055_v49, 0.0  ;;  %v1584_v29 = vmul.f32 0.2, %v7055_v49  ;;  %3586 = vmatmul.mubr.bf16.gmra.mxu1 %v7076_v19  ;;  %v314_v33 = vsub.s32 5, %v6974_v9  ;;  %vm1458_vm4 = vcmp.gt.f32.partialorder %v7061_v57, 0.0 }
 0x16a   :  { %vm1465_vm0 = vcmp.gt.f32.partialorder %v1033_v51, 0.0  ;;  %v1593_v34 = vmul.f32 0.2, %v1033_v51  ;;  %v1595_v25 = vmul.f32 0.2, %v1146_v56  ;;  %3774 = vmatpush1.bf16.msra.mxu1 %v6255_v52  ;;  %3662 = vmatprep.subr.bf16.mxu0 %v6260_v55  ;;  %vm1467_vm3 = vcmp.gt.f32.partialorder %v1146_v56, 0.0 }
 0x16b   :  { %v1038_v5 = vpop.f32.mrf.mxu0  ;;  %v1151_v21 = vpop.f32.mrf.mxu1  ;;  %3775 = vmatprep.subr.bf16.mxu1 %v6263_v0  ;;  %v1586_v35 = vmul.f32 0.2, %v7061_v57  ;;  %v1587_v61 = vmul.f32 0.2, %v1142_v3  ;;  %v1713_v36 = vsel %vm1457_vm1, %v7043_v37, %v1585_v8  ;;  %vm1459_vm5 = vcmp.gt.f32.partialorder %v1142_v3, 0.0 }
 0x16c   :  { %v1721_v26 = vsel %vm1465_vm0, %v1033_v51, %v1593_v34  ;;  %v1592_v39 = vmul.f32 0.2, %v1031_v7  ;;  %v1594_v40 = vmul.f32 0.2, %v1144_v16  ;;  %vm1464_vm6 = vcmp.gt.f32.partialorder %v1031_v7, 0.0 }
 0x16d   :  { %v1040_v2 = vpop.f32.mrf.mxu0  ;;  %v1153_v30 = vpop.f32.mrf.mxu1  ;;  %3663 = vmatpush1.bf16.msra.mxu0 %v6258_v6  ;;  %v7090_v42 = vpack.c.bf16 %v1721_v26, %v1713_v36  ;;  %vm1466_vm7 = vcmp.gt.f32.partialorder %v1144_v16, 0.0  ;;  %v7093_v32 = vadd.f32 %v1036_v53, %v6988_v13  ;;  %v1723_v43 = vsel %vm1467_vm3, %v1146_v56, %v1595_v25  ;;  %v6267_v46 = vld [vmem:[#allocation8 + $0x660] ss:$16 sps:$4 sm:$0xff]   ;;  %v6275_v55 = vld [vmem:[#allocation8 + $0x644] ss:$16 sps:$4 sm:$0xff]  }
 0x16e   :  { %3664 = vmatprep.subr.bf16.mxu0 %v6266_v24  ;;  %3776 = vmatpush1.bf16.msra.mxu1 %v6261_v22  ;;  %v7097_v50 = vadd.f32 %v1149_v63, %v6993_v14  ;;  %v7100_v37 = vadd.f32 %v1038_v5, %v6997_v17  ;;  %v7106_v8 = vadd.f32 %v1151_v21, %v7002_v23  ;;  %v6270_v22 = vld [vmem:[#allocation8 + $0x440] ss:$16 sps:$4 sm:$0xff]  }
 0x16f   :  { %v1042_v4 = vpop.f32.mrf.mxu0  ;;  %v1155_v41 = vpop.f32.mrf.mxu1  ;;  %3482 = vmatprep.mubr.bf16.mxu0 %v7090_v42  ;;  %3777 = vmatprep.subr.bf16.mxu1 %v6269_v38  ;;  %v1715_v62 = vsel %vm1459_vm5, %v1142_v3, %v1587_v61  ;;  %v1712_v63 = vsel %vm1456_vm2, %v7055_v49, %v1584_v29  ;;  %v1720_v44 = vsel %vm1464_vm6, %v1031_v7, %v1592_v39  ;;  %v6273_v25 = vld [vmem:[#allocation8 + $0x640] ss:$16 sps:$4 sm:$0xff]   ;;  %vm1472_vm8 = vcmp.gt.f32.partialorder %v7093_v32, 0.0 }
 0x170   :  { %v1043_v51 = vadd.f32 %v1042_v4, %v6997_v17  ;;  %v7109_v56 = vadd.f32 %v1155_v41, %v7002_v23  ;;  %v7115_v34 = vpack.c.bf16 %v1723_v43, %v1715_v62  ;;  %v1714_v5 = vsel %vm1458_vm4, %v7061_v57, %v1586_v35  ;;  %v6276_v29 = vld [vmem:[#allocation8 + $0x420] ss:$16 sps:$4 sm:$0xff]  }
 0x171   :  { %v1046_v48 = vpop.f32.mrf.mxu0  ;;  %v1159_v52 = vpop.f32.mrf.mxu1  ;;  %3665 = vmatpush1.bf16.msra.mxu0 %v6264_v27  ;;  %v1722_v6 = vsel %vm1466_vm7, %v1144_v16, %v1594_v40  ;;  %v1041_v3 = vadd.f32 %v1040_v2, %v6988_v13  ;;  %v7123_v24 = vpack.c.bf16 %v1720_v44, %v1712_v63  ;;  %v6278_v27 = vld [vmem:[#allocation8 + $0x424] ss:$16 sps:$4 sm:$0xff]   ;;  %v7128_v7 = vrot.slane %v6980_v11, %v310_v45  ;;  %v6279_v4 = vld [vmem:[#allocation8 + $0x620] ss:$16 sps:$4 sm:$0xff]  }
 0x172   :  { %3666 = vmatprep.subr.bf16.mxu0 %v6272_v31  ;;  %v7125_v49 = vpack.c.bf16 %v1722_v6, %v1714_v5  ;;  %3778 = vmatpush1.bf16.msra.mxu1 %v6267_v46  ;;  %v1600_v57 = vmul.f32 0.2, %v7093_v32  ;;  %v1154_v16 = vadd.f32 %v1153_v30, %v6993_v14  ;;  %v1609_v38 = vmul.f32 0.2, %v1043_v51  ;;  %v6281_v31 = vld [vmem:[#allocation8 + $0x624] ss:$16 sps:$4 sm:$0xff]  }
 0x173   :  { %v1048_v0 = vpop.f32.mrf.mxu0  ;;  %v1161_v21 = vpop.f32.mrf.mxu1  ;;  %3595 = vmatprep.mubr.bf16.mxu1 %v7115_v34  ;;  %3779 = vmatprep.subr.bf16.mxu1 %v6275_v55  ;;  %v7136_v35 = vrot.slane %v6980_v11, %v318_v28  ;;  %v1602_v45 = vmul.f32 0.2, %v7097_v50  ;;  %v1601_v61 = vmul.f32 0.2, %v7100_v37  ;;  %vm1481_vm9 = vcmp.gt.f32.partialorder %v1043_v51, 0.0 }
 0x174   :  { %3483 = vmatmul.mubr.bf16.gmra.mxu0 %v7123_v24  ;;  %3596 = vmatmul.mubr.bf16.gmra.mxu1 %v7125_v49  ;;  %vm1474_vm10 = vcmp.gt.f32.partialorder %v7097_v50, 0.0  ;;  %vm1473_vm11 = vcmp.gt.f32.partialorder %v7100_v37, 0.0  ;;  %v1603_v28 = vmul.f32 0.2, %v7106_v8  ;;  %v1611_v36 = vmul.f32 0.2, %v7109_v56 }
 0x175   :  { %v1050_v26 = vpop.f32.mrf.mxu0  ;;  %v1163_v2 = vpop.f32.mrf.mxu1  ;;  %3667 = vmatpush1.bf16.msra.mxu0 %v6270_v22  ;;  %vm1475_vm12 = vcmp.gt.f32.partialorder %v7106_v8, 0.0  ;;  %vm1480_vm13 = vcmp.gt.f32.partialorder %v1041_v3, 0.0  ;;  %v1608_v40 = vmul.f32 0.2, %v1041_v3  ;;  %vm1483_vm14 = vcmp.gt.f32.partialorder %v7109_v56, 0.0 }
 0x176   :  { %3780 = vmatpush1.bf16.msra.mxu1 %v6273_v25  ;;  %3668 = vmatprep.subr.bf16.mxu0 %v6278_v27  ;;  %vm1482_vm15 = vcmp.gt.f32.partialorder %v1154_v16, 0.0  ;;  %v1610_v43 = vmul.f32 0.2, %v1154_v16  ;;  %v7150_v46 = vadd.f32 %v1046_v48, %v6988_v13  ;;  %v1737_v55 = vsel %vm1481_vm9, %v1043_v51, %v1609_v38  ;;  %v6284_v48 = vld [vmem:[#allocation8 + $0x404] ss:$16 sps:$4 sm:$0xff]  }
 0x177   :  { %v1052_v30 = vpop.f32.mrf.mxu0  ;;  %v1165_v39 = vpop.f32.mrf.mxu1  ;;  %3781 = vmatprep.subr.bf16.mxu1 %v6281_v31  ;;  %v7156_v63 = vadd.f32 %v1159_v52, %v6993_v14  ;;  %v1729_v6 = vsel %vm1473_vm11, %v7100_v37, %v1601_v61  ;;  %v7166_v25 = vadd.f32 %v1048_v0, %v6997_v17  ;;  %v1731_v52 = vsel %vm1475_vm12, %v7106_v8, %v1603_v28  ;;  %v6287_v31 = vld [vmem:[#allocation8 + $0x604] ss:$16 sps:$4 sm:$0xff]   ;;  %v6282_v8 = vld [vmem:[#allocation8 + $0x400] ss:$16 sps:$4 sm:$0xff]  }
 0x178   :  { %v1053_v44 = vadd.f32 %v1052_v30, %v6997_v17  ;;  %v1166_v5 = vadd.f32 %v1165_v39, %v7002_v23  ;;  %v7168_v51 = vpack.c.bf16 %v1737_v55, %v1729_v6  ;;  %v1739_v27 = vsel %vm1483_vm14, %v7109_v56, %v1611_v36  ;;  %v6288_v6 = vld [vmem:[#allocation8 + $0x5e0] ss:$16 sps:$4 sm:$0xff]  }
 0x179   :  { %v1056_v41 = vpop.f32.mrf.mxu0  ;;  %v7153_v62 = vpop.f32.mrf.mxu1  ;;  %3669 = vmatpush1.bf16.msra.mxu0 %v6276_v29  ;;  %v7177_v37 = vadd.f32 %v1161_v21, %v7002_v23  ;;  %v7179_v61 = vpack.c.bf16 %v1739_v27, %v1731_v52  ;;  %v1728_v0 = vsel %vm1472_vm8, %v7093_v32, %v1600_v57  ;;  %v1736_v30 = vsel %vm1480_vm13, %v1041_v3, %v1608_v40  ;;  %v6285_v32 = vld [vmem:[#allocation8 + $0x600] ss:$16 sps:$4 sm:$0xff]   ;;  %v6290_v3 = vld [vmem:[#allocation8 + $0x5e4] ss:$16 sps:$4 sm:$0xff]  }
 0x17a   :  { %3782 = vmatpush1.bf16.msra.mxu1 %v6279_v4  ;;  %v7188_v56 = vadd.f32 %v1050_v26, %v6988_v13  ;;  %3492 = vmatprep.mubr.bf16.mxu0 %v7168_v51  ;;  %v7191_v29 = vpack.c.bf16 %v1736_v30, %v1728_v0  ;;  %v1730_v21 = vsel %vm1474_vm10, %v7097_v50, %v1602_v45  ;;  %v1625_v39 = vmul.f32 0.2, %v1053_v44  ;;  %v6293_v52 = vld [vmem:[#allocation8 + $0x7e4] ss:$16 sps:$4 sm:$0xff]  }
 0x17b   :  { %v7163_v22 = vpop.f32.mrf.mxu0  ;;  %v1171_v38 = vpop.f32.mrf.mxu1  ;;  %8660 = vst [vmem:[#allocation22_spill] sm:$0xff] %v7179_v61  ;;  %v1738_v36 = vsel %vm1482_vm15, %v1154_v16, %v1610_v43  ;;  %v1164_v4 = vadd.f32 %v1163_v2, %v6993_v14  ;;  %v1627_v40 = vmul.f32 0.2, %v1166_v5  ;;  %3605 = vmatprep.mubr.bf16.mxu1 %v7179_v61  ;;  %3670 = vmatprep.subr.bf16.mxu0 %v6284_v48  ;;  %vm1488_vm0 = vcmp.gt.f32.partialorder %v7150_v46, 0.0  ;;  %v6291_v2 = vld [vmem:[#allocation8 + $0x7e0] ss:$16 sps:$4 sm:$0xff]  }
 0x17c   :  { %8661 = vst [vmem:[#allocation23_spill] sm:$0xff] %v7191_v29  ;;  %v7201_v26 = vpack.c.bf16 %v1738_v36, %v1730_v21  ;;  %v1616_v50 = vmul.f32 0.2, %v7150_v46  ;;  %vm1497_vm1 = vcmp.gt.f32.partialorder %v1053_v44, 0.0  ;;  %vm1499_vm2 = vcmp.gt.f32.partialorder %v1166_v5, 0.0  ;;  %3493 = vmatmul.mubr.bf16.gmra.mxu0 %v7191_v29  ;;  %3783 = vmatprep.subr.bf16.mxu1 %v6287_v31 }
 0x17d   :  { %v7185_v28 = vpop.f32.mrf.mxu0  ;;  %v7197_v57 = vpop.f32.mrf.mxu1  ;;  %vm1490_vm3 = vcmp.gt.f32.partialorder %v7156_v63, 0.0  ;;  %v1617_v45 = vmul.f32 0.2, %v7166_v25  ;;  %v1619_v43 = vmul.f32 0.2, %v7177_v37  ;;  %v7211_v48 = vadd.f32 %v1056_v41, %v6988_v13  ;;  %3671 = vmatpush1.bf16.msra.mxu0 %v6282_v8 }
 0x17e   :  { %8662 = vst [vmem:[#allocation24_spill] sm:$0xff] %v7201_v26  ;;  %3606 = vmatmul.mubr.bf16.gmra.mxu1 %v7201_v26  ;;  %v1618_v0 = vmul.f32 0.2, %v7156_v63  ;;  %vm1489_vm4 = vcmp.gt.f32.partialorder %v7166_v25, 0.0  ;;  %vm1491_vm5 = vcmp.gt.f32.partialorder %v7177_v37, 0.0  ;;  %vm1496_vm6 = vcmp.gt.f32.partialorder %v7188_v56, 0.0  ;;  %3672 = vmatprep.subr.bf16.mxu0 %v6290_v3 }
 0x17f   :  { %v1062_v55 = vpop.f32.mrf.mxu0  ;;  %v1175_v16 = vpop.f32.mrf.mxu1  ;;  %v1624_v31 = vmul.f32 0.2, %v7188_v56  ;;  %3784 = vmatpush1.bf16.msra.mxu1 %v6285_v32  ;;  %v1626_v21 = vmul.f32 0.2, %v1164_v4  ;;  %v1753_v41 = vsel %vm1497_vm1, %v1053_v44, %v1625_v39  ;;  %v1755_v8 = vsel %vm1499_vm2, %v1166_v5, %v1627_v40 }
 0x180   :  { %vm1498_vm7 = vcmp.gt.f32.partialorder %v1164_v4, 0.0  ;;  %v7228_v59 = vadd.f32 %v7153_v62, %v6993_v14  ;;  %v7232_v32 = vadd.f32 %v7163_v22, %v6997_v17  ;;  %v7235_v53 = vadd.f32 %v1171_v38, %v7002_v23  ;;  %3785 = vmatprep.subr.bf16.mxu1 %v6293_v52  ;;  %v6299_v38 = vld [vmem:[#allocation8 + $0x7c4] ss:$16 sps:$4 sm:$0xff]  }
 0x181   :  { %v7213_v27 = vpop.f32.mrf.mxu0  ;;  %v7219_v30 = vpop.f32.mrf.mxu1  ;;  %vm1504_vm8 = vcmp.gt.f32.partialorder %v7211_v48, 0.0  ;;  %v7241_v5 = vadd.f32 %v1062_v55, %v6997_v17  ;;  %v7244_v3 = vadd.f32 %v1175_v16, %v7002_v23  ;;  %v1745_v62 = vsel %vm1489_vm4, %v7166_v25, %v1617_v45  ;;  %3673 = vmatpush2.bf16.msra.mxu0 %v6288_v6  ;;  %v6294_v25 = vld [vmem:[#allocation8 + $0x5c0] ss:$16 sps:$4 sm:$0xff]  }
 0x182   :  { %v1747_v22 = vsel %vm1491_vm5, %v7177_v37, %v1619_v43  ;;  %v7252_v40 = vpack.c.bf16 %v1753_v41, %v1745_v62  ;;  %v1744_v55 = vsel %vm1488_vm0, %v7150_v46, %v1616_v50  ;;  %v1752_v16 = vsel %vm1496_vm6, %v7188_v56, %v1624_v31  ;;  %3674 = vmatprep.subr.bf16.mxu0 %v6296_v58  ;;  %v6297_v50 = vld [vmem:[#allocation8 + $0x7c0] ss:$16 sps:$4 sm:$0xff]   ;;  %v6302_v56 = vld [vmem:[#allocation8 + $0x5a4] ss:$16 sps:$4 sm:$0xff]  }
 0x183   :  { %v7224_v36 = vpop.f32.mrf.mxu0  ;;  %v7237_v44 = vpop.f32.mrf.mxu1  ;;  %v7254_v52 = vpack.c.bf16 %v1755_v8, %v1747_v22  ;;  %3786 = vmatpush2.bf16.msra.mxu1 %v6291_v2  ;;  %v7266_v37 = vadd.f32 %v7185_v28, %v6988_v13  ;;  %v7268_v6 = vpack.c.bf16 %v1752_v16, %v1744_v55  ;;  %v1746_v43 = vsel %vm1490_vm3, %v7156_v63, %v1618_v0  ;;  %v6300_v0 = vld [vmem:[#allocation8 + $0x5a0] ss:$16 sps:$4 sm:$0xff]   ;;  %v6308_v22 = vld [vmem:[#allocation8 + $0x584] ss:$16 sps:$4 sm:$0xff]  }
 0x184   :  { %8663 = vst [vmem:[#allocation25_spill] sm:$0xff] %v7252_v40  ;;  %v1754_v46 = vsel %vm1498_vm7, %v1164_v4, %v1626_v21  ;;  %v1632_v2 = vmul.f32 0.2, %v7211_v48  ;;  %vm1506_vm9 = vcmp.gt.f32.partialorder %v7228_v59, 0.0  ;;  %v1174_v28 = vadd.f32 %v7197_v57, %v6993_v14  ;;  %3502 = vmatprep.mubr.bf16.mxu0 %v7252_v40  ;;  %v6305_v4 = vld [vmem:[#allocation8 + $0x7a4] ss:$16 sps:$4 sm:$0xff]   ;;  %3787 = vmatprep.subr.bf16.mxu1 %v6299_v38 }
 0x185   :  { %v1070_v39 = vpop.f32.mrf.mxu0  ;;  %8664 = vst [vmem:[#allocation26_spill] sm:$0xff] %v7254_v52  ;;  %v7262_v45 = vpop.f32.mrf.mxu1  ;;  %8665 = vst [vmem:[#allocation27_spill] sm:$0xff] %v7268_v6  ;;  %3615 = vmatprep.mubr.bf16.mxu1 %v7254_v52  ;;  %v7280_v31 = vpack.c.bf16 %v1754_v46, %v1746_v43  ;;  %v1634_v58 = vmul.f32 0.2, %v7228_v59  ;;  %v1641_v21 = vmul.f32 0.2, %v7241_v5  ;;  %3503 = vmatmul.mubr.bf16.gmra.mxu0 %v7268_v6 }
 0x186   :  { %v1643_v8 = vmul.f32 0.2, %v7244_v3  ;;  %v6303_v62 = vld [vmem:[#allocation8 + $0x7a0] ss:$16 sps:$4 sm:$0xff]   ;;  %v7291_v55 = vrot.slane %v6980_v11, %v314_v33  ;;  %v1633_v16 = vmul.f32 0.2, %v7232_v32  ;;  %3675 = vmatpush2.bf16.msra.mxu0 %v6294_v25  ;;  %v7308_v10 = vadd.f32 %v7213_v27, %v6988_v13 }
 0x187   :  { %v1072_v41 = vpop.f32.mrf.mxu0  ;;  %8666 = vst [vmem:[#allocation28_spill] sm:$0xff] %v7280_v31  ;;  %v1185_v63 = vpop.f32.mrf.mxu1  ;;  %v1635_v43 = vmul.f32 0.2, %v7235_v53  ;;  %vm1513_vm10 = vcmp.gt.f32.partialorder %v7241_v5, 0.0  ;;  %vm1515_vm11 = vcmp.gt.f32.partialorder %v7244_v3, 0.0  ;;  %3616 = vmatmul.mubr.bf16.gmra.mxu1 %v7280_v31  ;;  %vm1505_vm12 = vcmp.gt.f32.partialorder %v7232_v32, 0.0  ;;  %3676 = vmatprep.subr.bf16.mxu0 %v6302_v56 }
 0x188   :  { %vm1507_vm13 = vcmp.gt.f32.partialorder %v7235_v53, 0.0  ;;  %vm1512_vm14 = vcmp.gt.f32.partialorder %v7266_v37, 0.0  ;;  %v1640_v33 = vmul.f32 0.2, %v7266_v37  ;;  %3788 = vmatpush2.bf16.msra.mxu1 %v6297_v50  ;;  %vm1514_vm15 = vcmp.gt.f32.partialorder %v1174_v28, 0.0 }
 0x189   :  { %v7286_v57 = vpop.f32.mrf.mxu0  ;;  %v7298_v38 = vpop.f32.mrf.mxu1  ;;  %v1642_v12 = vmul.f32 0.2, %v1174_v28  ;;  %v7312_v25 = vadd.f32 %v7219_v30, %v6993_v14  ;;  %3789 = vmatprep.subr.bf16.mxu1 %v6305_v4  ;;  %v6311_v6 = vld [vmem:[#allocation8 + $0x784] ss:$16 sps:$4 sm:$0xff]   ;;  %v7318_v50 = vadd.f32 %v7224_v36, %v6997_v17  ;;  %v7322_v56 = vadd.f32 %v7237_v44, %v7002_v23 }
 0x18a   :  { %v1769_v27 = vsel %vm1513_vm10, %v7241_v5, %v1641_v21  ;;  %v1771_v30 = vsel %vm1515_vm11, %v7244_v3, %v1643_v8  ;;  %v7333_v52 = vadd.f32 %v1070_v39, %v6988_v13  ;;  %v1073_v36 = vadd.f32 %v1072_v41, %v6997_v17  ;;  %3677 = vmatpush2.bf16.msra.mxu0 %v6300_v0  ;;  %v6306_v5 = vld [vmem:[#allocation8 + $0x580] ss:$16 sps:$4 sm:$0xff]  }
 0x18b   :  { %v7304_v46 = vpop.f32.mrf.mxu0  ;;  %v7314_v31 = vpop.f32.mrf.mxu1  ;;  %v1761_v44 = vsel %vm1505_vm12, %v7232_v32, %v1633_v16  ;;  %v1763_v40 = vsel %vm1507_vm13, %v7235_v53, %v1635_v43  ;;  %v1186_v3 = vadd.f32 %v1185_v63, %v7002_v23  ;;  %3678 = vmatprep.subr.bf16.mxu0 %v6308_v22  ;;  %v1760_v32 = vsel %vm1504_vm8, %v7211_v48, %v1632_v2  ;;  %v6309_v16 = vld [vmem:[#allocation8 + $0x780] ss:$16 sps:$4 sm:$0xff]  }
 0x18c   :  { %v7345_v8 = vpack.c.bf16 %v1769_v27, %v1761_v44  ;;  %v7347_v39 = vpack.c.bf16 %v1771_v30, %v1763_v40  ;;  %3790 = vmatpush2.bf16.msra.mxu1 %v6303_v62  ;;  %v1768_v53 = vsel %vm1512_vm14, %v7266_v37, %v1640_v33  ;;  %v1762_v0 = vsel %vm1506_vm9, %v7228_v59, %v1634_v58  ;;  %v6314_v62 = vld [vmem:[#allocation8 + $0x564] ss:$16 sps:$4 sm:$0xff]   ;;  %v6312_v59 = vld [vmem:[#allocation8 + $0x560] ss:$16 sps:$4 sm:$0xff]  }
 0x18d   :  { %v7330_v4 = vpop.f32.mrf.mxu0  ;;  %v7342_v21 = vpop.f32.mrf.mxu1  ;;  %v1770_v63 = vsel %vm1514_vm15, %v1174_v28, %v1642_v12  ;;  %3791 = vmatprep.subr.bf16.mxu1 %v6311_v6  ;;  %vm1520_vm0 = vcmp.gt.f32.partialorder %v7308_v10, 0.0  ;;  %v1184_v48 = vadd.f32 %v7262_v45, %v6993_v14  ;;  %v7366_v37 = vpack.c.bf16 %v1768_v53, %v1760_v32  ;;  %v6317_v12 = vld [vmem:[#allocation8 + $0x764] ss:$16 sps:$4 sm:$0xff]   ;;  %v6315_v43 = vld [vmem:[#allocation8 + $0x760] ss:$16 sps:$4 sm:$0xff]  }
 0x18e   :  { %8667 = vst [vmem:[#allocation29_spill] sm:$0xff] %v7345_v8  ;;  %8668 = vst [vmem:[#allocation30_spill] sm:$0xff] %v7347_v39  ;;  %3512 = vmatprep.mubr.bf16.mxu0 %v7345_v8  ;;  %3625 = vmatprep.mubr.bf16.mxu1 %v7347_v39  ;;  %v7368_v2 = vpack.c.bf16 %v1770_v63, %v1762_v0  ;;  %v1648_v6 = vmul.f32 0.2, %v7308_v10  ;;  %v1649_v58 = vmul.f32 0.2, %v7318_v50 }
 0x18f   :  { %v1082_v41 = vpop.f32.mrf.mxu0  ;;  %v7359_v40 = vpop.f32.mrf.mxu1  ;;  %8669 = vst [vmem:[#allocation31_spill] sm:$0xff] %v7366_v37  ;;  %v1657_v22 = vmul.f32 0.2, %v1073_v36  ;;  %3679 = vmatpush2.bf16.msra.mxu0 %v6306_v5  ;;  %v8671_v33 = vsub.s32 7, %v6974_v9  ;;  %vm1521_vm1 = vcmp.gt.f32.partialorder %v7318_v50, 0.0  ;;  %vm1529_vm2 = vcmp.gt.f32.partialorder %v1073_v36, 0.0 }
 0x190   :  { %8670 = vst [vmem:[#allocation32_spill] sm:$0xff] %v7368_v2  ;;  %v1659_v30 = vmul.f32 0.2, %v1186_v3  ;;  %3513 = vmatmul.mubr.bf16.gmra.mxu0 %v7366_v37  ;;  %3626 = vmatmul.mubr.bf16.gmra.mxu1 %v7368_v2  ;;  %v7386_v44 = vadd.f32 %v7286_v57, %v6988_v13  ;;  %v6320_v32 = vld [vmem:[#allocation8 + $0x544] ss:$16 sps:$4 sm:$0xff]   ;;  %vm1522_vm3 = vcmp.gt.f32.partialorder %v7312_v25, 0.0  ;;  %v7400_v9 = vadd.f32 %v7298_v38, %v6993_v14 }
 0x191   :  { %v7370_v28 = vpop.f32.mrf.mxu0  ;;  %v7374_v45 = vpop.f32.mrf.mxu1  ;;  %v7379_v27 = vrot.slane %v6980_v11, %v8671_v33  ;;  %v1650_v11 = vmul.f32 0.2, %v7312_v25  ;;  %v1651_v53 = vmul.f32 0.2, %v7322_v56  ;;  %vm1531_vm4 = vcmp.gt.f32.partialorder %v1186_v3, 0.0  ;;  %3792 = vmatpush2.bf16.msra.mxu1 %v6309_v16  ;;  %3680 = vmatprep.subr.bf16.mxu0 %v6314_v62 }
 0x192   :  { %vm1523_vm5 = vcmp.gt.f32.partialorder %v7322_v56, 0.0  ;;  %vm1528_vm6 = vcmp.gt.f32.partialorder %v7333_v52, 0.0  ;;  %v1656_v57 = vmul.f32 0.2, %v7333_v52  ;;  %v1658_v63 = vmul.f32 0.2, %v1184_v48  ;;  %3793 = vmatprep.subr.bf16.mxu1 %v6317_v12 }
 0x193   :  { %v7388_v5 = vpop.f32.mrf.mxu0  ;;  %v7393_v0 = vpop.f32.mrf.mxu1  ;;  %vm1530_vm7 = vcmp.gt.f32.partialorder %v1184_v48, 0.0  ;;  %v1777_v16 = vsel %vm1521_vm1, %v7318_v50, %v1649_v58  ;;  %v1785_v62 = vsel %vm1529_vm2, %v1073_v36, %v1657_v22  ;;  %3681 = vmatpush2.bf16.msra.mxu0 %v6312_v59  ;;  %v6323_v2 = vld [vmem:[#allocation8 + $0x744] ss:$16 sps:$4 sm:$0xff]   ;;  %v7407_v39 = vmul.f32 0.2, %v7386_v44 }
 0x194   :  { %v7411_v12 = vadd.f32 %v7304_v46, %v6997_v17  ;;  %v7413_v8 = vpack.c.bf16 %v1785_v62, %v1777_v16  ;;  %v1787_v38 = vsel %vm1531_vm4, %v1186_v3, %v1659_v30  ;;  %3682 = vmatprep.subr.bf16.mxu0 %v6320_v32  ;;  %vm1536_vm8 = vcmp.gt.f32.partialorder %v7386_v44, 0.0  ;;  %v6321_v22 = vld [vmem:[#allocation8 + $0x740] ss:$16 sps:$4 sm:$0xff]   ;;  %v6329_v32 = vld [vmem:[#allocation8 + $0x724] ss:$16 sps:$4 sm:$0xff]  }
 0x195   :  { %v1236_v33 = vpop.f32.mrf.mxu0  ;;  %v1349_v37 = vpop.f32.mrf.mxu1  ;;  %v7421_v50 = vadd.f32 %v7314_v31, %v7002_v23  ;;  %v1083_v36 = vadd.f32 %v1082_v41, %v6997_v17  ;;  %v1779_v46 = vsel %vm1523_vm5, %v7322_v56, %v1651_v53  ;;  %v1776_v59 = vsel %vm1520_vm0, %v7308_v10, %v1648_v6  ;;  %3794 = vmatpush2.bf16.msra.mxu1 %v6315_v43  ;;  %v6318_v41 = vld [vmem:[#allocation8 + $0x540] ss:$16 sps:$4 sm:$0xff]   ;;  %v6332_v62 = vld [vmem:[#allocation8 + $0x504] ss:$16 sps:$4 sm:$0xff]  }
 0x196   :  { %8672 = vst [vmem:[#allocation33_spill] sm:$0xff] %v7413_v8  ;;  %3522 = vmatprep.mubr.bf16.mxu0 %v7413_v8  ;;  %v7433_v58 = vpack.c.bf16 %v1787_v38, %v1779_v46  ;;  %v1784_v31 = vsel %vm1528_vm6, %v7333_v52, %v1656_v57  ;;  %v1778_v17 = vsel %vm1522_vm3, %v7312_v25, %v1650_v11  ;;  %v6326_v25 = vld [vmem:[#allocation8 + $0x524] ss:$16 sps:$4 sm:$0xff]   ;;  %vm1538_vm9 = vcmp.gt.f32.partialorder %v7400_v9, 0.0 }
 0x197   :  { %v7416_v26 = vpop.f32.mrf.mxu0  ;;  %v7430_v3 = vpop.f32.mrf.mxu1  ;;  %v1786_v56 = vsel %vm1530_vm7, %v1184_v48, %v1658_v63  ;;  %v7446_v6 = vadd.f32 %v7330_v4, %v6988_v13  ;;  %v7450_v43 = vadd.f32 %v7342_v21, %v6993_v14  ;;  %v7452_v30 = vpack.c.bf16 %v1784_v31, %v1776_v59  ;;  %3795 = vmatprep.subr.bf16.mxu1 %v6323_v2  ;;  %v6324_v14 = vld [vmem:[#allocation8 + $0x520] ss:$16 sps:$4 sm:$0xff]  }
 0x198   :  { %8673 = vst [vmem:[#allocation34_spill] sm:$0xff] %v7433_v58  ;;  %v7454_v52 = vpack.c.bf16 %v1786_v56, %v1778_v17  ;;  %v7460_v11 = vmul.f32 0.2, %v7400_v9  ;;  %vm1537_vm10 = vcmp.gt.f32.partialorder %v7411_v12, 0.0  ;;  %v1196_v13 = vadd.f32 %v7359_v40, %v7002_v23  ;;  %3635 = vmatprep.mubr.bf16.mxu1 %v7433_v58  ;;  %v6327_v4 = vld [vmem:[#allocation8 + $0x720] ss:$16 sps:$4 sm:$0xff]   ;;  %3683 = vmatpush2.bf16.msra.mxu0 %v6318_v41 }
 0x199   :  { %v7442_v10 = vpop.f32.mrf.mxu0  ;;  %8674 = vst [vmem:[#allocation35_spill] sm:$0xff] %v7452_v30  ;;  %v7456_v48 = vpop.f32.mrf.mxu1  ;;  %v1665_v2 = vmul.f32 0.2, %v7411_v12  ;;  %vm1539_vm11 = vcmp.gt.f32.partialorder %v7421_v50, 0.0  ;;  %v1673_v53 = vmul.f32 0.2, %v1083_v36  ;;  %3523 = vmatmul.mubr.bf16.gmra.mxu0 %v7452_v30  ;;  %v7474_v57 = vadd.f32 %v7370_v28, %v7128_v7  ;;  %3796 = vmatpush2.bf16.msra.mxu1 %v6321_v22 }
 0x19a   :  { %8675 = vst [vmem:[#allocation36_spill] sm:$0xff] %v7454_v52  ;;  %3636 = vmatmul.mubr.bf16.gmra.mxu1 %v7454_v52  ;;  %v1667_v40 = vmul.f32 0.2, %v7421_v50  ;;  %vm1545_vm12 = vcmp.gt.f32.partialorder %v1083_v36, 0.0  ;;  %v7481_v63 = vadd.f32 %v7374_v45, %v7136_v35  ;;  %v1237_v16 = vadd.f32 %v1236_v33, %v7128_v7  ;;  %3684 = vmatprep.subr.bf16.mxu0 %v6326_v25  ;;  %v6335_v45 = vld [vmem:[#allocation8 + $0x704] ss:$16 sps:$4 sm:$0xff]  }
 0x19b   :  { %v7466_v21 = vpop.f32.mrf.mxu0  ;;  %v7476_v23 = vpop.f32.mrf.mxu1  ;;  %vm1544_vm13 = vcmp.gt.f32.partialorder %v7446_v6, 0.0  ;;  %v1672_v28 = vmul.f32 0.2, %v7446_v6  ;;  %vm1546_vm14 = vcmp.gt.f32.partialorder %v7450_v43, 0.0  ;;  %v7490_v46 = vadd.f32 %v1349_v37, %v7136_v35  ;;  %3797 = vmatprep.subr.bf16.mxu1 %v6329_v32  ;;  %v6330_v25 = vld [vmem:[#allocation8 + $0x500] ss:$16 sps:$4 sm:$0xff]  }
 0x19c   :  { %v1674_v33 = vmul.f32 0.2, %v7450_v43  ;;  %vm1547_vm15 = vcmp.gt.f32.partialorder %v1196_v13, 0.0  ;;  %v1675_v31 = vmul.f32 0.2, %v1196_v13  ;;  %v7497_v17 = vadd.f32 %v7388_v5, %v7291_v55  ;;  %3685 = vmatpush2.bf16.msra.mxu0 %v6324_v14 }
 0x19d   :  { %v7484_v38 = vpop.f32.mrf.mxu0  ;;  %v7492_v59 = vpop.f32.mrf.mxu1  ;;  %vm1428_vm0 = vcmp.gt.f32.partialorder %v7474_v57, 0.0  ;;  %v1556_v37 = vmul.f32 0.2, %v7474_v57  ;;  %v7505_v41 = vadd.f32 %v7393_v0, %v7379_v27  ;;  %v1801_v22 = vsel %vm1545_vm12, %v1083_v36, %v1673_v53  ;;  %3798 = vmatpush2.bf16.msra.mxu1 %v6327_v4  ;;  %3686 = vmatprep.subr.bf16.mxu0 %v6332_v62  ;;  %v6338_v4 = vld [vmem:[#allocation8 + $0xec] ss:$16 sps:$4 sm:$0xff]  }
 0x19e   :  { %v1558_v52 = vmul.f32 0.2, %v7481_v63  ;;  %vm1436_vm1 = vcmp.gt.f32.partialorder %v1237_v16, 0.0  ;;  %v1564_v30 = vmul.f32 0.2, %v1237_v16  ;;  %v1793_v5 = vsel %vm1537_vm10, %v7411_v12, %v1665_v2  ;;  %3799 = vmatprep.subr.bf16.mxu1 %v6335_v45 }
 0x19f   :  { %v7499_v56 = vpop.f32.mrf.mxu0  ;;  %v1361_v32 = vpop.f32.mrf.mxu1  ;;  %v1566_v8 = vmul.f32 0.2, %v7490_v46  ;;  %v1239_v0 = vadd.f32 %v7416_v26, %v7291_v55  ;;  %v1352_v36 = vadd.f32 %v7430_v3, %v7379_v27  ;;  %v7519_v53 = vpack.c.bf16 %v1801_v22, %v1793_v5 }
 0x1a0   :  { %v1795_v12 = vsel %vm1539_vm11, %v7421_v50, %v1667_v40  ;;  %v1803_v14 = vsel %vm1547_vm15, %v1196_v13, %v1675_v31  ;;  %v1792_v26 = vsel %vm1536_vm8, %v7386_v44, %v7407_v39  ;;  %v1800_v3 = vsel %vm1544_vm13, %v7446_v6, %v1672_v28  ;;  %v6333_v44 = vld [vmem:[#allocation8 + $0x700] ss:$16 sps:$4 sm:$0xff]   ;;  %3687 = vmatpush2.bf16.msra.mxu0 %v6330_v25  ;;  %v6341_v40 = vld [vmem:[#allocation8 + $0x2ec] ss:$16 sps:$4 sm:$0xff]  }
 0x1a1   :  { %v7512_v58 = vpop.f32.mrf.mxu0  ;;  %8676 = vst [vmem:[#allocation37_spill] sm:$0xff] %v7519_v53  ;;  %v7521_v29 = vpop.f32.mrf.mxu1  ;;  %3532 = vmatprep.mubr.bf16.mxu0 %v7519_v53  ;;  %v7537_v62 = vpack.c.bf16 %v1803_v14, %v1795_v12  ;;  %v7539_v45 = vpack.c.bf16 %v1800_v3, %v1792_v26  ;;  %v1794_v50 = vsel %vm1538_vm9, %v7400_v9, %v7460_v11  ;;  %vm1430_vm2 = vcmp.gt.f32.partialorder %v7481_v63, 0.0 }
 0x1a2   :  { %v1802_v39 = vsel %vm1546_vm14, %v7450_v43, %v1674_v33  ;;  %vm1429_vm3 = vcmp.gt.f32.partialorder %v7497_v17, 0.0  ;;  %vm1438_vm4 = vcmp.gt.f32.partialorder %v7490_v46, 0.0  ;;  %v1557_v9 = vmul.f32 0.2, %v7497_v17  ;;  %3882 = vmatprep.subr.bf16.mxu0 %v6338_v4  ;;  %3800 = vmatpush2.bf16.msra.mxu1 %v6333_v44 }
 0x1a3   :  { %v7534_v2 = vpop.f32.mrf.mxu0  ;;  %8677 = vst [vmem:[#allocation38_spill] sm:$0xff] %v7537_v62  ;;  %8678 = vst [vmem:[#allocation39_spill] sm:$0xff] %v7539_v45  ;;  %v7548_v6 = vpop.f32.mrf.mxu1  ;;  %v7553_v13 = vpack.c.bf16 %v1802_v39, %v1794_v50  ;;  %v1692_v11 = vsel %vm1436_vm1, %v1237_v16, %v1564_v30  ;;  %v1565_v43 = vmul.f32 0.2, %v1239_v0  ;;  %v1567_v33 = vmul.f32 0.2, %v1352_v36  ;;  %3645 = vmatprep.mubr.bf16.mxu1 %v7537_v62 }
 0x1a4   :  { %3533 = vmatmul.mubr.bf16.gmra.mxu0 %v7539_v45  ;;  %vm1431_vm5 = vcmp.gt.f32.partialorder %v7505_v41, 0.0  ;;  %v1559_v22 = vmul.f32 0.2, %v7505_v41  ;;  %vm1437_vm6 = vcmp.gt.f32.partialorder %v1239_v0, 0.0  ;;  %vm1439_vm7 = vcmp.gt.f32.partialorder %v1352_v36, 0.0  ;;  %3995 = vmatprep.subr.bf16.mxu1 %v6341_v40 }
 0x1a5   :  { %8679 = vst [vmem:[#allocation40_spill] sm:$0xff] %v7553_v13  ;;  %v7555_v28 = vpop.f32.mrf.mxu0  ;;  %v7561_v31 = vpop.f32.mrf.mxu1  ;;  %3646 = vmatmul.mubr.bf16.gmra.mxu1 %v7553_v13  ;;  %v1684_v30 = vsel %vm1428_vm0, %v7474_v57, %v1556_v37  ;;  %v1686_v16 = vsel %vm1430_vm2, %v7481_v63, %v1558_v52  ;;  %v1694_v5 = vsel %vm1438_vm4, %v7490_v46, %v1566_v8  ;;  %v6344_v40 = vld [vmem:[#allocation8 + $0xcc] ss:$16 sps:$4 sm:$0xff]  }
 0x1a6   :  { %v7579_v12 = vadd.f32 %v7442_v10, %v7128_v7  ;;  %v7583_v26 = vpack.c.bf16 %v1692_v11, %v1684_v30  ;;  %v7587_v57 = vadd.f32 %v7456_v48, %v7136_v35  ;;  %v7591_v52 = vadd.f32 %v7466_v21, %v7291_v55 }
 0x1a7   :  { %v7566_v25 = vpop.f32.mrf.mxu0  ;;  %v7581_v14 = vpop.f32.mrf.mxu1  ;;  %v7595_v8 = vadd.f32 %v7476_v23, %v7379_v27  ;;  %v1249_v63 = vadd.f32 %v7499_v56, %v7291_v55  ;;  %v1362_v46 = vadd.f32 %v1361_v32, %v7379_v27  ;;  %v1693_v37 = vsel %vm1437_vm6, %v1239_v0, %v1565_v43  ;;  %v6336_v32 = vld [vmem:[#allocation8 + $0xe8] ss:$16 sps:$4 sm:$0xff]  }
 0x1a8   :  { %8680 = vst [vmem:[#allocation41_spill] sm:$0xff] %v7583_v26  ;;  %v1695_v48 = vsel %vm1439_vm7, %v1352_v36, %v1567_v33  ;;  %v7606_v21 = vpack.c.bf16 %v1694_v5, %v1686_v16  ;;  %v7610_v23 = vadd.f32 %v7484_v38, %v7128_v7  ;;  %v1685_v4 = vsel %vm1429_vm3, %v7497_v17, %v1557_v9  ;;  %v6339_v0 = vld [vmem:[#allocation8 + $0x2e8] ss:$16 sps:$4 sm:$0xff]   ;;  %v6347_v17 = vld [vmem:[#allocation8 + $0x2cc] ss:$16 sps:$4 sm:$0xff]  }
 0x1a9   :  { %v7597_v10 = vpop.f32.mrf.mxu0  ;;  %v7604_v3 = vpop.f32.mrf.mxu1  ;;  %v1687_v56 = vsel %vm1431_vm5, %v7505_v41, %v1559_v22  ;;  %v1572_v36 = vmul.f32 0.2, %v7579_v12  ;;  %v7623_v39 = vadd.f32 %v7492_v59, %v7136_v35  ;;  %v7625_v38 = vpack.c.bf16 %v1693_v37, %v1685_v4  ;;  %v6342_v22 = vld [vmem:[#allocation8 + $0xc8] ss:$16 sps:$4 sm:$0xff]  }
 0x1aa   :  { %8681 = vst [vmem:[#allocation42_spill] sm:$0xff] %v7606_v21  ;;  %v7627_v44 = vpack.c.bf16 %v1695_v48, %v1687_v56  ;;  %vm1444_vm8 = vcmp.gt.f32.partialorder %v7579_v12, 0.0  ;;  %vm1446_vm9 = vcmp.gt.f32.partialorder %v7587_v57, 0.0  ;;  %v1574_v41 = vmul.f32 0.2, %v7587_v57 }
 0x1ab   :  { %v7618_v50 = vpop.f32.mrf.mxu0  ;;  %8682 = vst [vmem:[#allocation43_spill] sm:$0xff] %v7625_v38  ;;  %v7629_v9 = vpop.f32.mrf.mxu1  ;;  %v1573_v11 = vmul.f32 0.2, %v7591_v52  ;;  %vm1445_vm10 = vcmp.gt.f32.partialorder %v7591_v52, 0.0  ;;  %vm1447_vm11 = vcmp.gt.f32.partialorder %v7595_v8, 0.0  ;;  %3688 = vmatprep.mubr.bf16.mxu0 %v7625_v38  ;;  %vm1452_vm12 = vcmp.gt.f32.partialorder %v7610_v23, 0.0 }
 0x1ac   :  { %8683 = vst [vmem:[#allocation44_spill] sm:$0xff] %v7627_v44  ;;  %v1581_v59 = vmul.f32 0.2, %v1249_v63  ;;  %v1583_v33 = vmul.f32 0.2, %v1362_v46  ;;  %3801 = vmatprep.mubr.bf16.mxu1 %v7627_v44  ;;  %vm1453_vm13 = vcmp.gt.f32.partialorder %v1249_v63, 0.0  ;;  %3689 = vmatmul.mubr.bf16.vlgmr.msra.gmra.mxu0 %v7583_v26  ;;  %v7653_v48 = vadd.f32 %v7512_v58, %v7128_v7 }
 0x1ad   :  { %v7635_v43 = vpop.f32.mrf.mxu0  ;;  %v7641_v30 = vpop.f32.mrf.mxu1  ;;  %v1575_v16 = vmul.f32 0.2, %v7595_v8  ;;  %vm1455_vm14 = vcmp.gt.f32.partialorder %v1362_v46, 0.0  ;;  %3802 = vmatmul.mubr.bf16.vlgmr.msra.gmra.mxu1 %v7606_v21  ;;  %v1580_v37 = vmul.f32 0.2, %v7610_v23  ;;  %vm1454_vm15 = vcmp.gt.f32.partialorder %v7623_v39, 0.0  ;;  %3883 = vmatpush1.bf16.msra.mxu0 %v6336_v32 }
 0x1ae   :  { %v7657_v4 = vadd.f32 %v7521_v29, %v7136_v35  ;;  %3996 = vmatpush1.bf16.msra.mxu1 %v6339_v0  ;;  %v6345_v56 = vld [vmem:[#allocation8 + $0x2c8] ss:$16 sps:$4 sm:$0xff]   ;;  %v1582_v21 = vmul.f32 0.2, %v7623_v39  ;;  %v7664_v44 = vadd.f32 %v7534_v2, %v7291_v55  ;;  %v7668_v38 = vadd.f32 %v7548_v6, %v7379_v27  ;;  %3884 = vmatprep.subr.bf16.mxu0 %v6344_v40  ;;  %v6350_v58 = vld [vmem:[#allocation8 + $0xac] ss:$16 sps:$4 sm:$0xff]  }
 0x1af   :  { %v7647_v5 = vpop.f32.mrf.mxu0  ;;  %v7659_v26 = vpop.f32.mrf.mxu1  ;;  %3997 = vmatprep.subr.bf16.mxu1 %v6347_v17  ;;  %v7672_v29 = vadd.f32 %v7555_v28, %v7128_v7  ;;  %v6353_v32 = vld [vmem:[#allocation8 + $0x2ac] ss:$16 sps:$4 sm:$0xff]   ;;  %v7678_v13 = vadd.f32 %v7561_v31, %v7136_v35  ;;  %v7682_v2 = vadd.f32 %v7566_v25, %v7291_v55  ;;  %v1709_v6 = vsel %vm1453_vm13, %v1249_v63, %v1581_v59 }
 0x1b0   :  { %v1711_v40 = vsel %vm1455_vm14, %v1362_v46, %v1583_v33  ;;  %v7690_v28 = vadd.f32 %v7581_v14, %v7379_v27  ;;  %v1701_v45 = vsel %vm1445_vm10, %v7591_v52, %v1573_v11  ;;  %v1703_v31 = vsel %vm1447_vm11, %v7595_v8, %v1575_v16  ;;  %v6348_v11 = vld [vmem:[#allocation8 + $0xa8] ss:$16 sps:$4 sm:$0xff]   ;;  %v6356_v33 = vld [vmem:[#allocation8 + $0x8c] ss:$16 sps:$4 sm:$0xff]  }
 0x1b1   :  { %v7674_v0 = vpop.f32.mrf.mxu0  ;;  %v7686_v17 = vpop.f32.mrf.mxu1  ;;  %v1700_v25 = vsel %vm1444_vm8, %v7579_v12, %v1572_v36  ;;  %3885 = vmatpush1.bf16.msra.mxu0 %v6342_v22  ;;  %v7703_v46 = vpack.c.bf16 %v1709_v6, %v1701_v45  ;;  %v7705_v14 = vpack.c.bf16 %v1711_v40, %v1703_v31  ;;  %v1708_v52 = vsel %vm1452_vm12, %v7610_v23, %v1580_v37  ;;  %v6351_v36 = vld [vmem:[#allocation8 + $0x2a8] ss:$16 sps:$4 sm:$0xff]   ;;  %v6359_v22 = vld [vmem:[#allocation8 + $0x28c] ss:$16 sps:$4 sm:$0xff]  }
 0x1b2   :  { %3998 = vmatpush1.bf16.msra.mxu1 %v6345_v56  ;;  %v7712_v8 = vpack.c.bf16 %v1708_v52, %v1700_v25  ;;  %v1702_v12 = vsel %vm1446_vm9, %v7587_v57, %v1574_v41  ;;  %v1710_v45 = vsel %vm1454_vm15, %v7623_v39, %v1582_v21  ;;  %3886 = vmatprep.subr.bf16.mxu0 %v6350_v58  ;;  %vm1460_vm0 = vcmp.gt.f32.partialorder %v7653_v48, 0.0  ;;  %v6354_v21 = vld [vmem:[#allocation8 + $0x88] ss:$16 sps:$4 sm:$0xff]  }
 0x1b3   :  { %v7701_v63 = vpop.f32.mrf.mxu0  ;;  %8684 = vst [vmem:[#allocation45_spill] sm:$0xff] %v7703_v46  ;;  %8685 = vst [vmem:[#allocation46_spill] sm:$0xff] %v7705_v14  ;;  %v7710_v59 = vpop.f32.mrf.mxu1  ;;  %3999 = vmatprep.subr.bf16.mxu1 %v6353_v32  ;;  %v1588_v23 = vmul.f32 0.2, %v7653_v48  ;;  %v1590_v37 = vmul.f32 0.2, %v7657_v4  ;;  %3698 = vmatprep.mubr.bf16.mxu0 %v7703_v46  ;;  %v7727_v57 = vpack.c.bf16 %v1710_v45, %v1702_v12 }
 0x1b4   :  { %8686 = vst [vmem:[#allocation47_spill] sm:$0xff] %v7712_v8  ;;  %3811 = vmatprep.mubr.bf16.mxu1 %v7705_v14  ;;  %vm1462_vm1 = vcmp.gt.f32.partialorder %v7657_v4, 0.0  ;;  %vm1461_vm2 = vcmp.gt.f32.partialorder %v7664_v44, 0.0  ;;  %v1589_v41 = vmul.f32 0.2, %v7664_v44  ;;  %3699 = vmatmul.mubr.bf16.gmra.mxu0 %v7712_v8  ;;  %vm1463_vm3 = vcmp.gt.f32.partialorder %v7668_v38, 0.0 }
 0x1b5   :  { %v7720_v16 = vpop.f32.mrf.mxu0  ;;  %8687 = vst [vmem:[#allocation48_spill] sm:$0xff] %v7727_v57  ;;  %v7729_v39 = vpop.f32.mrf.mxu1  ;;  %v1597_v56 = vmul.f32 0.2, %v7682_v2  ;;  %v6357_v58 = vld [vmem:[#allocation8 + $0x288] ss:$16 sps:$4 sm:$0xff]   ;;  %vm1469_vm4 = vcmp.gt.f32.partialorder %v7682_v2, 0.0  ;;  %3812 = vmatmul.mubr.bf16.gmra.mxu1 %v7727_v57  ;;  %3887 = vmatpush1.bf16.msra.mxu0 %v6348_v11  ;;  %v7754_v57 = vadd.f32 %v7597_v10, %v7128_v7  ;;  %v7758_v11 = vadd.f32 %v7604_v3, %v7136_v35 }
 0x1b6   :  { %v6362_v32 = vld [vmem:[#allocation8 + $0x6c] ss:$16 sps:$4 sm:$0xff]   ;;  %v1591_v40 = vmul.f32 0.2, %v7668_v38  ;;  %v1599_v31 = vmul.f32 0.2, %v7690_v28  ;;  %4000 = vmatpush1.bf16.msra.mxu1 %v6351_v36  ;;  %3888 = vmatprep.subr.bf16.mxu0 %v6356_v33  ;;  %v7762_v8 = vadd.f32 %v7618_v50, %v7291_v55  ;;  %v7768_v36 = vadd.f32 %v7629_v9, %v7379_v27 }
 0x1b7   :  { %v7736_v6 = vpop.f32.mrf.mxu0  ;;  %v7743_v25 = vpop.f32.mrf.mxu1  ;;  %vm1468_vm5 = vcmp.gt.f32.partialorder %v7672_v29, 0.0  ;;  %v1596_v52 = vmul.f32 0.2, %v7672_v29  ;;  %vm1470_vm6 = vcmp.gt.f32.partialorder %v7678_v13, 0.0  ;;  %vm1471_vm7 = vcmp.gt.f32.partialorder %v7690_v28, 0.0  ;;  %4001 = vmatprep.subr.bf16.mxu1 %v6359_v22 }
 0x1b8   :  { %v1598_v45 = vmul.f32 0.2, %v7678_v13  ;;  %v7772_v33 = vadd.f32 %v7635_v43, %v7128_v7  ;;  %v1717_v10 = vsel %vm1461_vm2, %v7664_v44, %v1589_v41  ;;  %v1725_v3 = vsel %vm1469_vm4, %v7682_v2, %v1597_v56  ;;  %v6365_v50 = vld [vmem:[#allocation8 + $0x26c] ss:$16 sps:$4 sm:$0xff]   ;;  %v6360_v41 = vld [vmem:[#allocation8 + $0x68] ss:$16 sps:$4 sm:$0xff]  }
 0x1b9   :  { %v7749_v12 = vpop.f32.mrf.mxu0  ;;  %v7764_v14 = vpop.f32.mrf.mxu1  ;;  %v7784_v46 = vadd.f32 %v7641_v30, %v7136_v35  ;;  %3889 = vmatpush1.bf16.msra.mxu0 %v6354_v21  ;;  %v7788_v9 = vadd.f32 %v7647_v5, %v7291_v55  ;;  %v7790_v43 = vpack.c.bf16 %v1725_v3, %v1717_v10  ;;  %v1727_v44 = vsel %vm1471_vm7, %v7690_v28, %v1599_v31  ;;  %v6363_v21 = vld [vmem:[#allocation8 + $0x268] ss:$16 sps:$4 sm:$0xff]  }
 0x1ba   :  { %4002 = vmatpush1.bf16.msra.mxu1 %v6357_v58  ;;  %v1382_v56 = vadd.f32 %v7659_v26, %v7379_v27  ;;  %v1719_v30 = vsel %vm1463_vm3, %v7668_v38, %v1591_v40  ;;  %v1716_v5 = vsel %vm1460_vm0, %v7653_v48, %v1588_v23  ;;  %3890 = vmatprep.subr.bf16.mxu0 %v6362_v32  ;;  %v6366_v23 = vld [vmem:[#allocation8 + $0x48] ss:$16 sps:$4 sm:$0xff]   ;;  %v6368_v58 = vld [vmem:[#allocation8 + $0x4c] ss:$16 sps:$4 sm:$0xff]   ;;  %vm1476_vm8 = vcmp.gt.f32.partialorder %v7754_v57, 0.0 }
 0x1bb   :  { %v7780_v22 = vpop.f32.mrf.mxu0  ;;  %8688 = vst [vmem:[#allocation49_spill] sm:$0xff] %v7790_v43  ;;  %v7795_v2 = vpop.f32.mrf.mxu1  ;;  %3708 = vmatprep.mubr.bf16.mxu0 %v7790_v43  ;;  %v7808_v28 = vpack.c.bf16 %v1727_v44, %v1719_v30  ;;  %v1724_v26 = vsel %vm1468_vm5, %v7672_v29, %v1596_v52  ;;  %v1718_v38 = vsel %vm1462_vm1, %v7657_v4, %v1590_v37  ;;  %v6371_v32 = vld [vmem:[#allocation8 + $0x24c] ss:$16 sps:$4 sm:$0xff]   ;;  %v1604_v31 = vmul.f32 0.2, %v7754_v57 }
 0x1bc   :  { %v1726_v48 = vsel %vm1470_vm6, %v7678_v13, %v1598_v45  ;;  %v7823_v3 = vpack.c.bf16 %v1724_v26, %v1716_v5  ;;  %4003 = vmatprep.subr.bf16.mxu1 %v6365_v50  ;;  %v6374_v52 = vld [vmem:[#allocation8 + $0x2c] ss:$16 sps:$4 sm:$0xff]   ;;  %vm1478_vm9 = vcmp.gt.f32.partialorder %v7758_v11, 0.0  ;;  %v1606_v13 = vmul.f32 0.2, %v7758_v11 }
 0x1bd   :  { %v7805_v10 = vpop.f32.mrf.mxu0  ;;  %8689 = vst [vmem:[#allocation50_spill] sm:$0xff] %v7808_v28  ;;  %v7819_v40 = vpop.f32.mrf.mxu1  ;;  %v7825_v29 = vpack.c.bf16 %v1726_v48, %v1718_v38  ;;  %vm1477_vm10 = vcmp.gt.f32.partialorder %v7762_v8, 0.0  ;;  %v1605_v37 = vmul.f32 0.2, %v7762_v8  ;;  %3821 = vmatprep.mubr.bf16.mxu1 %v7808_v28  ;;  %3891 = vmatpush1.bf16.msra.mxu0 %v6360_v41  ;;  %v6369_v45 = vld [vmem:[#allocation8 + $0x248] ss:$16 sps:$4 sm:$0xff]   ;;  %v7842_v5 = vadd.f32 %v7674_v0, %v7128_v7 }
 0x1be   :  { %8690 = vst [vmem:[#allocation51_spill] sm:$0xff] %v7823_v3  ;;  %vm1479_vm11 = vcmp.gt.f32.partialorder %v7768_v36, 0.0  ;;  %v1613_v50 = vmul.f32 0.2, %v7788_v9  ;;  %v1615_v30 = vmul.f32 0.2, %v1382_v56  ;;  %3709 = vmatmul.mubr.bf16.gmra.mxu0 %v7823_v3  ;;  %4004 = vmatpush1.bf16.msra.mxu1 %v6363_v21  ;;  %v1277_v41 = vadd.f32 %v7720_v16, %v7128_v7 }
 0x1bf   :  { %8691 = vst [vmem:[#allocation52_spill] sm:$0xff] %v7825_v29  ;;  %v7827_v4 = vpop.f32.mrf.mxu0  ;;  %v7834_v44 = vpop.f32.mrf.mxu1  ;;  %3822 = vmatmul.mubr.bf16.gmra.mxu1 %v7825_v29  ;;  %v1607_v26 = vmul.f32 0.2, %v7768_v36  ;;  %vm1485_vm12 = vcmp.gt.f32.partialorder %v7788_v9, 0.0  ;;  %vm1487_vm13 = vcmp.gt.f32.partialorder %v1382_v56, 0.0  ;;  %3892 = vmatprep.subr.bf16.mxu0 %v6368_v58  ;;  %vm1484_vm14 = vcmp.gt.f32.partialorder %v7772_v33, 0.0 }
 0x1c0   :  { %v6377_v38 = vld [vmem:[#allocation8 + $0x22c] ss:$16 sps:$4 sm:$0xff]   ;;  %v1612_v0 = vmul.f32 0.2, %v7772_v33  ;;  %vm1486_vm15 = vcmp.gt.f32.partialorder %v7784_v46, 0.0  ;;  %4005 = vmatprep.subr.bf16.mxu1 %v6371_v32  ;;  %v1386_v21 = vadd.f32 %v7686_v17, %v7136_v35  ;;  %v7860_v16 = vadd.f32 %v7701_v63, %v7291_v55 }
 0x1c1   :  { %v7848_v48 = vpop.f32.mrf.mxu0  ;;  %v7850_v3 = vpop.f32.mrf.mxu1  ;;  %v1614_v29 = vmul.f32 0.2, %v7784_v46  ;;  %v7864_v58 = vadd.f32 %v7710_v59, %v7379_v27  ;;  %v1390_v28 = vadd.f32 %v7729_v39, %v7136_v35  ;;  %3893 = vmatpush1.bf16.msra.mxu0 %v6366_v23  ;;  %v6372_v43 = vld [vmem:[#allocation8 + $0x28] ss:$16 sps:$4 sm:$0xff]   ;;  %vm1492_vm0 = vcmp.gt.f32.partialorder %v7842_v5, 0.0 }
 0x1c2   :  { %v1620_v32 = vmul.f32 0.2, %v7842_v5  ;;  %v1741_v17 = vsel %vm1485_vm12, %v7788_v9, %v1613_v50  ;;  %v1743_v63 = vsel %vm1487_vm13, %v1382_v56, %v1615_v30  ;;  %3894 = vmatprep.subr.bf16.mxu0 %v6374_v52  ;;  %vm1500_vm1 = vcmp.gt.f32.partialorder %v1277_v41, 0.0  ;;  %4006 = vmatpush1.bf16.msra.mxu1 %v6369_v45  ;;  %v6375_v23 = vld [vmem:[#allocation8 + $0x228] ss:$16 sps:$4 sm:$0xff]  }
 0x1c3   :  { %v1628_v62 = vmul.f32 0.2, %v1277_v41  ;;  %v7876_v59 = vadd.f32 %v7736_v6, %v7291_v55  ;;  %v1733_v39 = vsel %vm1477_vm10, %v7762_v8, %v1605_v37  ;;  %v7881_v53 = vpop.f32.mrf.mxu0  ;;  %v7883_v61 = vpop.f32.mrf.mxu1  ;;  %v1630_v9 = vmul.f32 0.2, %v1390_v28  ;;  %4007 = vmatprep.subr.bf16.mxu1 %v6377_v38  ;;  %v6380_v45 = vld [vmem:[#allocation8 + $0xc] ss:$16 sps:$4 sm:$0xff]  }
 0x1c4   :  { %v7887_v56 = vadd.f32 %v7743_v25, %v7379_v27  ;;  %v7889_v52 = vpack.c.bf16 %v1741_v17, %v1733_v39  ;;  %v1735_v6 = vsel %vm1479_vm11, %v7768_v36, %v1607_v26  ;;  %vm1502_vm2 = vcmp.gt.f32.partialorder %v1390_v28, 0.0  ;;  %v6383_v50 = vld [vmem:[#allocation8 + $0x20c] ss:$16 sps:$4 sm:$0xff]  }
 0x1c5   :  { %v7894_v8 = vpack.c.bf16 %v1743_v63, %v1735_v6  ;;  %v1732_v37 = vsel %vm1476_vm8, %v7754_v57, %v1604_v31  ;;  %v1740_v25 = vsel %vm1484_vm14, %v7772_v33, %v1612_v0  ;;  %3895 = vmatpush1.bf16.msra.mxu0 %v6372_v43  ;;  %v1622_v30 = vmul.f32 0.2, %v1386_v21  ;;  %v6378_v57 = vld [vmem:[#allocation8 + $0x8] ss:$16 sps:$4 sm:$0xff]   ;;  %v6386_v38 = vld [vmem:[#allocation8 + $0x1ec] ss:$16 sps:$4 sm:$0xff]   ;;  %v7915_v0 = vpop.f32.mrf.mxu0  ;;  %v7917_v63 = vpop.f32.mrf.mxu1 }
 0x1c6   :  { %3718 = vmatprep.mubr.bf16.mxu0 %v7889_v52  ;;  %v7903_v17 = vpack.c.bf16 %v1740_v25, %v1732_v37  ;;  %v1734_v36 = vsel %vm1478_vm9, %v7758_v11, %v1606_v13  ;;  %v1742_v26 = vsel %vm1486_vm15, %v7784_v46, %v1614_v29  ;;  %vm1494_vm3 = vcmp.gt.f32.partialorder %v1386_v21, 0.0  ;;  %4008 = vmatpush1.bf16.msra.mxu1 %v6375_v23  ;;  %v6381_v43 = vld [vmem:[#allocation8 + $0x208] ss:$16 sps:$4 sm:$0xff]   ;;  %v6389_v29 = vld [vmem:[#allocation8 + $0x3ec] ss:$16 sps:$4 sm:$0xff]  }
 0x1c7   :  { %v1756_v31 = vsel %vm1500_vm1, %v1277_v41, %v1628_v62  ;;  %3831 = vmatprep.mubr.bf16.mxu1 %v7894_v8  ;;  %v7913_v33 = vpack.c.bf16 %v1742_v26, %v1734_v36  ;;  %vm1493_vm4 = vcmp.gt.f32.partialorder %v7860_v16, 0.0  ;;  %v1621_v11 = vmul.f32 0.2, %v7860_v16  ;;  %3896 = vmatprep.subr.bf16.mxu0 %v6380_v45  ;;  %v6392_v45 = vld [vmem:[#allocation8 + $0x1cc] ss:$16 sps:$4 sm:$0xff]   ;;  %v7944_v37 = vpop.f32.mrf.mxu0  ;;  %v7946_v25 = vpop.f32.mrf.mxu1 }
 0x1c8   :  { %v1758_v46 = vsel %vm1502_vm2, %v1390_v28, %v1630_v9  ;;  %3719 = vmatmul.mubr.bf16.gmra.mxu0 %v7903_v17  ;;  %v1287_v62 = vadd.f32 %v7805_v10, %v7128_v7  ;;  %v1748_v13 = vsel %vm1492_vm0, %v7842_v5, %v1620_v32  ;;  %vm1495_vm5 = vcmp.gt.f32.partialorder %v7864_v58, 0.0  ;;  %4009 = vmatprep.subr.bf16.mxu1 %v6383_v50  ;;  %v6384_v10 = vld [vmem:[#allocation8 + $0x1e8] ss:$16 sps:$4 sm:$0xff]  }
 0x1c9   :  { %v1629_v41 = vmul.f32 0.2, %v7876_v59  ;;  %v1631_v39 = vmul.f32 0.2, %v7887_v56  ;;  %3832 = vmatmul.mubr.bf16.gmra.mxu1 %v7913_v33  ;;  %v1750_v28 = vsel %vm1494_vm3, %v1386_v21, %v1622_v30  ;;  %v7933_v23 = vpack.c.bf16 %v1756_v31, %v1748_v13  ;;  %3897 = vmatpush1.bf16.msra.mxu0 %v6378_v57  ;;  %v6387_v21 = vld [vmem:[#allocation8 + $0x3e8] ss:$16 sps:$4 sm:$0xff]  }
 0x1ca   :  { %vm1501_vm6 = vcmp.gt.f32.partialorder %v7876_v59, 0.0  ;;  %vm1503_vm7 = vcmp.gt.f32.partialorder %v7887_v56, 0.0  ;;  %v1623_v5 = vmul.f32 0.2, %v7864_v58  ;;  %v7938_v32 = vpack.c.bf16 %v1758_v46, %v1750_v28  ;;  %4010 = vmatpush1.bf16.msra.mxu1 %v6381_v43  ;;  %3898 = vmatprep.subr.bf16.mxu0 %v6386_v38  ;;  %v6390_v43 = vld [vmem:[#allocation8 + $0x1c8] ss:$16 sps:$4 sm:$0xff]  }
 0x1cb   :  { %v1283_v9 = vadd.f32 %v7749_v12, %v7128_v7  ;;  %v1396_v6 = vadd.f32 %v7764_v14, %v7136_v35  ;;  %v7950_v50 = vadd.f32 %v7780_v22, %v7291_v55  ;;  %v7954_v30 = vadd.f32 %v7795_v2, %v7379_v27  ;;  %4011 = vmatprep.subr.bf16.mxu1 %v6389_v29  ;;  %v6395_v12 = vld [vmem:[#allocation8 + $0x3cc] ss:$16 sps:$4 sm:$0xff]   ;;  %v7976_v29 = vpop.f32.mrf.mxu0 }
 0x1cc   :  { %vm1516_vm8 = vcmp.gt.f32.partialorder %v1287_v62, 0.0  ;;  %v1400_v14 = vadd.f32 %v7819_v40, %v7136_v35  ;;  %v1644_v36 = vmul.f32 0.2, %v1287_v62  ;;  %v1289_v26 = vadd.f32 %v7827_v4, %v7291_v55  ;;  %v6401_v28 = vld [vmem:[#allocation8 + $0x3ac] ss:$16 sps:$4 sm:$0xff]  }
 0x1cd   :  { %v1757_v57 = vsel %vm1501_vm6, %v7876_v59, %v1629_v41  ;;  %v1759_v22 = vsel %vm1503_vm7, %v7887_v56, %v1631_v39  ;;  %v1402_v31 = vadd.f32 %v7834_v44, %v7379_v27  ;;  %v1749_v40 = vsel %vm1493_vm4, %v7860_v16, %v1621_v11  ;;  %3899 = vmatpush2.bf16.msra.mxu0 %v6384_v10  ;;  %v6393_v56 = vld [vmem:[#allocation8 + $0x3c8] ss:$16 sps:$4 sm:$0xff]   ;;  %v7978_v44 = vpop.f32.mrf.mxu1  ;;  %v6398_v11 = vld [vmem:[#allocation8 + $0x1ac] ss:$16 sps:$4 sm:$0xff]  }
 0x1ce   :  { %vm1518_vm9 = vcmp.gt.f32.partialorder %v1400_v14, 0.0  ;;  %v1646_v2 = vmul.f32 0.2, %v1400_v14  ;;  %v1636_v4 = vmul.f32 0.2, %v1283_v9  ;;  %v7971_v46 = vpack.c.bf16 %v1757_v57, %v1749_v40  ;;  %4012 = vmatpush2.bf16.msra.mxu1 %v6387_v21  ;;  %3900 = vmatprep.subr.bf16.mxu0 %v6392_v45 }
 0x1cf   :  { %v1638_v38 = vmul.f32 0.2, %v1396_v6  ;;  %v1751_v59 = vsel %vm1495_vm5, %v7864_v58, %v1623_v5  ;;  %vm1508_vm10 = vcmp.gt.f32.partialorder %v1283_v9, 0.0  ;;  %vm1510_vm11 = vcmp.gt.f32.partialorder %v1396_v6, 0.0  ;;  %4013 = vmatprep.subr.bf16.mxu1 %v6395_v12  ;;  %v1417_v12 = vpop.f32.mrf.mxu1 }
 0x1d0   :  { %vm1509_vm12 = vcmp.gt.f32.partialorder %v7950_v50, 0.0  ;;  %v7981_v16 = vpack.c.bf16 %v1759_v22, %v1751_v59  ;;  %v1637_v13 = vmul.f32 0.2, %v7950_v50  ;;  %v1772_v41 = vsel %vm1516_vm8, %v1287_v62, %v1644_v36  ;;  %3728 = vmatprep.mubr.bf16.mxu0 %v7971_v46 }
 0x1d1   :  { %v1774_v58 = vsel %vm1518_vm9, %v1400_v14, %v1646_v2  ;;  %v1297_v39 = vadd.f32 %v7915_v0, %v7128_v7  ;;  %vm1511_vm13 = vcmp.gt.f32.partialorder %v7954_v30, 0.0  ;;  %v1645_v10 = vmul.f32 0.2, %v1289_v26  ;;  %3729 = vmatmul.mubr.bf16.gmra.mxu0 %v7933_v23  ;;  %v6396_v0 = vld [vmem:[#allocation8 + $0x1a8] ss:$16 sps:$4 sm:$0xff]   ;;  %v1304_v14 = vpop.f32.mrf.mxu0 }
 0x1d2   :  { %v1647_v5 = vmul.f32 0.2, %v1402_v31  ;;  %3841 = vmatprep.mubr.bf16.mxu1 %v7981_v16  ;;  %v1293_v21 = vadd.f32 %v7848_v48, %v7128_v7  ;;  %v1764_v62 = vsel %vm1508_vm10, %v1283_v9, %v1636_v4  ;;  %v1766_v45 = vsel %vm1510_vm11, %v1396_v6, %v1638_v38  ;;  %3901 = vmatpush2.bf16.msra.mxu0 %v6390_v43  ;;  %v6399_v9 = vld [vmem:[#allocation8 + $0x3a8] ss:$16 sps:$4 sm:$0xff]   ;;  %v6404_v6 = vld [vmem:[#allocation8 + $0x18c] ss:$16 sps:$4 sm:$0xff]  }
 0x1d3   :  { %vm1517_vm14 = vcmp.gt.f32.partialorder %v1289_v26, 0.0  ;;  %vm1519_vm15 = vcmp.gt.f32.partialorder %v1402_v31, 0.0  ;;  %3842 = vmatmul.mubr.bf16.gmra.mxu1 %v7938_v32  ;;  %v1639_v36 = vmul.f32 0.2, %v7954_v30  ;;  %v7998_v57 = vpack.c.bf16 %v1772_v41, %v1764_v62  ;;  %3902 = vmatprep.subr.bf16.mxu0 %v6398_v11  ;;  %v6407_v38 = vld [vmem:[#allocation8 + $0x38c] ss:$16 sps:$4 sm:$0xff]  }
 0x1d4   :  { %v8000_v22 = vpack.c.bf16 %v1774_v58, %v1766_v45  ;;  %v1406_v48 = vadd.f32 %v7850_v3, %v7136_v35  ;;  %4014 = vmatpush2.bf16.msra.mxu1 %v6393_v56  ;;  %v8006_v2 = vadd.f32 %v7881_v53, %v7291_v55  ;;  %v8010_v40 = vadd.f32 %v7883_v61, %v7379_v27  ;;  %v6405_v41 = vld [vmem:[#allocation8 + $0x388] ss:$16 sps:$4 sm:$0xff]   ;;  %v1306_v58 = vpop.f32.mrf.mxu0 }
 0x1d5   :  { %v1660_v43 = vmul.f32 0.2, %v1297_v39  ;;  %v1410_v4 = vadd.f32 %v7917_v63, %v7136_v35  ;;  %4015 = vmatprep.subr.bf16.mxu1 %v6401_v28  ;;  %vm1524_vm0 = vcmp.gt.f32.partialorder %v1293_v21, 0.0  ;;  %vm1532_vm1 = vcmp.gt.f32.partialorder %v1297_v39, 0.0  ;;  %v6402_v63 = vld [vmem:[#allocation8 + $0x188] ss:$16 sps:$4 sm:$0xff]   ;;  %v1419_v28 = vpop.f32.mrf.mxu1 }
 0x1d6   :  { %v1773_v3 = vsel %vm1517_vm14, %v1289_v26, %v1645_v10  ;;  %v1775_v59 = vsel %vm1519_vm15, %v1402_v31, %v1647_v5  ;;  %v1652_v56 = vmul.f32 0.2, %v1293_v21  ;;  %v1299_v53 = vadd.f32 %v7944_v37, %v7291_v55  ;;  %3903 = vmatpush2.bf16.msra.mxu0 %v6396_v0  ;;  %v6413_v5 = vld [vmem:[#allocation8 + $0x36c] ss:$16 sps:$4 sm:$0xff]  }
 0x1d7   :  { %v1412_v61 = vadd.f32 %v7946_v25, %v7379_v27  ;;  %v1765_v11 = vsel %vm1509_vm12, %v7950_v50, %v1637_v13  ;;  %vm1526_vm2 = vcmp.gt.f32.partialorder %v1406_v48, 0.0  ;;  %v1654_v26 = vmul.f32 0.2, %v1406_v48  ;;  %3904 = vmatprep.subr.bf16.mxu0 %v6404_v6  ;;  %v6410_v25 = vld [vmem:[#allocation8 + $0x16c] ss:$16 sps:$4 sm:$0xff]   ;;  %v1308_v6 = vpop.f32.mrf.mxu0 }
 0x1d8   :  { %v8023_v10 = vpack.c.bf16 %v1773_v3, %v1765_v11  ;;  %v1767_v37 = vsel %vm1511_vm13, %v7954_v30, %v1639_v36  ;;  %4016 = vmatpush2.bf16.msra.mxu1 %v6399_v9  ;;  %vm1525_vm3 = vcmp.gt.f32.partialorder %v8006_v2, 0.0  ;;  %v1788_v50 = vsel %vm1532_vm1, %v1297_v39, %v1660_v43  ;;  %v1421_v43 = vpop.f32.mrf.mxu1 }
 0x1d9   :  { %v1662_v31 = vmul.f32 0.2, %v1410_v4  ;;  %v8030_v13 = vpack.c.bf16 %v1775_v59, %v1767_v37  ;;  %4017 = vmatprep.subr.bf16.mxu1 %v6407_v38  ;;  %v1653_v62 = vmul.f32 0.2, %v8006_v2  ;;  %v1655_v45 = vmul.f32 0.2, %v8010_v40 }
 0x1da   :  { %vm1534_vm4 = vcmp.gt.f32.partialorder %v1410_v4, 0.0  ;;  %3738 = vmatprep.mubr.bf16.mxu0 %v8023_v10  ;;  %v1305_v30 = vadd.f32 %v1304_v14, %v7291_v55  ;;  %v1780_v0 = vsel %vm1524_vm0, %v1293_v21, %v1652_v56  ;;  %v1661_v36 = vmul.f32 0.2, %v1299_v53  ;;  %3905 = vmatpush2.bf16.msra.mxu0 %v6402_v63  ;;  %v6408_v21 = vld [vmem:[#allocation8 + $0x168] ss:$16 sps:$4 sm:$0xff]  }
 0x1db   :  { %v1663_v9 = vmul.f32 0.2, %v1412_v61  ;;  %3851 = vmatprep.mubr.bf16.mxu1 %v8030_v13  ;;  %3739 = vmatmul.mubr.bf16.gmra.mxu0 %v7998_v57  ;;  %v1418_v39 = vadd.f32 %v1417_v12, %v7379_v27  ;;  %v1782_v38 = vsel %vm1526_vm2, %v1406_v48, %v1654_v26  ;;  %v8041_v3 = vpack.c.bf16 %v1788_v50, %v1780_v0  ;;  %v6411_v48 = vld [vmem:[#allocation8 + $0x368] ss:$16 sps:$4 sm:$0xff]   ;;  %v6416_v56 = vld [vmem:[#allocation8 + $0x14c] ss:$16 sps:$4 sm:$0xff]  }
 0x1dc   :  { %vm1533_vm5 = vcmp.gt.f32.partialorder %v1299_v53, 0.0  ;;  %vm1535_vm6 = vcmp.gt.f32.partialorder %v1412_v61, 0.0  ;;  %3852 = vmatmul.mubr.bf16.gmra.mxu1 %v8000_v22  ;;  %vm1527_vm7 = vcmp.gt.f32.partialorder %v8010_v40, 0.0  ;;  %v1790_v14 = vsel %vm1534_vm4, %v1410_v4, %v1662_v31  ;;  %3906 = vmatprep.subr.bf16.mxu0 %v6410_v25  ;;  %v6419_v37 = vld [vmem:[#allocation8 + $0x34c] ss:$16 sps:$4 sm:$0xff]  }
 0x1dd   :  { %v8048_v59 = vadd.f32 %v7976_v29, %v7128_v7  ;;  %v1307_v12 = vadd.f32 %v1306_v58, %v7128_v7  ;;  %4018 = vmatpush2.bf16.msra.mxu1 %v6405_v41  ;;  %vm1541_vm8 = vcmp.gt.f32.partialorder %v1305_v30, 0.0  ;;  %v1669_v11 = vmul.f32 0.2, %v1305_v30 }
 0x1de   :  { %v1309_v26 = vadd.f32 %v1308_v6, %v7291_v55  ;;  %v1422_v63 = vadd.f32 %v1421_v43, %v7379_v27  ;;  %4019 = vmatprep.subr.bf16.mxu1 %v6413_v5  ;;  %vm1543_vm9 = vcmp.gt.f32.partialorder %v1418_v39, 0.0  ;;  %v1671_v4 = vmul.f32 0.2, %v1418_v39  ;;  %3907 = vmatpush2.bf16.msra.mxu0 %v6408_v21  ;;  %v6414_v27 = vld [vmem:[#allocation8 + $0x148] ss:$16 sps:$4 sm:$0xff]  }
 0x1df   :  { %v1789_v50 = vsel %vm1533_vm5, %v1299_v53, %v1661_v36  ;;  %v1791_v29 = vsel %vm1535_vm6, %v1412_v61, %v1663_v9  ;;  %v1420_v7 = vadd.f32 %v1419_v28, %v7136_v35  ;;  %v1781_v41 = vsel %vm1525_vm3, %v8006_v2, %v1653_v62  ;;  %3908 = vmatprep.subr.bf16.mxu0 %v6416_v56  ;;  %v6417_v5 = vld [vmem:[#allocation8 + $0x348] ss:$16 sps:$4 sm:$0xff]   ;;  %v6422_v9 = vld [vmem:[#allocation8 + $0x12c] ss:$16 sps:$4 sm:$0xff]  }
 0x1e0   :  { %vm1549_vm10 = vcmp.gt.f32.partialorder %v1309_v26, 0.0  ;;  %v1783_v55 = vsel %vm1527_vm7, %v8010_v40, %v1655_v45  ;;  %v1677_v58 = vmul.f32 0.2, %v1309_v26  ;;  %vm1551_vm11 = vcmp.gt.f32.partialorder %v1422_v63, 0.0  ;;  %v6420_v36 = vld [vmem:[#allocation8 + $0x128] ss:$16 sps:$4 sm:$0xff]  }
 0x1e1   :  { %v1679_v25 = vmul.f32 0.2, %v1422_v63  ;;  %v8062_v31 = vpack.c.bf16 %v1789_v50, %v1781_v41  ;;  %4020 = vmatpush2.bf16.msra.mxu1 %v6411_v48  ;;  %v8064_v53 = vpack.c.bf16 %v1790_v14, %v1782_v38  ;;  %v1416_v61 = vadd.f32 %v7978_v44, %v7136_v35  ;;  %v6425_v43 = vld [vmem:[#allocation8 + $0x32c] ss:$16 sps:$4 sm:$0xff]   ;;  %v6429_v50 = vld [vmem:[#allocation8 + $0x308] ss:$16 sps:$4 sm:$0xff]  }
 0x1e2   :  { %v1676_v28 = vmul.f32 0.2, %v1307_v12  ;;  %v8068_v2 = vpack.c.bf16 %v1791_v29, %v1783_v55  ;;  %4021 = vmatprep.subr.bf16.mxu1 %v6419_v37  ;;  %v1797_v40 = vsel %vm1541_vm8, %v1305_v30, %v1669_v11  ;;  %v1805_v62 = vsel %vm1549_vm10, %v1309_v26, %v1677_v58  ;;  %3909 = vmatpush2.bf16.msra.mxu0 %v6414_v27  ;;  %v6428_v21 = vld [vmem:[#allocation8 + $0x10c] ss:$16 sps:$4 sm:$0xff]   ;;  %v6426_v37 = vld [vmem:[#allocation8 + $0x108] ss:$16 sps:$4 sm:$0xff]  }
 0x1e3   :  { %3748 = vmatprep.mubr.bf16.mxu0 %v8062_v31  ;;  %v1799_v45 = vsel %vm1543_vm9, %v1418_v39, %v1671_v4  ;;  %v1807_v0 = vsel %vm1551_vm11, %v1422_v63, %v1679_v25  ;;  %vm1548_vm12 = vcmp.gt.f32.partialorder %v1307_v12, 0.0  ;;  %v1678_v6 = vmul.f32 0.2, %v1420_v7  ;;  %v6423_v39 = vld [vmem:[#allocation8 + $0x328] ss:$16 sps:$4 sm:$0xff]   ;;  %3910 = vmatprep.subr.bf16.mxu0 %v6422_v9 }
 0x1e4   :  { %3861 = vmatprep.mubr.bf16.mxu1 %v8068_v2  ;;  %3749 = vmatmul.mubr.bf16.gmra.mxu0 %v8041_v3  ;;  %v8076_v35 = vpack.c.bf16 %v1805_v62, %v1797_v40  ;;  %v8078_v44 = vpack.c.bf16 %v1807_v0, %v1799_v45  ;;  %v1668_v30 = vmul.f32 0.2, %v8048_v59  ;;  %vm1550_vm13 = vcmp.gt.f32.partialorder %v1420_v7, 0.0  ;;  %v6431_v48 = vld [vmem:[#allocation8 + $0x30c] ss:$16 sps:$4 sm:$0xff]  }
 0x1e5   :  { %3862 = vmatmul.mubr.bf16.gmra.mxu1 %v8064_v53  ;;  %vm1540_vm14 = vcmp.gt.f32.partialorder %v8048_v59, 0.0  ;;  %v1670_v38 = vmul.f32 0.2, %v1416_v61  ;;  %vm1542_vm15 = vcmp.gt.f32.partialorder %v1416_v61, 0.0  ;;  %v1804_v14 = vsel %vm1548_vm12, %v1307_v12, %v1676_v28  ;;  %v6434_v12 = vld [vmem:[#allocation8 + $0x4ec] ss:$16 sps:$4 sm:$0xff]  }
 0x1e6   :  { %4022 = vmatpush2.bf16.msra.mxu1 %v6417_v5  ;;  %3758 = vmatprep.mubr.bf16.mxu0 %v8076_v35  ;;  %v1806_v56 = vsel %vm1550_vm13, %v1420_v7, %v1678_v6  ;;  %v1796_v11 = vsel %vm1540_vm14, %v8048_v59, %v1668_v30  ;;  %v6437_v29 = vld [vmem:[#allocation8 + $0x6ec] ss:$16 sps:$4 sm:$0xff]   ;;  %v6432_v59 = vld [vmem:[#allocation8 + $0x4e8] ss:$16 sps:$4 sm:$0xff]  }
 0x1e7   :  { %3871 = vmatprep.mubr.bf16.mxu1 %v8078_v44  ;;  %4023 = vmatprep.subr.bf16.mxu1 %v6425_v43  ;;  %v1798_v26 = vsel %vm1542_vm15, %v1416_v61, %v1670_v38  ;;  %v8087_v63 = vpack.c.bf16 %v1804_v14, %v1796_v11  ;;  %v6435_v7 = vld [vmem:[#allocation8 + $0x6e8] ss:$16 sps:$4 sm:$0xff]   ;;  %v6440_v41 = vld [vmem:[#allocation8 + $0x4cc] ss:$16 sps:$4 sm:$0xff]  }
 0x1e8   :  { %3911 = vmatpush2.bf16.msra.mxu0 %v6420_v36  ;;  %v8089_v4 = vpack.c.bf16 %v1806_v56, %v1798_v26  ;;  %v6443_v55 = vld [vmem:[#allocation8 + $0x6cc] ss:$16 sps:$4 sm:$0xff]   ;;  %v6444_v25 = vld [vmem:[#allocation8 + $0x4a8] ss:$16 sps:$4 sm:$0xff]  }
 0x1e9   :  { %3912 = vmatprep.subr.bf16.mxu0 %v6428_v21  ;;  %v6446_v27 = vld [vmem:[#allocation8 + $0x4ac] ss:$16 sps:$4 sm:$0xff]   ;;  %v6456_v40 = vld [vmem:[#allocation8 + $0x468] ss:$16 sps:$4 sm:$0xff]  }
 0x1ea   :  { %4024 = vmatpush2.bf16.msra.mxu1 %v6423_v39  ;;  %v6449_v58 = vld [vmem:[#allocation8 + $0x6ac] ss:$16 sps:$4 sm:$0xff]   ;;  %v6465_v45 = vld [vmem:[#allocation8 + $0x648] ss:$16 sps:$4 sm:$0xff]  }
 0x1eb   :  { %4025 = vmatprep.subr.bf16.mxu1 %v6431_v48  ;;  %v6452_v61 = vld [vmem:[#allocation8 + $0x48c] ss:$16 sps:$4 sm:$0xff]   ;;  %v6468_v9 = vld [vmem:[#allocation8 + $0x428] ss:$16 sps:$4 sm:$0xff]  }
 0x1ec   :  { %3759 = vmatmul.mubr.bf16.gmra.mxu0 %v8087_v63  ;;  %v6458_v28 = vld [vmem:[#allocation8 + $0x46c] ss:$16 sps:$4 sm:$0xff]   ;;  %v8693_v43 = vld [vmem:[#allocation23_spill] sm:$0xff]  ;;  %v8695_v30 = vld [vmem:[#allocation25_spill] sm:$0xff] }
 0x1ed   :  { %3872 = vmatmul.mubr.bf16.gmra.mxu1 %v8089_v4  ;;  %3914 = vmatprep.mubr.bf16.mxu0 %v7017_v54  ;;  %v6438_v54 = vld [vmem:[#allocation8 + $0x4c8] ss:$16 sps:$4 sm:$0xff]   ;;  %v6461_v5 = vld [vmem:[#allocation8 + $0x66c] ss:$16 sps:$4 sm:$0xff]  }
 0x1ee   :  { %4027 = vmatprep.mubr.bf16.mxu1 %v7033_v15  ;;  %3913 = vmatpush2.bf16.msra.mxu0 %v6426_v37  ;;  %v6441_v15 = vld [vmem:[#allocation8 + $0x6c8] ss:$16 sps:$4 sm:$0xff]   ;;  %v6464_v62 = vld [vmem:[#allocation8 + $0x44c] ss:$16 sps:$4 sm:$0xff]  }
 0x1ef   :  { %4026 = vmatpush2.bf16.msra.mxu1 %v6429_v50  ;;  %4108 = vmatprep.subr.bf16.mxu0 %v6434_v12  ;;  %v6470_v0 = vld [vmem:[#allocation8 + $0x42c] ss:$16 sps:$4 sm:$0xff]   ;;  %v6474_v38 = vld [vmem:[#allocation8 + $0x408] ss:$16 sps:$4 sm:$0xff]  }
 0x1f0   :  { %4221 = vmatprep.subr.bf16.mxu1 %v6437_v29  ;;  %v6473_v36 = vld [vmem:[#allocation8 + $0x62c] ss:$16 sps:$4 sm:$0xff]   ;;  %v6477_v21 = vld [vmem:[#allocation8 + $0x608] ss:$16 sps:$4 sm:$0xff]  }
 0x1f1   :  { %v6476_v6 = vld [vmem:[#allocation8 + $0x40c] ss:$16 sps:$4 sm:$0xff]   ;;  %v6480_v56 = vld [vmem:[#allocation8 + $0x5e8] ss:$16 sps:$4 sm:$0xff]  }
 0x1f2   :  { %v8696_v39 = vld [vmem:[#allocation26_spill] sm:$0xff]  ;;  %v8697_v37 = vld [vmem:[#allocation27_spill] sm:$0xff]  ;;  %v8698_v12 = vld [vmem:[#allocation28_spill] sm:$0xff] }
 0x1f3   :  { %v6482_v14 = vld [vmem:[#allocation8 + $0x5ec] ss:$16 sps:$4 sm:$0xff]   ;;  %v6483_v11 = vld [vmem:[#allocation8 + $0x7e8] ss:$16 sps:$4 sm:$0xff]  }
 0x1f4   :  { %3915 = vmatmul.mubr.bf16.vlgmr.msra.gmra.mxu0 %v7020_v18  ;;  %v6447_v18 = vld [vmem:[#allocation8 + $0x6a8] ss:$16 sps:$4 sm:$0xff]   ;;  %v6485_v48 = vld [vmem:[#allocation8 + $0x7ec] ss:$16 sps:$4 sm:$0xff]  }
 0x1f5   :  { %4028 = vmatmul.mubr.bf16.vlgmr.msra.gmra.mxu1 %v7024_v1  ;;  %3924 = vmatprep.mubr.bf16.mxu0 %v7046_v20  ;;  %v6455_v1 = vld [vmem:[#allocation8 + $0x68c] ss:$16 sps:$4 sm:$0xff]   ;;  %v6450_v20 = vld [vmem:[#allocation8 + $0x488] ss:$16 sps:$4 sm:$0xff]  }
 0x1f6   :  { %4037 = vmatprep.mubr.bf16.mxu1 %v7064_v60  ;;  %4109 = vmatpush1.bf16.msra.mxu0 %v6432_v59  ;;  %v6453_v60 = vld [vmem:[#allocation8 + $0x688] ss:$16 sps:$4 sm:$0xff]   ;;  %v6488_v26 = vld [vmem:[#allocation8 + $0x5cc] ss:$16 sps:$4 sm:$0xff]  }
 0x1f7   :  { %4222 = vmatpush1.bf16.msra.mxu1 %v6435_v7  ;;  %4110 = vmatprep.subr.bf16.mxu0 %v6440_v41  ;;  %v6491_v50 = vld [vmem:[#allocation8 + $0x7cc] ss:$16 sps:$4 sm:$0xff]   ;;  %v8699_v29 = vld [vmem:[#allocation29_spill] sm:$0xff] }
 0x1f8   :  { %4223 = vmatprep.subr.bf16.mxu1 %v6443_v55  ;;  %v8700_v59 = vld [vmem:[#allocation30_spill] sm:$0xff] }
 0x1f9   :  { %v6486_v7 = vld [vmem:[#allocation8 + $0x5c8] ss:$16 sps:$4 sm:$0xff]   ;;  %v6494_v55 = vld [vmem:[#allocation8 + $0x5ac] ss:$16 sps:$4 sm:$0xff]  }
 0x1fa   :  { %4111 = vmatpush1.bf16.msra.mxu0 %v6438_v54  ;;  %v6489_v41 = vld [vmem:[#allocation8 + $0x7c8] ss:$16 sps:$4 sm:$0xff]   ;;  %v6497_v54 = vld [vmem:[#allocation8 + $0x7ac] ss:$16 sps:$4 sm:$0xff]  }
 0x1fb   :  { %4224 = vmatpush1.bf16.msra.mxu1 %v6441_v15  ;;  %4112 = vmatprep.subr.bf16.mxu0 %v6446_v27  ;;  %v2128_v15 = vld [vmem:[%s8612_s4] sm:$0xf] }
 0x1fc   :  { %3925 = vmatmul.mubr.bf16.gmra.mxu0 %v7052_v47  ;;  %4225 = vmatprep.subr.bf16.mxu1 %v6449_v58  ;;  %v6459_v47 = vld [vmem:[#allocation8 + $0x668] ss:$16 sps:$4 sm:$0xff]  }
 0x1fd   :  { %4038 = vmatmul.mubr.bf16.gmra.mxu1 %v7076_v19  ;;  %3934 = vmatprep.mubr.bf16.mxu0 %v7090_v42  ;;  %v6467_v19 = vld [vmem:[#allocation8 + $0x64c] ss:$16 sps:$4 sm:$0xff]   ;;  %v6492_v27 = vld [vmem:[#allocation8 + $0x5a8] ss:$16 sps:$4 sm:$0xff]  }
 0x1fe   :  { %4047 = vmatprep.mubr.bf16.mxu1 %v7115_v34  ;;  %4113 = vmatpush1.bf16.msra.mxu0 %v6444_v25  ;;  %v8692_v42 = vld [vmem:[#allocation22_spill] sm:$0xff] }
 0x1ff   :  { %4226 = vmatpush1.bf16.msra.mxu1 %v6447_v18  ;;  %4114 = vmatprep.subr.bf16.mxu0 %v6452_v61  ;;  %v6462_v34 = vld [vmem:[#allocation8 + $0x448] ss:$16 sps:$4 sm:$0xff]   ;;  %v6500_v25 = vld [vmem:[#allocation8 + $0x58c] ss:$16 sps:$4 sm:$0xff]  }
 0x200   :  { %4227 = vmatprep.subr.bf16.mxu1 %v6455_v1  ;;  %v6495_v58 = vld [vmem:[#allocation8 + $0x7a8] ss:$16 sps:$4 sm:$0xff]  }
 0x201   :  { %v8701_v18 = vld [vmem:[#allocation20_spill] sm:$0xff]  ;;  %v8702_v1 = vld [vmem:[#allocation31_spill] sm:$0xff] }
 0x202   :  { %4115 = vmatpush1.bf16.msra.mxu0 %v6450_v20  ;;  %v8119_v61 = vrot.slane %v2128_v15, %v8701_v18  ;;  %v6503_v20 = vld [vmem:[#allocation8 + $0x78c] ss:$16 sps:$4 sm:$0xff]  }
 0x203   :  { %4228 = vmatpush1.bf16.msra.mxu1 %v6453_v60  ;;  %4116 = vmatprep.subr.bf16.mxu0 %v6458_v28  ;;  %v8703_v60 = vld [vmem:[#allocation32_spill] sm:$0xff]  ;;  %v8704_v28 = vld [vmem:[#allocation33_spill] sm:$0xff] }
 0x204   :  { %3935 = vmatmul.mubr.bf16.gmra.mxu0 %v7123_v24  ;;  %4229 = vmatprep.subr.bf16.mxu1 %v6461_v5  ;;  %v6471_v24 = vld [vmem:[#allocation8 + $0x628] ss:$16 sps:$4 sm:$0xff]  }
 0x205   :  { %4048 = vmatmul.mubr.bf16.gmra.mxu1 %v7125_v49  ;;  %3944 = vmatprep.mubr.bf16.mxu0 %v7168_v51  ;;  %v6479_v49 = vld [vmem:[#allocation8 + $0x60c] ss:$16 sps:$4 sm:$0xff]   ;;  %v8705_v5 = vld [vmem:[#allocation21_spill] sm:$0xff] }
 0x206   :  { %4057 = vmatprep.mubr.bf16.mxu1 %v8692_v42  ;;  %4117 = vmatpush1.bf16.msra.mxu0 %v6456_v40  ;;  %v8694_v51 = vld [vmem:[#allocation24_spill] sm:$0xff]  ;;  %v8125_v40 = vrot.slane %v2128_v15, %v8705_v5 }
 0x207   :  { %4230 = vmatpush1.bf16.msra.mxu1 %v6459_v47  ;;  %4118 = vmatprep.subr.bf16.mxu0 %v6464_v62  ;;  %v8706_v47 = vld [vmem:[#allocation34_spill] sm:$0xff] }
 0x208   :  { %4231 = vmatprep.subr.bf16.mxu1 %v6467_v19  ;;  %v6498_v62 = vld [vmem:[#allocation8 + $0x588] ss:$16 sps:$4 sm:$0xff]  }
 0x209   :  { %v6501_v42 = vld [vmem:[#allocation8 + $0x788] ss:$16 sps:$4 sm:$0xff]  }
 0x20a   :  { %4119 = vmatpush1.bf16.msra.mxu0 %v6462_v34  ;;  %v6506_v34 = vld [vmem:[#allocation8 + $0x56c] ss:$16 sps:$4 sm:$0xff]   ;;  %v6516_v15 = vld [vmem:[#allocation8 + $0x528] ss:$16 sps:$4 sm:$0xff]  }
 0x20b   :  { %4232 = vmatpush1.bf16.msra.mxu1 %v6465_v45  ;;  %4120 = vmatprep.subr.bf16.mxu0 %v6470_v0  ;;  %v6509_v0 = vld [vmem:[#allocation8 + $0x76c] ss:$16 sps:$4 sm:$0xff]   ;;  %v6615_v5 = vld [vmem:[#allocation10 + $0x1a0] ss:$8 sps:$4 sm:$0xff]  }
 0x20c   :  { %3945 = vmatmul.mubr.bf16.gmra.mxu0 %v8693_v43  ;;  %4233 = vmatprep.subr.bf16.mxu1 %v6473_v36 }
 0x20d   :  { %4058 = vmatmul.mubr.bf16.gmra.mxu1 %v8694_v51  ;;  %3954 = vmatprep.mubr.bf16.mxu0 %v8695_v30  ;;  %v6507_v51 = vld [vmem:[#allocation8 + $0x768] ss:$16 sps:$4 sm:$0xff]   ;;  %v6512_v30 = vld [vmem:[#allocation8 + $0x54c] ss:$16 sps:$4 sm:$0xff]  }
 0x20e   :  { %4067 = vmatprep.mubr.bf16.mxu1 %v8696_v39  ;;  %4121 = vmatpush1.bf16.msra.mxu0 %v6468_v9 }
 0x20f   :  { %4234 = vmatpush1.bf16.msra.mxu1 %v6471_v24  ;;  %4122 = vmatprep.subr.bf16.mxu0 %v6476_v6  ;;  %v6504_v6 = vld [vmem:[#allocation8 + $0x568] ss:$16 sps:$4 sm:$0xff]  }
 0x210   :  { %4235 = vmatprep.subr.bf16.mxu1 %v6479_v49 }
 0x212   :  { %4123 = vmatpush1.bf16.msra.mxu0 %v6474_v38  ;;  %v8707_v38 = vld [vmem:[#allocation35_spill] sm:$0xff] }
 0x213   :  { %4236 = vmatpush1.bf16.msra.mxu1 %v6477_v21  ;;  %4124 = vmatprep.subr.bf16.mxu0 %v6482_v14  ;;  %v6515_v21 = vld [vmem:[#allocation8 + $0x74c] ss:$16 sps:$4 sm:$0xff]  }
 0x214   :  { %3955 = vmatmul.mubr.bf16.gmra.mxu0 %v8697_v37  ;;  %4237 = vmatprep.subr.bf16.mxu1 %v6485_v48  ;;  %v8710_v37 = vld [vmem:[#allocation38_spill] sm:$0xff] }
 0x215   :  { %4068 = vmatmul.mubr.bf16.gmra.mxu1 %v8698_v12  ;;  %3964 = vmatprep.mubr.bf16.mxu0 %v8699_v29  ;;  %v6513_v12 = vld [vmem:[#allocation8 + $0x748] ss:$16 sps:$4 sm:$0xff]   ;;  %v6518_v29 = vld [vmem:[#allocation8 + $0x52c] ss:$16 sps:$4 sm:$0xff]  }
 0x216   :  { %4077 = vmatprep.mubr.bf16.mxu1 %v8700_v59  ;;  %4125 = vmatpush2.bf16.msra.mxu0 %v6480_v56  ;;  %v8708_v56 = vld [vmem:[#allocation36_spill] sm:$0xff] }
 0x217   :  { %4238 = vmatpush2.bf16.msra.mxu1 %v6483_v11  ;;  %4126 = vmatprep.subr.bf16.mxu0 %v6488_v26  ;;  %v8709_v11 = vld [vmem:[#allocation37_spill] sm:$0xff] }
 0x218   :  { %4239 = vmatprep.subr.bf16.mxu1 %v6491_v50  ;;  %v6510_v50 = vld [vmem:[#allocation8 + $0x548] ss:$16 sps:$4 sm:$0xff]  }
 0x21a   :  { %4127 = vmatpush2.bf16.msra.mxu0 %v6486_v7 }
 0x21b   :  { %4240 = vmatpush2.bf16.msra.mxu1 %v6489_v41  ;;  %4128 = vmatprep.subr.bf16.mxu0 %v6494_v55  ;;  %v6521_v41 = vld [vmem:[#allocation8 + $0x72c] ss:$16 sps:$4 sm:$0xff]  }
 0x21c   :  { %3965 = vmatmul.mubr.bf16.gmra.mxu0 %v8702_v1  ;;  %4241 = vmatprep.subr.bf16.mxu1 %v6497_v54 }
 0x21d   :  { %4078 = vmatmul.mubr.bf16.gmra.mxu1 %v8703_v60  ;;  %3974 = vmatprep.mubr.bf16.mxu0 %v8704_v28  ;;  %v6527_v60 = vld [vmem:[#allocation8 + $0x70c] ss:$16 sps:$4 sm:$0xff]  }
 0x21e   :  { %4087 = vmatprep.mubr.bf16.mxu1 %v8706_v47  ;;  %4129 = vmatpush2.bf16.msra.mxu0 %v6492_v27 }
 0x21f   :  { %4242 = vmatpush2.bf16.msra.mxu1 %v6495_v58  ;;  %4130 = vmatprep.subr.bf16.mxu0 %v6500_v25  ;;  %v6519_v58 = vld [vmem:[#allocation8 + $0x728] ss:$16 sps:$4 sm:$0xff]   ;;  %v6524_v25 = vld [vmem:[#allocation8 + $0x50c] ss:$16 sps:$4 sm:$0xff]  }
 0x220   :  { %v3464_v19 = vpop.f32.mrf.mxu0  ;;  %4243 = vmatprep.subr.bf16.mxu1 %v6503_v20  ;;  %v8711_v20 = vld [vmem:[#allocation39_spill] sm:$0xff] }
 0x221   :  { %v3465_v45 = vadd.f32 %v3464_v19, %v8119_v61  ;;  %v3577_v9 = vpop.f32.mrf.mxu1  ;;  %v8713_v19 = vld [vmem:[#allocation43_spill] sm:$0xff] }
 0x222   :  { %v3466_v36 = vpop.f32.mrf.mxu0  ;;  %4131 = vmatpush2.bf16.msra.mxu0 %v6498_v62  ;;  %v8712_v62 = vld [vmem:[#allocation40_spill] sm:$0xff] }
 0x223   :  { %v3467_v24 = vadd.f32 %v3466_v36, %v8125_v40  ;;  %v8130_v43 = vadd.f32 %v3577_v9, %v3465_v45  ;;  %4244 = vmatpush2.bf16.msra.mxu1 %v6501_v42  ;;  %4132 = vmatprep.subr.bf16.mxu0 %v6506_v34  ;;  %v3579_v39 = vpop.f32.mrf.mxu1  ;;  %v8714_v34 = vld [vmem:[#allocation44_spill] sm:$0xff] }
 0x224   :  { %v8132_v49 = vpop.f32.mrf.mxu0  ;;  %3975 = vmatmul.mubr.bf16.gmra.mxu0 %v8707_v38  ;;  %4245 = vmatprep.subr.bf16.mxu1 %v6509_v0  ;;  %v6522_v45 = vld [vmem:[#allocation8 + $0x508] ss:$16 sps:$4 sm:$0xff]  }
 0x225   :  { %v8135_v14 = vadd.f32 %v3579_v39, %v3467_v24  ;;  %4088 = vmatmul.mubr.bf16.gmra.mxu1 %v8708_v56  ;;  %3984 = vmatprep.mubr.bf16.mxu0 %v8709_v11  ;;  %v8141_v26 = vpop.f32.mrf.mxu1  ;;  %v6525_v36 = vld [vmem:[#allocation8 + $0x708] ss:$16 sps:$4 sm:$0xff]   ;;  %v6530_v24 = vld [vmem:[#allocation10 + $0x74] ss:$8 sps:$4 sm:$0xff]  }
 0x226   :  { %v8137_v48 = vpop.f32.mrf.mxu0  ;;  %4097 = vmatprep.mubr.bf16.mxu1 %v8710_v37  ;;  %4133 = vmatpush2.bf16.msra.mxu0 %v6504_v6  ;;  %v8715_v56 = vld [vmem:[#allocation41_spill] sm:$0xff]  ;;  %v8716_v37 = vld [vmem:[#allocation42_spill] sm:$0xff] }
 0x227   :  { %4246 = vmatpush2.bf16.msra.mxu1 %v6507_v51  ;;  %4134 = vmatprep.subr.bf16.mxu0 %v6512_v30  ;;  %v8144_v59 = vpop.f32.mrf.mxu1  ;;  %v6528_v30 = vld [vmem:[#allocation10 + $0x70] ss:$8 sps:$4 sm:$0xff]  }
 0x228   :  { %v3474_v7 = vpop.f32.mrf.mxu0  ;;  %4247 = vmatprep.subr.bf16.mxu1 %v6515_v21  ;;  %v6533_v21 = vld [vmem:[#allocation10 + $0x64] ss:$8 sps:$4 sm:$0xff]  }
 0x229   :  { %v3475_v55 = vadd.f32 %v3474_v7, %v8119_v61  ;;  %v3587_v1 = vpop.f32.mrf.mxu1  ;;  %v8718_v7 = vld [vmem:[#allocation46_spill] sm:$0xff] }
 0x22a   :  { %v3476_v54 = vpop.f32.mrf.mxu0  ;;  %4135 = vmatpush2.bf16.msra.mxu0 %v6510_v50  ;;  %v8717_v50 = vld [vmem:[#allocation45_spill] sm:$0xff] }
 0x22b   :  { %v3477_v27 = vadd.f32 %v3476_v54, %v8125_v40  ;;  %4248 = vmatpush2.bf16.msra.mxu1 %v6513_v12  ;;  %4136 = vmatprep.subr.bf16.mxu0 %v6518_v29  ;;  %v8149_v28 = vadd.f32 %v3587_v1, %v3475_v55  ;;  %v3589_v42 = vpop.f32.mrf.mxu1  ;;  %v6531_v54 = vld [vmem:[#allocation10 + $0x60] ss:$8 sps:$4 sm:$0xff]  }
 0x22c   :  { %3985 = vmatmul.mubr.bf16.gmra.mxu0 %v8711_v20  ;;  %4249 = vmatprep.subr.bf16.mxu1 %v6521_v41  ;;  %v8151_v47 = vpop.f32.mrf.mxu0 }
 0x22d   :  { %4098 = vmatmul.mubr.bf16.gmra.mxu1 %v8712_v62  ;;  %4140 = vmatprep.mubr.bf16.mxu0 %v8713_v19  ;;  %v8156_v0 = vadd.f32 %v3589_v42, %v3477_v27  ;;  %v8158_v9 = vpop.f32.mrf.mxu1  ;;  %v6534_v19 = vld [vmem:[#allocation10 + $0x50] ss:$8 sps:$4 sm:$0xff]   ;;  %v6539_v42 = vld [vmem:[#allocation10 + $0x44] ss:$8 sps:$4 sm:$0xff]  }
 0x22e   :  { %4137 = vmatpush2.bf16.msra.mxu0 %v6516_v15  ;;  %4253 = vmatprep.mubr.bf16.mxu1 %v8714_v34  ;;  %v8160_v6 = vpop.f32.mrf.mxu0  ;;  %v8719_v34 = vld [vmem:[#allocation47_spill] sm:$0xff] }
 0x22f   :  { %4250 = vmatpush2.bf16.msra.mxu1 %v6519_v58  ;;  %4138 = vmatprep.subr.bf16.mxu0 %v6524_v25  ;;  %v8162_v51 = vpop.f32.mrf.mxu1  ;;  %v6536_v58 = vld [vmem:[#allocation10 + $0x54] ss:$8 sps:$4 sm:$0xff]  }
 0x230   :  { %4251 = vmatprep.subr.bf16.mxu1 %v6527_v60 }
 0x232   :  { %4139 = vmatpush2.bf16.msra.mxu0 %v6522_v45 }
 0x233   :  { %4252 = vmatpush2.bf16.msra.mxu1 %v6525_v36  ;;  %4954 = vmatprep.subr.bf16.mxu0 %v6530_v24  ;;  %v8720_v36 = vld [vmem:[#allocation48_spill] sm:$0xff]  ;;  %v8721_v24 = vld [vmem:[#allocation49_spill] sm:$0xff] }
 0x234   :  { %v3484_v39 = vpop.f32.mrf.mxu0  ;;  %v3597_v38 = vpop.f32.mrf.mxu1 }
 0x235   :  { %4141 = vmatmul.mubr.bf16.vlgmr.msra.gmra.mxu0 %v8715_v56  ;;  %v3485_v11 = vadd.f32 %v3484_v39, %v8119_v61  ;;  %v6537_v56 = vld [vmem:[#allocation10 + $0x40] ss:$8 sps:$4 sm:$0xff]  }
 0x236   :  { %4254 = vmatmul.mubr.bf16.vlgmr.msra.gmra.mxu1 %v8716_v37  ;;  %4150 = vmatprep.mubr.bf16.mxu0 %v8717_v50  ;;  %v3486_v12 = vpop.f32.mrf.mxu0  ;;  %v3599_v29 = vpop.f32.mrf.mxu1 }
 0x237   :  { %4263 = vmatprep.mubr.bf16.mxu1 %v8718_v7  ;;  %v8169_v41 = vadd.f32 %v3597_v38, %v3485_v11  ;;  %v3487_v55 = vadd.f32 %v3486_v12, %v8125_v40  ;;  %4955 = vmatpush1.bf16.msra.mxu0 %v6528_v30  ;;  %v8722_v38 = vld [vmem:[#allocation50_spill] sm:$0xff] }
 0x238   :  { %v3488_v15 = vpop.f32.mrf.mxu0  ;;  %v3601_v27 = vpop.f32.mrf.mxu1  ;;  %4956 = vmatprep.subr.bf16.mxu0 %v6533_v21  ;;  %v6542_v12 = vld [vmem:[#allocation10 + $0x34] ss:$8 sps:$4 sm:$0xff]  }
 0x239   :  { %v8172_v25 = vadd.f32 %v3599_v29, %v3487_v55  ;;  %v3489_v1 = vadd.f32 %v3488_v15, %v8119_v61 }
 0x23a   :  { %v8175_v20 = vpop.f32.mrf.mxu0  ;;  %v8177_v60 = vpop.f32.mrf.mxu1 }
 0x23b   :  { %v8179_v62 = vadd.f32 %v3601_v27, %v3489_v1  ;;  %4957 = vmatpush1.bf16.msra.mxu0 %v6531_v54  ;;  %v6540_v27 = vld [vmem:[#allocation10 + $0x30] ss:$8 sps:$4 sm:$0xff]  }
 0x23c   :  { %4958 = vmatprep.subr.bf16.mxu0 %v6536_v58  ;;  %v3494_v45 = vpop.f32.mrf.mxu0 }
 0x23d   :  { %4151 = vmatmul.mubr.bf16.gmra.mxu0 %v8719_v34  ;;  %v3495_v30 = vadd.f32 %v3494_v45, %v8119_v61  ;;  %v6545_v34 = vld [vmem:[#allocation10 + $0x24] ss:$8 sps:$4 sm:$0xff]  }
 0x23e   :  { %4264 = vmatmul.mubr.bf16.gmra.mxu1 %v8720_v36  ;;  %4160 = vmatprep.mubr.bf16.mxu0 %v8721_v24  ;;  %v3607_v39 = vpop.f32.mrf.mxu1  ;;  %v3496_v21 = vpop.f32.mrf.mxu0  ;;  %v8723_v45 = vld [vmem:[#allocation51_spill] sm:$0xff] }
 0x23f   :  { %4273 = vmatprep.mubr.bf16.mxu1 %v8722_v38  ;;  %4959 = vmatpush1.bf16.msra.mxu0 %v6534_v19  ;;  %v8186_v11 = vadd.f32 %v3607_v39, %v3495_v30  ;;  %v3497_v37 = vadd.f32 %v3496_v21, %v8125_v40  ;;  %v6543_v38 = vld [vmem:[#allocation10 + $0x20] ss:$8 sps:$4 sm:$0xff]   ;;  %v6576_v21 = vld [vmem:[#allocation10 + $0x170] ss:$8 sps:$4 sm:$0xff]  }
 0x240   :  { %v3609_v50 = vpop.f32.mrf.mxu1  ;;  %4960 = vmatprep.subr.bf16.mxu0 %v6539_v42  ;;  %v3498_v29 = vpop.f32.mrf.mxu0  ;;  %v8724_v42 = vld [vmem:[#allocation52_spill] sm:$0xff] }
 0x241   :  { %v8189_v7 = vadd.f32 %v3609_v50, %v3497_v37  ;;  %v3499_v55 = vadd.f32 %v3498_v29, %v8119_v61  ;;  %v6548_v50 = vld [vmem:[#allocation10 + $0x14] ss:$8 sps:$4 sm:$0xff]  }
 0x242   :  { %v3611_v54 = vpop.f32.mrf.mxu1  ;;  %v3500_v15 = vpop.f32.mrf.mxu0 }
 0x243   :  { %4961 = vmatpush1.bf16.msra.mxu0 %v6537_v56  ;;  %v8192_v58 = vadd.f32 %v3611_v54, %v3499_v55  ;;  %v3501_v1 = vadd.f32 %v3500_v15, %v8125_v40  ;;  %v6578_v56 = vld [vmem:[#allocation10 + $0x174] ss:$8 sps:$4 sm:$0xff]  }
 0x244   :  { %v3613_v19 = vpop.f32.mrf.mxu1  ;;  %4962 = vmatprep.subr.bf16.mxu0 %v6542_v12  ;;  %5067 = vmatprep.subr.bf16.mxu1 %v6578_v56  ;;  %v6554_v56 = vld [vmem:[#allocation10 + $0xf4] ss:$8 sps:$4 sm:$0xff]  }
 0x245   :  { %4161 = vmatmul.mubr.bf16.gmra.mxu0 %v8723_v45  ;;  %v8198_v36 = vadd.f32 %v3613_v19, %v3501_v1  ;;  %v3504_v24 = vpop.f32.mrf.mxu0  ;;  %5068 = vmatpush1.bf16.msra.mxu1 %v6576_v21  ;;  %v6581_v1 = vld [vmem:[#allocation10 + $0x164] ss:$8 sps:$4 sm:$0xff]   ;;  %v6579_v45 = vld [vmem:[#allocation10 + $0x160] ss:$8 sps:$4 sm:$0xff]  }
 0x246   :  { %4274 = vmatmul.mubr.bf16.gmra.mxu1 %v8724_v42  ;;  %4170 = vmatprep.mubr.bf16.mxu0 %v7889_v52  ;;  %v3505_v30 = vadd.f32 %v3504_v24, %v8119_v61 }
 0x247   :  { %4283 = vmatprep.mubr.bf16.mxu1 %v7894_v8  ;;  %v3617_v39 = vpop.f32.mrf.mxu1  ;;  %4963 = vmatpush1.bf16.msra.mxu0 %v6540_v27  ;;  %v3506_v37 = vpop.f32.mrf.mxu0  ;;  %v6546_v27 = vld [vmem:[#allocation10 + $0x10] ss:$8 sps:$4 sm:$0xff]  }
 0x248   :  { %4964 = vmatprep.subr.bf16.mxu0 %v6545_v34  ;;  %v8202_v12 = vadd.f32 %v3617_v39, %v3505_v30  ;;  %v3507_v29 = vadd.f32 %v3506_v37, %v8125_v40  ;;  %v6551_v34 = vld [vmem:[#allocation10 + $0x4] ss:$8 sps:$4 sm:$0xff]   ;;  %5069 = vmatprep.subr.bf16.mxu1 %v6581_v1  ;;  %v6549_v30 = vld [vmem:[#allocation10] ss:$8 sps:$4 sm:$0xff]   ;;  %v6584_v39 = vld [vmem:[#allocation10 + $0x154] ss:$8 sps:$4 sm:$0xff]  }
 0x249   :  { %v3619_v52 = vpop.f32.mrf.mxu1  ;;  %v3508_v55 = vpop.f32.mrf.mxu0  ;;  %5070 = vmatpush1.bf16.msra.mxu1 %v6579_v45 }
 0x24a   :  { %v8205_v54 = vadd.f32 %v3619_v52, %v3507_v29  ;;  %v3509_v8 = vadd.f32 %v3508_v55, %v8119_v61  ;;  %5071 = vmatprep.subr.bf16.mxu1 %v6584_v39 }
 0x24b   :  { %v3621_v15 = vpop.f32.mrf.mxu1  ;;  %4965 = vmatpush1.bf16.msra.mxu0 %v6543_v38  ;;  %v8208_v19 = vpop.f32.mrf.mxu0 }
 0x24c   :  { %4966 = vmatprep.subr.bf16.mxu0 %v6548_v50  ;;  %v8211_v42 = vadd.f32 %v3621_v15, %v3509_v8  ;;  %v6557_v15 = vld [vmem:[#allocation10 + $0xe4] ss:$8 sps:$4 sm:$0xff]  }
 0x24d   :  { %4171 = vmatmul.mubr.bf16.gmra.mxu0 %v7903_v17  ;;  %v8213_v24 = vpop.f32.mrf.mxu1  ;;  %v6582_v17 = vld [vmem:[#allocation10 + $0x150] ss:$8 sps:$4 sm:$0xff]  }
 0x24e   :  { %4284 = vmatmul.mubr.bf16.gmra.mxu1 %v7913_v33  ;;  %4180 = vmatprep.mubr.bf16.mxu0 %v7971_v46  ;;  %v6552_v46 = vld [vmem:[#allocation10 + $0xf0] ss:$8 sps:$4 sm:$0xff]  }
 0x24f   :  { %4293 = vmatprep.mubr.bf16.mxu1 %v7981_v16  ;;  %4967 = vmatpush1.bf16.msra.mxu0 %v6546_v27  ;;  %v6587_v16 = vld [vmem:[#allocation10 + $0x144] ss:$8 sps:$4 sm:$0xff]   ;;  %v6585_v27 = vld [vmem:[#allocation10 + $0x140] ss:$8 sps:$4 sm:$0xff]  }
 0x250   :  { %v3514_v38 = vpop.f32.mrf.mxu0  ;;  %v3627_v21 = vpop.f32.mrf.mxu1  ;;  %4968 = vmatprep.subr.bf16.mxu0 %v6551_v34  ;;  %5072 = vmatpush1.bf16.msra.mxu1 %v6582_v17 }
 0x251   :  { %v3515_v37 = vadd.f32 %v3514_v38, %v8119_v61  ;;  %5073 = vmatprep.subr.bf16.mxu1 %v6587_v16  ;;  %v6555_v38 = vld [vmem:[#allocation10 + $0xe0] ss:$8 sps:$4 sm:$0xff]   ;;  %v6563_v16 = vld [vmem:[#allocation10 + $0xc4] ss:$8 sps:$4 sm:$0xff]  }
 0x252   :  { %v3516_v50 = vpop.f32.mrf.mxu0  ;;  %v3629_v29 = vpop.f32.mrf.mxu1 }
 0x253   :  { %v8219_v52 = vadd.f32 %v3627_v21, %v3515_v37  ;;  %v3517_v33 = vadd.f32 %v3516_v50, %v8125_v40  ;;  %4969 = vmatpush1.bf16.msra.mxu0 %v6549_v30  ;;  %v6560_v21 = vld [vmem:[#allocation10 + $0xd4] ss:$8 sps:$4 sm:$0xff]  }
 0x254   :  { %v3518_v55 = vpop.f32.mrf.mxu0  ;;  %v3631_v8 = vpop.f32.mrf.mxu1  ;;  %4970 = vmatprep.subr.bf16.mxu0 %v6554_v56  ;;  %5074 = vmatpush1.bf16.msra.mxu1 %v6585_v27  ;;  %v6588_v56 = vld [vmem:[#allocation10 + $0x130] ss:$8 sps:$4 sm:$0xff]  }
 0x255   :  { %4181 = vmatmul.mubr.bf16.gmra.mxu0 %v7933_v23  ;;  %v8223_v1 = vadd.f32 %v3629_v29, %v3517_v33  ;;  %v3519_v34 = vadd.f32 %v3518_v55, %v8119_v61  ;;  %v6590_v23 = vld [vmem:[#allocation10 + $0x134] ss:$8 sps:$4 sm:$0xff]   ;;  %v6558_v29 = vld [vmem:[#allocation10 + $0xd0] ss:$8 sps:$4 sm:$0xff]   ;;  %v6593_v33 = vld [vmem:[#allocation10 + $0x124] ss:$8 sps:$4 sm:$0xff]  }
 0x256   :  { %4294 = vmatmul.mubr.bf16.gmra.mxu1 %v7938_v32  ;;  %4190 = vmatprep.mubr.bf16.mxu0 %v8023_v10  ;;  %v8228_v45 = vpop.f32.mrf.mxu0  ;;  %v8230_v30 = vpop.f32.mrf.mxu1  ;;  %v6591_v55 = vld [vmem:[#allocation10 + $0x120] ss:$8 sps:$4 sm:$0xff]  }
 0x257   :  { %4303 = vmatprep.mubr.bf16.mxu1 %v8030_v13  ;;  %v8233_v39 = vadd.f32 %v3631_v8, %v3519_v34  ;;  %4971 = vmatpush2.bf16.msra.mxu0 %v6552_v46 }
 0x258   :  { %4972 = vmatprep.subr.bf16.mxu0 %v6557_v15  ;;  %5075 = vmatprep.subr.bf16.mxu1 %v6590_v23  ;;  %v6561_v23 = vld [vmem:[#allocation10 + $0xc0] ss:$8 sps:$4 sm:$0xff]  }
 0x259   :  { %v3524_v17 = vpop.f32.mrf.mxu0  ;;  %5076 = vmatpush1.bf16.msra.mxu1 %v6588_v56 }
 0x25a   :  { %v3637_v37 = vpop.f32.mrf.mxu1  ;;  %v3525_v32 = vadd.f32 %v3524_v17, %v8119_v61  ;;  %5077 = vmatprep.subr.bf16.mxu1 %v6593_v33  ;;  %v6566_v17 = vld [vmem:[#allocation10 + $0xb4] ss:$8 sps:$4 sm:$0xff]  }
 0x25b   :  { %v3526_v10 = vpop.f32.mrf.mxu0  ;;  %4973 = vmatpush2.bf16.msra.mxu0 %v6555_v38 }
 0x25c   :  { %v3639_v50 = vpop.f32.mrf.mxu1  ;;  %v8236_v13 = vadd.f32 %v3637_v37, %v3525_v32  ;;  %v3527_v46 = vadd.f32 %v3526_v10, %v8125_v40  ;;  %4974 = vmatprep.subr.bf16.mxu0 %v6560_v21  ;;  %v6596_v21 = vld [vmem:[#allocation10 + $0x114] ss:$8 sps:$4 sm:$0xff]   ;;  %v6564_v37 = vld [vmem:[#allocation10 + $0xb0] ss:$8 sps:$4 sm:$0xff]   ;;  %v6599_v32 = vld [vmem:[#allocation10 + $0x104] ss:$8 sps:$4 sm:$0xff]  }
 0x25d   :  { %4191 = vmatmul.mubr.bf16.gmra.mxu0 %v7998_v57  ;;  %v3528_v8 = vpop.f32.mrf.mxu0  ;;  %5078 = vmatpush1.bf16.msra.mxu1 %v6591_v55 }
 0x25e   :  { %v3641_v15 = vpop.f32.mrf.mxu1  ;;  %4304 = vmatmul.mubr.bf16.gmra.mxu1 %v8000_v22  ;;  %4200 = vmatprep.mubr.bf16.mxu0 %v8062_v31  ;;  %v8242_v27 = vadd.f32 %v3639_v50, %v3527_v46  ;;  %v3529_v34 = vadd.f32 %v3528_v8, %v8119_v61  ;;  %v6594_v22 = vld [vmem:[#allocation10 + $0x110] ss:$8 sps:$4 sm:$0xff]   ;;  %v6569_v50 = vld [vmem:[#allocation10 + $0xa4] ss:$8 sps:$4 sm:$0xff]  }
 0x25f   :  { %4313 = vmatprep.mubr.bf16.mxu1 %v8068_v2  ;;  %v8246_v38 = vpop.f32.mrf.mxu0  ;;  %4975 = vmatpush2.bf16.msra.mxu0 %v6558_v29  ;;  %v6597_v29 = vld [vmem:[#allocation10 + $0x100] ss:$8 sps:$4 sm:$0xff]  }
 0x260   :  { %v8248_v56 = vadd.f32 %v3641_v15, %v3529_v34  ;;  %v8250_v57 = vpop.f32.mrf.mxu1  ;;  %4976 = vmatprep.subr.bf16.mxu0 %v6563_v16  ;;  %5079 = vmatprep.subr.bf16.mxu1 %v6596_v21  ;;  %v6567_v15 = vld [vmem:[#allocation10 + $0xa0] ss:$8 sps:$4 sm:$0xff]   ;;  %v6602_v34 = vld [vmem:[#allocation10 + $0x1f4] ss:$8 sps:$4 sm:$0xff]  }
 0x261   :  { %5080 = vmatpush1.bf16.msra.mxu1 %v6594_v22 }
 0x262   :  { %5081 = vmatprep.subr.bf16.mxu1 %v6599_v32  ;;  %v6570_v32 = vld [vmem:[#allocation10 + $0x90] ss:$8 sps:$4 sm:$0xff]  }
 0x263   :  { %4977 = vmatpush2.bf16.msra.mxu0 %v6561_v23 }
 0x264   :  { %v3534_v31 = vpop.f32.mrf.mxu0  ;;  %4978 = vmatprep.subr.bf16.mxu0 %v6566_v17 }
 0x265   :  { %v3535_v2 = vadd.f32 %v3534_v31, %v8119_v61  ;;  %v3647_v10 = vpop.f32.mrf.mxu1  ;;  %4201 = vmatmul.mubr.bf16.gmra.mxu0 %v8041_v3  ;;  %5082 = vmatpush1.bf16.msra.mxu1 %v6597_v29  ;;  %v6575_v29 = vld [vmem:[#allocation10 + $0x84] ss:$8 sps:$4 sm:$0xff]  }
 0x266   :  { %v3536_v33 = vpop.f32.mrf.mxu0  ;;  %4314 = vmatmul.mubr.bf16.gmra.mxu1 %v8064_v53  ;;  %4210 = vmatprep.mubr.bf16.mxu0 %v8076_v35  ;;  %v6572_v53 = vld [vmem:[#allocation10 + $0x94] ss:$8 sps:$4 sm:$0xff]   ;;  %v6600_v35 = vld [vmem:[#allocation10 + $0x1f0] ss:$8 sps:$4 sm:$0xff]  }
 0x267   :  { %v8256_v46 = vadd.f32 %v3647_v10, %v3535_v2  ;;  %v3537_v16 = vadd.f32 %v3536_v33, %v8125_v40  ;;  %v3649_v55 = vpop.f32.mrf.mxu1  ;;  %4323 = vmatprep.mubr.bf16.mxu1 %v8078_v44  ;;  %4979 = vmatpush2.bf16.msra.mxu0 %v6564_v37  ;;  %v3469_v37 = vadd.f32 %v8132_v49, %v8119_v61  ;;  %v6605_v2 = vld [vmem:[#allocation10 + $0x1e4] ss:$8 sps:$4 sm:$0xff]   ;;  %v6603_v33 = vld [vmem:[#allocation10 + $0x1e0] ss:$8 sps:$4 sm:$0xff]  }
 0x268   :  { %v3538_v8 = vpop.f32.mrf.mxu0  ;;  %4980 = vmatprep.subr.bf16.mxu0 %v6569_v50  ;;  %5083 = vmatprep.subr.bf16.mxu1 %v6602_v34 }
 0x269   :  { %v8260_v23 = vadd.f32 %v3649_v55, %v3537_v16  ;;  %v3539_v3 = vadd.f32 %v3538_v8, %v8119_v61  ;;  %v3651_v21 = vpop.f32.mrf.mxu1  ;;  %5084 = vmatpush2.bf16.msra.mxu1 %v6600_v35  ;;  %v3471_v16 = vadd.f32 %v8137_v48, %v8125_v40 }
 0x26a   :  { %v3540_v17 = vpop.f32.mrf.mxu0  ;;  %5085 = vmatprep.subr.bf16.mxu1 %v6605_v2 }
 0x26b   :  { %v8263_v22 = vadd.f32 %v3651_v21, %v3539_v3  ;;  %v8266_v31 = vadd.f32 %v3540_v17, %v8125_v40  ;;  %v8268_v44 = vpop.f32.mrf.mxu1  ;;  %4981 = vmatpush2.bf16.msra.mxu0 %v6567_v15  ;;  %v3582_v15 = vadd.f32 %v8141_v26, %v3469_v37  ;;  %v6573_v3 = vld [vmem:[#allocation10 + $0x80] ss:$8 sps:$4 sm:$0xff]   ;;  %v6608_v21 = vld [vmem:[#allocation10 + $0x1d4] ss:$8 sps:$4 sm:$0xff]   ;;  %v3479_v26 = vadd.f32 %v8151_v47, %v8119_v61 }
 0x26c   :  { %v3690_v10 = vpop.f32.mrf.mxu0  ;;  %4982 = vmatprep.subr.bf16.mxu0 %v6572_v53 }
 0x26d   :  { %v3803_v50 = vpop.f32.mrf.mxu1  ;;  %4211 = vmatmul.mubr.bf16.gmra.mxu0 %v8087_v63  ;;  %v3691_v55 = vadd.f32 %v3690_v10, %v8130_v43  ;;  %5086 = vmatpush2.bf16.msra.mxu1 %v6603_v33  ;;  %v6606_v63 = vld [vmem:[#allocation10 + $0x1d0] ss:$8 sps:$4 sm:$0xff]   ;;  %v3481_v33 = vadd.f32 %v8160_v6, %v8125_v40  ;;  %v3592_v61 = vadd.f32 %v8158_v9, %v3479_v26 }
 0x26e   :  { %4324 = vmatmul.mubr.bf16.gmra.mxu1 %v8089_v4  ;;  %v3692_v49 = vpop.f32.mrf.mxu0  ;;  %5087 = vmatprep.subr.bf16.mxu1 %v6608_v21  ;;  %v3584_v4 = vadd.f32 %v8144_v59, %v3471_v16 }
 0x26f   :  { %v3805_v8 = vpop.f32.mrf.mxu1  ;;  %v3693_v34 = vadd.f32 %v3692_v49, %v8135_v14  ;;  %4983 = vmatpush2.bf16.msra.mxu0 %v6570_v32  ;;  %v3804_v48 = vadd.f32 %v3803_v50, %v3691_v55  ;;  %v6609_v49 = vld [vmem:[#allocation10 + $0x1c0] ss:$8 sps:$4 sm:$0xff]  }
 0x270   :  { %v3694_v53 = vpop.f32.mrf.mxu0  ;;  %4984 = vmatprep.subr.bf16.mxu0 %v6575_v29  ;;  %v6611_v29 = vld [vmem:[#allocation10 + $0x1c4] ss:$8 sps:$4 sm:$0xff]  }
 0x271   :  { %v3807_v35 = vpop.f32.mrf.mxu1  ;;  %v3695_v17 = vadd.f32 %v3694_v53, %v3582_v15  ;;  %v3806_v37 = vadd.f32 %v3805_v8, %v3693_v34  ;;  %5088 = vmatpush2.bf16.msra.mxu1 %v6606_v63  ;;  %v4398_v21 = vmul.f32 0.2, %v3804_v48  ;;  %vm4334_vm3 = vcmp.gt.f32.partialorder %v3804_v48, 0.0 }
 0x272   :  { %v3696_v43 = vpop.f32.mrf.mxu0  ;;  %5089 = vmatprep.subr.bf16.mxu1 %v6611_v29  ;;  %v6617_v29 = vld [vmem:[#allocation10 + $0x1a4] ss:$8 sps:$4 sm:$0xff]  }
 0x273   :  { %v3809_v2 = vpop.f32.mrf.mxu1  ;;  %v3808_v14 = vadd.f32 %v3807_v35, %v3695_v17  ;;  %4985 = vmatpush2.bf16.msra.mxu0 %v6573_v3  ;;  %v3697_v32 = vadd.f32 %v3696_v43, %v3584_v4  ;;  %v4399_v47 = vmul.f32 0.2, %v3806_v37  ;;  %v6614_v3 = vld [vmem:[#allocation10 + $0x1b4] ss:$8 sps:$4 sm:$0xff]   ;;  %vm4335_vm1 = vcmp.gt.f32.partialorder %v3806_v37, 0.0 }
 0x274   :  { %v3700_v10 = vpop.f32.mrf.mxu0  ;;  %v6612_v35 = vld [vmem:[#allocation10 + $0x1b0] ss:$8 sps:$4 sm:$0xff]  }
 0x275   :  { %v3813_v15 = vpop.f32.mrf.mxu1  ;;  %v4402_v59 = vmul.f32 0.2, %v3808_v14  ;;  %v3810_v50 = vadd.f32 %v3809_v2, %v3697_v32  ;;  %v3701_v16 = vadd.f32 %v3700_v10, %v8149_v28  ;;  %vm4338_vm0 = vcmp.gt.f32.partialorder %v3808_v14, 0.0  ;;  %5090 = vmatpush2.bf16.msra.mxu1 %v6609_v49 }
 0x276   :  { %v3702_v55 = vpop.f32.mrf.mxu0  ;;  %5091 = vmatprep.subr.bf16.mxu1 %v6614_v3  ;;  %v3594_v28 = vadd.f32 %v8162_v51, %v3481_v33  ;;  %v4463_v10 = vsel %vm4335_vm1, %v3806_v37, %v4399_v47  ;;  %v6620_v37 = vld [vmem:[#allocation10 + $0x194] ss:$8 sps:$4 sm:$0xff]   ;;  %v6618_v47 = vld [vmem:[#allocation10 + $0x190] ss:$8 sps:$4 sm:$0xff]  }
 0x277   :  { %v3703_v8 = vadd.f32 %v3702_v55, %v8156_v0  ;;  %v3815_v34 = vpop.f32.mrf.mxu1  ;;  %vm4339_vm2 = vcmp.gt.f32.partialorder %v3810_v50, 0.0  ;;  %v4403_v53 = vmul.f32 0.2, %v3810_v50  ;;  %v4466_v4 = vsel %vm4338_vm0, %v3808_v14, %v4402_v59 }
 0x278   :  { %v3704_v6 = vpop.f32.mrf.mxu0  ;;  %v3814_v9 = vadd.f32 %v3813_v15, %v3701_v16  ;;  %v4462_v55 = vsel %vm4334_vm3, %v3804_v48, %v4398_v21  ;;  %v3491_v48 = vadd.f32 %v8175_v20, %v8125_v40 }
 0x279   :  { %v3705_v63 = vadd.f32 %v3704_v6, %v3592_v61  ;;  %v3817_v17 = vpop.f32.mrf.mxu1  ;;  %v4467_v2 = vsel %vm4339_vm2, %v3810_v50, %v4403_v53  ;;  %v3816_v26 = vadd.f32 %v3815_v34, %v3703_v8  ;;  %5092 = vmatpush2.bf16.msra.mxu1 %v6612_v35  ;;  %v4526_v61 = vpack.c.bf16 %v4466_v4, %v4462_v55 }
 0x27a   :  { %v3706_v43 = vpop.f32.mrf.mxu0  ;;  %v4527_v49 = vpack.c.bf16 %v4467_v2, %v4463_v10  ;;  %5093 = vmatprep.subr.bf16.mxu1 %v6617_v29  ;;  %v4406_v3 = vmul.f32 0.2, %v3814_v9  ;;  %vm4342_vm7 = vcmp.gt.f32.partialorder %v3814_v9, 0.0  ;;  %v6621_v2 = vld [vmem:[#allocation10 + $0x180] ss:$8 sps:$4 sm:$0xff]  }
 0x27b   :  { %v3818_v0 = vadd.f32 %v3817_v17, %v3705_v63  ;;  %v3819_v32 = vpop.f32.mrf.mxu1  ;;  %v3707_v18 = vadd.f32 %v3706_v43, %v3594_v28  ;;  %v4407_v15 = vmul.f32 0.2, %v3816_v26  ;;  %vm4343_vm5 = vcmp.gt.f32.partialorder %v3816_v26, 0.0  ;;  %v6623_v17 = vld [vmem:[#allocation10 + $0x184] ss:$8 sps:$4 sm:$0xff]  }
 0x27c   :  { %4986 = vmatprep.mubr.bf16.mxu0 %v4527_v49  ;;  %v3604_v28 = vadd.f32 %v8177_v60, %v3491_v48  ;;  %v4470_v4 = vsel %vm4342_vm7, %v3814_v9, %v4406_v3 }
 0x27d   :  { %v4410_v6 = vmul.f32 0.2, %v3818_v0  ;;  %v3820_v51 = vadd.f32 %v3819_v32, %v3707_v18  ;;  %vm4346_vm4 = vcmp.gt.f32.partialorder %v3818_v0, 0.0  ;;  %4987 = vmatmul.mubr.bf16.vlgmr.msra.gmra.mxu0 %v4526_v61  ;;  %5094 = vmatpush2.bf16.msra.mxu1 %v6615_v5  ;;  %v4471_v20 = vsel %vm4343_vm5, %v3816_v26, %v4407_v15 }
 0x27e   :  { %v3710_v14 = vpop.f32.mrf.mxu0  ;;  %5095 = vmatprep.subr.bf16.mxu1 %v6620_v37 }
 0x27f   :  { %v3823_v33 = vpop.f32.mrf.mxu1  ;;  %v3711_v59 = vadd.f32 %v3710_v14, %v8169_v41  ;;  %vm4347_vm6 = vcmp.gt.f32.partialorder %v3820_v51, 0.0  ;;  %v4411_v21 = vmul.f32 0.2, %v3820_v51  ;;  %v4474_v34 = vsel %vm4346_vm4, %v3818_v0, %v4410_v6 }
 0x280   :  { %v3712_v50 = vpop.f32.mrf.mxu0  ;;  %v4530_v32 = vpack.c.bf16 %v4474_v34, %v4470_v4 }
 0x281   :  { %v3825_v16 = vpop.f32.mrf.mxu1  ;;  %v3824_v18 = vadd.f32 %v3823_v33, %v3711_v59  ;;  %v3713_v8 = vadd.f32 %v3712_v50, %v8172_v25  ;;  %v4475_v35 = vsel %vm4347_vm6, %v3820_v51, %v4411_v21  ;;  %5096 = vmatpush2.bf16.msra.mxu1 %v6618_v47 }
 0x282   :  { %v3714_v41 = vpop.f32.mrf.mxu0  ;;  %v4531_v43 = vpack.c.bf16 %v4475_v35, %v4471_v20  ;;  %5097 = vmatprep.subr.bf16.mxu1 %v6623_v17 }
 0x283   :  { %v3827_v53 = vpop.f32.mrf.mxu1  ;;  %v3715_v63 = vadd.f32 %v3714_v41, %v8179_v62  ;;  %v4414_v25 = vmul.f32 0.2, %v3824_v18  ;;  %v3826_v10 = vadd.f32 %v3825_v16, %v3713_v8  ;;  %vm4350_vm8 = vcmp.gt.f32.partialorder %v3824_v18, 0.0 }
 0x284   :  { %v3716_v5 = vpop.f32.mrf.mxu0  ;;  %4996 = vmatprep.mubr.bf16.mxu0 %v4531_v43 }
 0x285   :  { %v3828_v29 = vadd.f32 %v3827_v53, %v3715_v63  ;;  %v3829_v0 = vpop.f32.mrf.mxu1  ;;  %v3717_v55 = vadd.f32 %v3716_v5, %v3604_v28  ;;  %4997 = vmatmul.mubr.bf16.gmra.mxu0 %v4530_v32  ;;  %5098 = vmatpush2.bf16.msra.mxu1 %v6621_v2  ;;  %v4478_v60 = vsel %vm4350_vm8, %v3824_v18, %v4414_v25  ;;  %v4415_v9 = vmul.f32 0.2, %v3826_v10 }
 0x286   :  { %vm4351_vm10 = vcmp.gt.f32.partialorder %v3826_v10, 0.0 }
 0x287   :  { %vm4354_vm9 = vcmp.gt.f32.partialorder %v3828_v29, 0.0  ;;  %v4418_v62 = vmul.f32 0.2, %v3828_v29  ;;  %v3830_v26 = vadd.f32 %v3829_v0, %v3717_v55  ;;  %v4479_v47 = vsel %vm4351_vm10, %v3826_v10, %v4415_v9 }
 0x288   :  { %v3720_v49 = vpop.f32.mrf.mxu0 }
 0x289   :  { %v4482_v61 = vsel %vm4354_vm9, %v3828_v29, %v4418_v62  ;;  %v3721_v3 = vadd.f32 %v3720_v49, %v8186_v11  ;;  %v3833_v6 = vpop.f32.mrf.mxu1  ;;  %vm4355_vm11 = vcmp.gt.f32.partialorder %v3830_v26, 0.0  ;;  %v4419_v14 = vmul.f32 0.2, %v3830_v26 }
 0x28a   :  { %v4534_v51 = vpack.c.bf16 %v4482_v61, %v4478_v60  ;;  %v3722_v33 = vpop.f32.mrf.mxu0 }
 0x28b   :  { %v3834_v15 = vadd.f32 %v3833_v6, %v3721_v3  ;;  %v3723_v59 = vadd.f32 %v3722_v33, %v8189_v7  ;;  %v3835_v37 = vpop.f32.mrf.mxu1  ;;  %v4483_v21 = vsel %vm4355_vm11, %v3830_v26, %v4419_v14  ;;  %v3511_v7 = vadd.f32 %v8208_v19, %v8125_v40 }
 0x28c   :  { %v3724_v48 = vpop.f32.mrf.mxu0  ;;  %v4535_v8 = vpack.c.bf16 %v4483_v21, %v4479_v47 }
 0x28d   :  { %v3725_v50 = vadd.f32 %v3724_v48, %v8192_v58  ;;  %v3837_v16 = vpop.f32.mrf.mxu1  ;;  %v4422_v34 = vmul.f32 0.2, %v3834_v15  ;;  %v3836_v11 = vadd.f32 %v3835_v37, %v3723_v59  ;;  %vm4358_vm12 = vcmp.gt.f32.partialorder %v3834_v15, 0.0 }
 0x28e   :  { %v3726_v18 = vpop.f32.mrf.mxu0  ;;  %5006 = vmatprep.mubr.bf16.mxu0 %v4535_v8  ;;  %v3624_v49 = vadd.f32 %v8213_v24, %v3511_v7 }
 0x28f   :  { %v3838_v41 = vadd.f32 %v3837_v16, %v3725_v50  ;;  %v3839_v53 = vpop.f32.mrf.mxu1  ;;  %v3727_v35 = vadd.f32 %v3726_v18, %v8198_v36  ;;  %5007 = vmatmul.mubr.bf16.gmra.mxu0 %v4534_v51  ;;  %v4486_v17 = vsel %vm4358_vm12, %v3834_v15, %v4422_v34  ;;  %v4423_v28 = vmul.f32 0.2, %v3836_v11 }
 0x290   :  { %vm4359_vm14 = vcmp.gt.f32.partialorder %v3836_v11, 0.0 }
 0x291   :  { %vm4362_vm13 = vcmp.gt.f32.partialorder %v3838_v41, 0.0  ;;  %v4426_v63 = vmul.f32 0.2, %v3838_v41  ;;  %v3840_v20 = vadd.f32 %v3839_v53, %v3727_v35  ;;  %v3730_v58 = vpop.f32.mrf.mxu0  ;;  %v4487_v26 = vsel %vm4359_vm14, %v3836_v11, %v4423_v28 }
 0x292   :  { %v3731_v5 = vadd.f32 %v3730_v58, %v8202_v12 }
 0x293   :  { %v4490_v4 = vsel %vm4362_vm13, %v3838_v41, %v4426_v63  ;;  %v3843_v43 = vpop.f32.mrf.mxu1  ;;  %vm4363_vm15 = vcmp.gt.f32.partialorder %v3840_v20, 0.0  ;;  %v4427_v32 = vmul.f32 0.2, %v3840_v20  ;;  %v3732_v36 = vpop.f32.mrf.mxu0 }
 0x294   :  { %v4538_v2 = vpack.c.bf16 %v4490_v4, %v4486_v17  ;;  %v3844_v25 = vadd.f32 %v3843_v43, %v3731_v5  ;;  %v3733_v10 = vadd.f32 %v3732_v36, %v8205_v54 }
 0x295   :  { %v3845_v29 = vpop.f32.mrf.mxu1  ;;  %v3734_v0 = vpop.f32.mrf.mxu0  ;;  %v4491_v55 = vsel %vm4363_vm15, %v3840_v20, %v4427_v32 }
 0x296   :  { %v3735_v19 = vadd.f32 %v3734_v0, %v8211_v42  ;;  %v3846_v60 = vadd.f32 %v3845_v29, %v3733_v10  ;;  %v4539_v9 = vpack.c.bf16 %v4491_v55, %v4487_v26  ;;  %v4430_v61 = vmul.f32 0.2, %v3844_v25 }
 0x297   :  { %v3847_v62 = vpop.f32.mrf.mxu1  ;;  %v3736_v12 = vpop.f32.mrf.mxu0  ;;  %vm4366_vm0 = vcmp.gt.f32.partialorder %v3844_v25, 0.0  ;;  %v3521_v42 = vadd.f32 %v8228_v45, %v8125_v40 }
 0x298   :  { %v3848_v3 = vadd.f32 %v3847_v62, %v3735_v19  ;;  %v3737_v51 = vadd.f32 %v3736_v12, %v3624_v49  ;;  %5016 = vmatprep.mubr.bf16.mxu0 %v4539_v9  ;;  %v4431_v33 = vmul.f32 0.2, %v3846_v60  ;;  %v4494_v37 = vsel %vm4366_vm0, %v3844_v25, %v4430_v61 }
 0x299   :  { %v3849_v6 = vpop.f32.mrf.mxu1  ;;  %5017 = vmatmul.mubr.bf16.gmra.mxu0 %v4538_v2  ;;  %vm4367_vm2 = vcmp.gt.f32.partialorder %v3846_v60, 0.0  ;;  %v3634_v11 = vadd.f32 %v8230_v30, %v3521_v42  ;;  %v3531_v30 = vadd.f32 %v8246_v38, %v8125_v40 }
 0x29a   :  { %vm4370_vm1 = vcmp.gt.f32.partialorder %v3848_v3, 0.0  ;;  %v4434_v54 = vmul.f32 0.2, %v3848_v3  ;;  %v3850_v15 = vadd.f32 %v3849_v6, %v3737_v51  ;;  %v4495_v53 = vsel %vm4367_vm2, %v3846_v60, %v4431_v33 }
 0x29b   :  { %v3740_v14 = vpop.f32.mrf.mxu0  ;;  %v3644_v60 = vadd.f32 %v8250_v57, %v3531_v30 }
 0x29c   :  { %v3741_v24 = vadd.f32 %v3740_v14, %v8219_v52  ;;  %v3853_v59 = vpop.f32.mrf.mxu1  ;;  %v4498_v48 = vsel %vm4370_vm1, %v3848_v3, %v4434_v54  ;;  %vm4371_vm3 = vcmp.gt.f32.partialorder %v3850_v15, 0.0  ;;  %v4435_v16 = vmul.f32 0.2, %v3850_v15 }
 0x29d   :  { %v3742_v21 = vpop.f32.mrf.mxu0  ;;  %v4542_v50 = vpack.c.bf16 %v4498_v48, %v4494_v37 }
 0x29e   :  { %v3854_v47 = vadd.f32 %v3853_v59, %v3741_v24  ;;  %v3855_v18 = vpop.f32.mrf.mxu1  ;;  %v3743_v8 = vadd.f32 %v3742_v21, %v8223_v1  ;;  %v4499_v52 = vsel %vm4371_vm3, %v3850_v15, %v4435_v16 }
 0x29f   :  { %v3744_v34 = vpop.f32.mrf.mxu0  ;;  %v4543_v20 = vpack.c.bf16 %v4499_v52, %v4495_v53 }
 0x2a0   :  { %v3745_v45 = vadd.f32 %v3744_v34, %v8233_v39  ;;  %v3857_v41 = vpop.f32.mrf.mxu1  ;;  %v4438_v35 = vmul.f32 0.2, %v3854_v47  ;;  %v3856_v63 = vadd.f32 %v3855_v18, %v3743_v8  ;;  %vm4374_vm4 = vcmp.gt.f32.partialorder %v3854_v47, 0.0  ;;  %v8725_v8 = vld [vmem:[#allocation19_spill] sm:$0xff] }
 0x2a1   :  { %v3746_v7 = vpop.f32.mrf.mxu0  ;;  %5026 = vmatprep.mubr.bf16.mxu0 %v4543_v20  ;;  %v8726_v34 = vsub.s32 2, %v8725_v8 }
 0x2a2   :  { %v3858_v58 = vadd.f32 %v3857_v41, %v3745_v45  ;;  %v3747_v17 = vadd.f32 %v3746_v7, %v3634_v11  ;;  %v3859_v28 = vpop.f32.mrf.mxu1  ;;  %5027 = vmatmul.mubr.bf16.gmra.mxu0 %v4542_v50  ;;  %v4502_v39 = vsel %vm4374_vm4, %v3854_v47, %v4438_v35  ;;  %v4439_v43 = vmul.f32 0.2, %v3856_v63 }
 0x2a3   :  { %vm4375_vm6 = vcmp.gt.f32.partialorder %v3856_v63, 0.0  ;;  %v8727_v7 = vsub.s32 3, %v8725_v8 }
 0x2a4   :  { %vm4378_vm5 = vcmp.gt.f32.partialorder %v3858_v58, 0.0  ;;  %v4442_v4 = vmul.f32 0.2, %v3858_v58  ;;  %v3860_v1 = vadd.f32 %v3859_v28, %v3747_v17  ;;  %v3750_v5 = vpop.f32.mrf.mxu0  ;;  %v4503_v38 = vsel %vm4375_vm6, %v3856_v63, %v4439_v43 }
 0x2a5   :  { %v3751_v2 = vadd.f32 %v3750_v5, %v8236_v13  ;;  %v3863_v32 = vpop.f32.mrf.mxu1 }
 0x2a6   :  { %v4506_v36 = vsel %vm4378_vm5, %v3858_v58, %v4442_v4  ;;  %vm4379_vm7 = vcmp.gt.f32.partialorder %v3860_v1, 0.0  ;;  %v4443_v25 = vmul.f32 0.2, %v3860_v1  ;;  %v3752_v10 = vpop.f32.mrf.mxu0 }
 0x2a7   :  { %v4546_v29 = vpack.c.bf16 %v4506_v36, %v4502_v39  ;;  %v3864_v0 = vadd.f32 %v3863_v32, %v3751_v2  ;;  %v3753_v55 = vadd.f32 %v3752_v10, %v8242_v27  ;;  %v3865_v19 = vpop.f32.mrf.mxu1 }
 0x2a8   :  { %v3754_v62 = vpop.f32.mrf.mxu0  ;;  %v4507_v26 = vsel %vm4379_vm7, %v3860_v1, %v4443_v25 }
 0x2a9   :  { %v3755_v49 = vadd.f32 %v3754_v62, %v8248_v56  ;;  %v3867_v40 = vpop.f32.mrf.mxu1  ;;  %v4446_v13 = vmul.f32 0.2, %v3864_v0  ;;  %v4547_v9 = vpack.c.bf16 %v4507_v26, %v4503_v38  ;;  %vm4382_vm8 = vcmp.gt.f32.partialorder %v3864_v0, 0.0 }
 0x2aa   :  { %v3756_v12 = vpop.f32.mrf.mxu0  ;;  %v3866_v61 = vadd.f32 %v3865_v19, %v3753_v55 }
 0x2ab   :  { %v3868_v3 = vadd.f32 %v3867_v40, %v3755_v49  ;;  %v3869_v6 = vpop.f32.mrf.mxu1  ;;  %v3757_v51 = vadd.f32 %v3756_v12, %v3644_v60  ;;  %5036 = vmatprep.mubr.bf16.mxu0 %v4547_v9  ;;  %v4510_v56 = vsel %vm4382_vm8, %v3864_v0, %v4446_v13 }
 0x2ac   :  { %v3760_v54 = vpop.f32.mrf.mxu0  ;;  %5037 = vmatmul.mubr.bf16.gmra.mxu0 %v4546_v29  ;;  %v4447_v57 = vmul.f32 0.2, %v3866_v61  ;;  %vm4383_vm10 = vcmp.gt.f32.partialorder %v3866_v61, 0.0 }
 0x2ad   :  { %vm4386_vm9 = vcmp.gt.f32.partialorder %v3868_v3, 0.0  ;;  %v4450_v27 = vmul.f32 0.2, %v3868_v3  ;;  %v3761_v14 = vadd.f32 %v3760_v54, %v8256_v46  ;;  %v3873_v42 = vpop.f32.mrf.mxu1  ;;  %v3870_v33 = vadd.f32 %v3869_v6, %v3757_v51  ;;  %v6644_v46 = vld [vmem:[%s8612_s4] sm:$0xf] }
 0x2ae   :  { %v3762_v15 = vpop.f32.mrf.mxu0  ;;  %v8327_v11 = vrot.slane %v6644_v46, %v8726_v34  ;;  %v8334_v20 = vrot.slane %v6644_v46, %v8727_v7 }
 0x2af   :  { %v4514_v24 = vsel %vm4386_vm9, %v3868_v3, %v4450_v27  ;;  %v3874_v59 = vadd.f32 %v3873_v42, %v3761_v14  ;;  %v3763_v37 = vadd.f32 %v3762_v15, %v8260_v23  ;;  %v3875_v48 = vpop.f32.mrf.mxu1  ;;  %vm4387_vm11 = vcmp.gt.f32.partialorder %v3870_v33, 0.0 }
 0x2b0   :  { %v4550_v21 = vpack.c.bf16 %v4514_v24, %v4510_v56  ;;  %v4451_v50 = vmul.f32 0.2, %v3870_v33  ;;  %v3764_v16 = vpop.f32.mrf.mxu0  ;;  %v3654_v23 = vadd.f32 %v8268_v44, %v8266_v31 }
 0x2b1   :  { %v3765_v47 = vadd.f32 %v3764_v16, %v8263_v22  ;;  %v3877_v18 = vpop.f32.mrf.mxu1  ;;  %v4454_v45 = vmul.f32 0.2, %v3874_v59  ;;  %v3876_v41 = vadd.f32 %v3875_v48, %v3763_v37  ;;  %vm4390_vm12 = vcmp.gt.f32.partialorder %v3874_v59, 0.0 }
 0x2b2   :  { %v3766_v53 = vpop.f32.mrf.mxu0  ;;  %v4515_v52 = vsel %vm4387_vm11, %v3870_v33, %v4451_v50  ;;  %v4511_v22 = vsel %vm4383_vm10, %v3866_v61, %v4447_v57 }
 0x2b3   :  { %v3878_v35 = vadd.f32 %v3877_v18, %v3765_v47  ;;  %v3879_v63 = vpop.f32.mrf.mxu1  ;;  %v3767_v58 = vadd.f32 %v3766_v53, %v3654_v23  ;;  %v4551_v28 = vpack.c.bf16 %v4515_v52, %v4511_v22  ;;  %v4518_v1 = vsel %vm4390_vm12, %v3874_v59, %v4454_v45 }
 0x2b4   :  { %v3916_v17 = vpop.f32.mrf.mxu0  ;;  %v4455_v5 = vmul.f32 0.2, %v3876_v41  ;;  %vm4391_vm14 = vcmp.gt.f32.partialorder %v3876_v41, 0.0 }
 0x2b5   :  { %vm4394_vm13 = vcmp.gt.f32.partialorder %v3878_v35, 0.0  ;;  %v4458_v4 = vmul.f32 0.2, %v3878_v35  ;;  %v3917_v31 = vadd.f32 %v3916_v17, %v8327_v11  ;;  %v4029_v44 = vpop.f32.mrf.mxu1  ;;  %v3880_v30 = vadd.f32 %v3879_v63, %v3767_v58  ;;  %5046 = vmatprep.mubr.bf16.mxu0 %v4551_v28 }
 0x2b6   :  { %v3918_v39 = vpop.f32.mrf.mxu0  ;;  %5047 = vmatmul.mubr.bf16.gmra.mxu0 %v4550_v21  ;;  %v4519_v26 = vsel %vm4391_vm14, %v3876_v41, %v4455_v5 }
 0x2b7   :  { %v4522_v43 = vsel %vm4394_vm13, %v3878_v35, %v4458_v4  ;;  %v8337_v2 = vadd.f32 %v4029_v44, %v3917_v31  ;;  %v3919_v32 = vadd.f32 %v3918_v39, %v8334_v20  ;;  %v4031_v36 = vpop.f32.mrf.mxu1  ;;  %vm4395_vm15 = vcmp.gt.f32.partialorder %v3880_v30, 0.0 }
 0x2b8   :  { %v4554_v25 = vpack.c.bf16 %v4522_v43, %v4518_v1  ;;  %v4459_v10 = vmul.f32 0.2, %v3880_v30  ;;  %v3920_v29 = vpop.f32.mrf.mxu0 }
 0x2b9   :  { %v8340_v0 = vadd.f32 %v4031_v36, %v3919_v32  ;;  %v3921_v55 = vadd.f32 %v3920_v29, %v8327_v11  ;;  %v4033_v19 = vpop.f32.mrf.mxu1 }
 0x2ba   :  { %v8343_v62 = vpop.f32.mrf.mxu0  ;;  %v4523_v49 = vsel %vm4395_vm15, %v3880_v30, %v4459_v10 }
 0x2bb   :  { %v8345_v40 = vadd.f32 %v4033_v19, %v3921_v55  ;;  %v8347_v38 = vpop.f32.mrf.mxu1  ;;  %v4555_v60 = vpack.c.bf16 %v4523_v49, %v4519_v26 }
 0x2bc   :  { %v3926_v13 = vpop.f32.mrf.mxu0 }
 0x2bd   :  { %v3927_v12 = vadd.f32 %v3926_v13, %v8327_v11  ;;  %v4039_v9 = vpop.f32.mrf.mxu1  ;;  %5056 = vmatprep.mubr.bf16.mxu0 %v4555_v60 }
 0x2be   :  { %v3928_v61 = vpop.f32.mrf.mxu0  ;;  %5057 = vmatmul.mubr.bf16.gmra.mxu0 %v4554_v25 }
 0x2bf   :  { %v8350_v3 = vadd.f32 %v4039_v9, %v3927_v12  ;;  %v3929_v6 = vadd.f32 %v3928_v61, %v8334_v20  ;;  %v4041_v51 = vpop.f32.mrf.mxu1 }
 0x2c0   :  { %v3930_v54 = vpop.f32.mrf.mxu0 }
 0x2c1   :  { %v8353_v27 = vadd.f32 %v4041_v51, %v3929_v6  ;;  %v3931_v14 = vadd.f32 %v3930_v54, %v8327_v11  ;;  %v4043_v42 = vpop.f32.mrf.mxu1 }
 0x2c2   :  { %v8356_v56 = vpop.f32.mrf.mxu0 }
 0x2c3   :  { %v8358_v33 = vadd.f32 %v4043_v42, %v3931_v14  ;;  %v8360_v15 = vpop.f32.mrf.mxu1 }
 0x2c4   :  { %v3936_v57 = vpop.f32.mrf.mxu0 }
 0x2c5   :  { %v3937_v24 = vadd.f32 %v3936_v57, %v8327_v11  ;;  %v4049_v59 = vpop.f32.mrf.mxu1 }
 0x2c6   :  { %v3938_v37 = vpop.f32.mrf.mxu0 }
 0x2c7   :  { %v8363_v48 = vadd.f32 %v4049_v59, %v3937_v24  ;;  %v3939_v21 = vadd.f32 %v3938_v37, %v8334_v20  ;;  %v4051_v50 = vpop.f32.mrf.mxu1 }
 0x2c8   :  { %v3940_v16 = vpop.f32.mrf.mxu0 }
 0x2c9   :  { %v8366_v47 = vadd.f32 %v4051_v50, %v3939_v21  ;;  %v3941_v18 = vadd.f32 %v3940_v16, %v8327_v11  ;;  %v4053_v46 = vpop.f32.mrf.mxu1 }
 0x2ca   :  { %v8369_v8 = vpop.f32.mrf.mxu0 }
 0x2cb   :  { %v8371_v34 = vadd.f32 %v4053_v46, %v3941_v18  ;;  %v8373_v23 = vpop.f32.mrf.mxu1 }
 0x2cc   :  { %v3946_v45 = vpop.f32.mrf.mxu0 }
 0x2cd   :  { %v3947_v41 = vadd.f32 %v3946_v45, %v8327_v11  ;;  %v4059_v53 = vpop.f32.mrf.mxu1 }
 0x2ce   :  { %v3948_v52 = vpop.f32.mrf.mxu0 }
 0x2cf   :  { %v8376_v35 = vadd.f32 %v4059_v53, %v3947_v41  ;;  %v3949_v63 = vadd.f32 %v3948_v52, %v8334_v20  ;;  %v4061_v22 = vpop.f32.mrf.mxu1 }
 0x2d0   :  { %v3950_v7 = vpop.f32.mrf.mxu0 }
 0x2d1   :  { %v8379_v58 = vadd.f32 %v4061_v22, %v3949_v63  ;;  %v3951_v17 = vadd.f32 %v3950_v7, %v8327_v11  ;;  %v4063_v28 = vpop.f32.mrf.mxu1 }
 0x2d2   :  { %v8382_v4 = vpop.f32.mrf.mxu0 }
 0x2d3   :  { %v8384_v31 = vadd.f32 %v4063_v28, %v3951_v17  ;;  %v8386_v44 = vpop.f32.mrf.mxu1 }
 0x2d4   :  { %v3956_v1 = vpop.f32.mrf.mxu0 }
 0x2d5   :  { %v3957_v5 = vadd.f32 %v3956_v1, %v8327_v11  ;;  %v4069_v30 = vpop.f32.mrf.mxu1 }
 0x2d6   :  { %v3958_v39 = vpop.f32.mrf.mxu0 }
 0x2d7   :  { %v8389_v43 = vadd.f32 %v4069_v30, %v3957_v5  ;;  %v3959_v32 = vadd.f32 %v3958_v39, %v8334_v20  ;;  %v4071_v36 = vpop.f32.mrf.mxu1 }
 0x2d8   :  { %v3960_v25 = vpop.f32.mrf.mxu0 }
 0x2d9   :  { %v8392_v10 = vadd.f32 %v4071_v36, %v3959_v32  ;;  %v3961_v29 = vadd.f32 %v3960_v25, %v8327_v11  ;;  %v4073_v55 = vpop.f32.mrf.mxu1 }
 0x2da   :  { %v8395_v19 = vpop.f32.mrf.mxu0 }
 0x2db   :  { %v8397_v26 = vadd.f32 %v4073_v55, %v3961_v29  ;;  %v8399_v49 = vpop.f32.mrf.mxu1 }
 0x2dc   :  { %v3966_v60 = vpop.f32.mrf.mxu0 }
 0x2dd   :  { %v3967_v13 = vadd.f32 %v3966_v60, %v8327_v11  ;;  %v4079_v12 = vpop.f32.mrf.mxu1 }
 0x2de   :  { %v3968_v9 = vpop.f32.mrf.mxu0 }
 0x2df   :  { %v8402_v61 = vadd.f32 %v4079_v12, %v3967_v13  ;;  %v3969_v6 = vadd.f32 %v3968_v9, %v8334_v20  ;;  %v4081_v51 = vpop.f32.mrf.mxu1 }
 0x2e0   :  { %v3970_v54 = vpop.f32.mrf.mxu0 }
 0x2e1   :  { %v8405_v14 = vadd.f32 %v4081_v51, %v3969_v6  ;;  %v3971_v42 = vadd.f32 %v3970_v54, %v8327_v11  ;;  %v4083_v57 = vpop.f32.mrf.mxu1 }
 0x2e2   :  { %v8408_v24 = vpop.f32.mrf.mxu0 }
 0x2e3   :  { %v8410_v59 = vadd.f32 %v4083_v57, %v3971_v42  ;;  %v8412_v37 = vpop.f32.mrf.mxu1  ;;  %v3923_v57 = vadd.f32 %v8343_v62, %v8334_v20 }
 0x2e4   :  { %v3976_v21 = vpop.f32.mrf.mxu0 }
 0x2e5   :  { %v3977_v50 = vadd.f32 %v3976_v21, %v8327_v11  ;;  %v4089_v16 = vpop.f32.mrf.mxu1 }
 0x2e6   :  { %v3978_v18 = vpop.f32.mrf.mxu0 }
 0x2e7   :  { %v8415_v46 = vadd.f32 %v4089_v16, %v3977_v50  ;;  %v3979_v45 = vadd.f32 %v3978_v18, %v8334_v20  ;;  %v4091_v41 = vpop.f32.mrf.mxu1 }
 0x2e8   :  { %v3980_v53 = vpop.f32.mrf.mxu0 }
 0x2e9   :  { %v8418_v52 = vadd.f32 %v4091_v41, %v3979_v45  ;;  %v3981_v63 = vadd.f32 %v3980_v53, %v8327_v11  ;;  %v4093_v22 = vpop.f32.mrf.mxu1  ;;  %v4036_v53 = vadd.f32 %v8347_v38, %v3923_v57 }
 0x2ea   :  { %v8421_v7 = vpop.f32.mrf.mxu0 }
 0x2eb   :  { %v8423_v17 = vadd.f32 %v4093_v22, %v3981_v63  ;;  %v8425_v28 = vpop.f32.mrf.mxu1 }
 0x2ec   :  { %v3986_v1 = vpop.f32.mrf.mxu0 }
 0x2ed   :  { %v3987_v5 = vadd.f32 %v3986_v1, %v8327_v11  ;;  %v4099_v30 = vpop.f32.mrf.mxu1 }
 0x2ee   :  { %v3988_v39 = vpop.f32.mrf.mxu0 }
 0x2ef   :  { %v8428_v32 = vadd.f32 %v4099_v30, %v3987_v5  ;;  %v3989_v36 = vadd.f32 %v3988_v39, %v8334_v20  ;;  %v4101_v25 = vpop.f32.mrf.mxu1 }
 0x2f0   :  { %v3990_v29 = vpop.f32.mrf.mxu0 }
 0x2f1   :  { %v8431_v55 = vadd.f32 %v4101_v25, %v3989_v36  ;;  %v3991_v60 = vadd.f32 %v3990_v29, %v8327_v11  ;;  %v4103_v13 = vpop.f32.mrf.mxu1  ;;  %v3933_v25 = vadd.f32 %v8356_v56, %v8334_v20 }
 0x2f2   :  { %v8434_v12 = vpop.f32.mrf.mxu0 }
 0x2f3   :  { %v8436_v9 = vadd.f32 %v4103_v13, %v3991_v60  ;;  %v8438_v6 = vpop.f32.mrf.mxu1 }
 0x2f5   :  { %v4142_v51 = vpop.f32.mrf.mxu0 }
 0x2f6   :  { %v4143_v54 = vadd.f32 %v4142_v51, %v8337_v2  ;;  %v4255_v42 = vpop.f32.mrf.mxu1 }
 0x2f7   :  { %v4144_v21 = vpop.f32.mrf.mxu0 }
 0x2f8   :  { %v4256_v50 = vadd.f32 %v4255_v42, %v4143_v54  ;;  %v4145_v16 = vadd.f32 %v4144_v21, %v8340_v0  ;;  %v4257_v18 = vpop.f32.mrf.mxu1 }
 0x2f9   :  { %v4146_v11 = vpop.f32.mrf.mxu0 }
 0x2fa   :  { %v4147_v45 = vadd.f32 %v4146_v11, %v8345_v40  ;;  %v4259_v41 = vpop.f32.mrf.mxu1  ;;  %v4400_v63 = vmul.f32 0.2, %v4256_v50  ;;  %vm4336_vm0 = vcmp.gt.f32.partialorder %v4256_v50, 0.0  ;;  %v4258_v1 = vadd.f32 %v4257_v18, %v4145_v16 }
 0x2fb   :  { %v4148_v22 = vpop.f32.mrf.mxu0  ;;  %v4046_v11 = vadd.f32 %v8360_v15, %v3933_v25  ;;  %v3943_v15 = vadd.f32 %v8369_v8, %v8334_v20  ;;  %v6627_v8 = vld [vmem:[#allocation11 + $0x30] sm:$0xff]  }
 0x2fc   :  { %v4260_v2 = vadd.f32 %v4259_v41, %v4147_v45  ;;  %v4261_v5 = vpop.f32.mrf.mxu1  ;;  %v4149_v30 = vadd.f32 %v4148_v22, %v4036_v53  ;;  %v4464_v40 = vsel %vm4336_vm0, %v4256_v50, %v4400_v63  ;;  %v4401_v38 = vmul.f32 0.2, %v4258_v1 }
 0x2fd   :  { %v4152_v39 = vpop.f32.mrf.mxu0  ;;  %vm4337_vm2 = vcmp.gt.f32.partialorder %v4258_v1, 0.0 }
 0x2fe   :  { %vm4340_vm1 = vcmp.gt.f32.partialorder %v4260_v2, 0.0  ;;  %v4404_v62 = vmul.f32 0.2, %v4260_v2  ;;  %v4153_v36 = vadd.f32 %v4152_v39, %v8350_v3  ;;  %v4265_v0 = vpop.f32.mrf.mxu1  ;;  %v4262_v29 = vadd.f32 %v4261_v5, %v4149_v30 }
 0x2ff   :  { %v4154_v60 = vpop.f32.mrf.mxu0  ;;  %v4465_v22 = vsel %vm4337_vm2, %v4258_v1, %v4401_v38 }
 0x300   :  { %v4468_v13 = vsel %vm4340_vm1, %v4260_v2, %v4404_v62  ;;  %v4266_v51 = vadd.f32 %v4265_v0, %v4153_v36  ;;  %v4155_v54 = vadd.f32 %v4154_v60, %v8353_v27  ;;  %v4267_v42 = vpop.f32.mrf.mxu1  ;;  %vm4341_vm3 = vcmp.gt.f32.partialorder %v4262_v29, 0.0  ;;  %v6625_v36 = vld [vmem:[#allocation11 + $0x38] sm:$0xff]   ;;  %v6626_v0 = vld [vmem:[#allocation11 + $0x70] sm:$0xff]  }
 0x301   :  { %v4528_v57 = vpack.c.bf16 %v4468_v13, %v4464_v40  ;;  %v4405_v21 = vmul.f32 0.2, %v4262_v29  ;;  %v4156_v16 = vpop.f32.mrf.mxu0 }
 0x302   :  { %v4157_v3 = vadd.f32 %v4156_v16, %v8358_v33  ;;  %v4269_v18 = vpop.f32.mrf.mxu1  ;;  %v4408_v56 = vmul.f32 0.2, %v4266_v51  ;;  %vm4344_vm4 = vcmp.gt.f32.partialorder %v4266_v51, 0.0  ;;  %v4268_v41 = vadd.f32 %v4267_v42, %v4155_v54  ;;  %v6624_v33 = vld [vmem:[#allocation11 + $0x78] sm:$0xff]  }
 0x303   :  { %v4158_v50 = vpop.f32.mrf.mxu0  ;;  %v4469_v45 = vsel %vm4341_vm3, %v4262_v29, %v4405_v21  ;;  %6049 = vmatprep.subr.bf16.mxu0 %v6624_v33  ;;  %6113 = vmatprep.subr.bf16.mxu1 %v6624_v33 }
 0x304   :  { %v4270_v53 = vadd.f32 %v4269_v18, %v4157_v3  ;;  %v4271_v63 = vpop.f32.mrf.mxu1  ;;  %v4159_v27 = vadd.f32 %v4158_v50, %v4046_v11  ;;  %v4529_v5 = vpack.c.bf16 %v4469_v45, %v4465_v22  ;;  %v4472_v25 = vsel %vm4344_vm4, %v4266_v51, %v4408_v56  ;;  %6050 = vmatpush3.bf16.msra.mxu0 %v6625_v36  ;;  %v6628_v3 = vld [vmem:[#allocation11 + $0x68] sm:$0xff]  }
 0x305   :  { %v4162_v2 = vpop.f32.mrf.mxu0  ;;  %v4409_v1 = vmul.f32 0.2, %v4268_v41  ;;  %vm4345_vm6 = vcmp.gt.f32.partialorder %v4268_v41, 0.0  ;;  %6051 = vmatprep.subr.bf16.mxu0 %v6626_v0 }
 0x306   :  { %vm4348_vm5 = vcmp.gt.f32.partialorder %v4270_v53, 0.0  ;;  %v4412_v30 = vmul.f32 0.2, %v4270_v53  ;;  %v4163_v39 = vadd.f32 %v4162_v2, %v8363_v48  ;;  %v4275_v62 = vpop.f32.mrf.mxu1  ;;  %v4272_v40 = vadd.f32 %v4271_v63, %v4159_v27  ;;  %5099 = vmatprep.mubr.bf16.mxu1 %v4529_v5 }
 0x307   :  { %v4164_v29 = vpop.f32.mrf.mxu0  ;;  %5100 = vmatmul.mubr.bf16.vlgmr.msra.gmra.mxu1 %v4528_v57  ;;  %v4056_v57 = vadd.f32 %v8373_v23, %v3943_v15 }
 0x308   :  { %v4476_v60 = vsel %vm4348_vm5, %v4270_v53, %v4412_v30  ;;  %v4276_v38 = vadd.f32 %v4275_v62, %v4163_v39  ;;  %v4165_v13 = vadd.f32 %v4164_v29, %v8366_v47  ;;  %v4277_v54 = vpop.f32.mrf.mxu1  ;;  %vm4349_vm7 = vcmp.gt.f32.partialorder %v4272_v40, 0.0  ;;  %6121 = vmatpush3.bf16.msra.mxu1 %v6625_v36  ;;  %6052 = vmatpush3.bf16.msra.mxu0 %v6627_v8  ;;  %v6630_v30 = vld [vmem:[#allocation11 + $0x60] sm:$0xff]  }
 0x309   :  { %v4532_v48 = vpack.c.bf16 %v4476_v60, %v4472_v25  ;;  %v4413_v42 = vmul.f32 0.2, %v4272_v40  ;;  %v4166_v21 = vpop.f32.mrf.mxu0  ;;  %6114 = vmatprep.subr.bf16.mxu1 %v6626_v0  ;;  %v4473_v53 = vsel %vm4345_vm6, %v4268_v41, %v4409_v1  ;;  %6053 = vmatprep.subr.bf16.mxu0 %v6628_v3  ;;  %v3953_v39 = vadd.f32 %v8382_v4, %v8334_v20  ;;  %v6631_v4 = vld [vmem:[#allocation11 + $0x20] sm:$0xff]  }
 0x30a   :  { %v4167_v51 = vadd.f32 %v4166_v21, %v8371_v34  ;;  %v4279_v16 = vpop.f32.mrf.mxu1  ;;  %v4416_v18 = vmul.f32 0.2, %v4276_v38  ;;  %vm4352_vm8 = vcmp.gt.f32.partialorder %v4276_v38, 0.0  ;;  %v4278_v56 = vadd.f32 %v4277_v54, %v4165_v13  ;;  %v6629_v34 = vld [vmem:[#allocation11 + $0x28] sm:$0xff]   ;;  %v6632_v13 = vld [vmem:[#allocation11 + $0x58] sm:$0xff]  }
 0x30b   :  { %v4168_v47 = vpop.f32.mrf.mxu0  ;;  %v4477_v11 = vsel %vm4349_vm7, %v4272_v40, %v4413_v42  ;;  %v4066_v54 = vadd.f32 %v8386_v44, %v3953_v39 }
 0x30c   :  { %v4280_v50 = vadd.f32 %v4279_v16, %v4167_v51  ;;  %v4281_v45 = vpop.f32.mrf.mxu1  ;;  %v4169_v63 = vadd.f32 %v4168_v47, %v4056_v57  ;;  %v4533_v27 = vpack.c.bf16 %v4477_v11, %v4473_v53  ;;  %6122 = vmatpush3.bf16.msra.mxu1 %v6627_v8  ;;  %v4480_v62 = vsel %vm4352_vm8, %v4276_v38, %v4416_v18 }
 0x30d   :  { %v4172_v22 = vpop.f32.mrf.mxu0  ;;  %6115 = vmatprep.subr.bf16.mxu1 %v6628_v3  ;;  %v4417_v36 = vmul.f32 0.2, %v4278_v56  ;;  %vm4353_vm10 = vcmp.gt.f32.partialorder %v4278_v56, 0.0  ;;  %6054 = vmatpush3.bf16.msra.mxu0 %v6629_v34 }
 0x30e   :  { %vm4356_vm9 = vcmp.gt.f32.partialorder %v4280_v50, 0.0  ;;  %v4420_v2 = vmul.f32 0.2, %v4280_v50  ;;  %v4173_v5 = vadd.f32 %v4172_v22, %v8376_v35  ;;  %v4285_v23 = vpop.f32.mrf.mxu1  ;;  %v4282_v33 = vadd.f32 %v4281_v45, %v4169_v63  ;;  %5109 = vmatprep.mubr.bf16.mxu1 %v4533_v27  ;;  %6055 = vmatprep.subr.bf16.mxu0 %v6630_v30 }
 0x30f   :  { %v4174_v41 = vpop.f32.mrf.mxu0  ;;  %5110 = vmatmul.mubr.bf16.gmra.mxu1 %v4532_v48  ;;  %v4481_v16 = vsel %vm4353_vm10, %v4278_v56, %v4417_v36  ;;  %v3963_v45 = vadd.f32 %v8395_v19, %v8334_v20  ;;  %v6635_v19 = vld [vmem:[#allocation11 + $0x10] sm:$0xff]  }
 0x310   :  { %v4484_v0 = vsel %vm4356_vm9, %v4280_v50, %v4420_v2  ;;  %v4286_v15 = vadd.f32 %v4285_v23, %v4173_v5  ;;  %v4175_v25 = vadd.f32 %v4174_v41, %v8379_v58  ;;  %v4287_v35 = vpop.f32.mrf.mxu1  ;;  %vm4357_vm11 = vcmp.gt.f32.partialorder %v4282_v33, 0.0  ;;  %6123 = vmatpush3.bf16.msra.mxu1 %v6629_v34  ;;  %v6634_v50 = vld [vmem:[#allocation11 + $0x50] sm:$0xff]  }
 0x311   :  { %v4536_v40 = vpack.c.bf16 %v4484_v0, %v4480_v62  ;;  %v4421_v29 = vmul.f32 0.2, %v4282_v33  ;;  %v4176_v1 = vpop.f32.mrf.mxu0  ;;  %6116 = vmatprep.subr.bf16.mxu1 %v6630_v30  ;;  %6056 = vmatpush3.bf16.msra.mxu0 %v6631_v4  ;;  %v4076_v41 = vadd.f32 %v8399_v49, %v3963_v45  ;;  %v3973_v49 = vadd.f32 %v8408_v24, %v8334_v20 }
 0x312   :  { %v4177_v60 = vadd.f32 %v4176_v1, %v8384_v31  ;;  %v4289_v38 = vpop.f32.mrf.mxu1  ;;  %v4424_v42 = vmul.f32 0.2, %v4286_v15  ;;  %vm4360_vm12 = vcmp.gt.f32.partialorder %v4286_v15, 0.0  ;;  %v4288_v58 = vadd.f32 %v4287_v35, %v4175_v25  ;;  %v6633_v31 = vld [vmem:[#allocation11 + $0x18] sm:$0xff]   ;;  %6057 = vmatprep.subr.bf16.mxu0 %v6632_v13 }
 0x313   :  { %v4178_v48 = vpop.f32.mrf.mxu0  ;;  %v4485_v21 = vsel %vm4357_vm11, %v4282_v33, %v4421_v29  ;;  %v6636_v33 = vld [vmem:[#allocation11 + $0x48] sm:$0xff]  }
 0x314   :  { %v4290_v8 = vadd.f32 %v4289_v38, %v4177_v60  ;;  %v4291_v51 = vpop.f32.mrf.mxu1  ;;  %v4179_v3 = vadd.f32 %v4178_v48, %v4066_v54  ;;  %v4537_v18 = vpack.c.bf16 %v4485_v21, %v4481_v16  ;;  %6124 = vmatpush3.bf16.msra.mxu1 %v6631_v4  ;;  %v4488_v53 = vsel %vm4360_vm12, %v4286_v15, %v4424_v42 }
 0x315   :  { %v4182_v57 = vpop.f32.mrf.mxu0  ;;  %6117 = vmatprep.subr.bf16.mxu1 %v6632_v13  ;;  %v4425_v22 = vmul.f32 0.2, %v4288_v58  ;;  %vm4361_vm14 = vcmp.gt.f32.partialorder %v4288_v58, 0.0  ;;  %6058 = vmatpush3.bf16.msra.mxu0 %v6633_v31 }
 0x316   :  { %vm4364_vm13 = vcmp.gt.f32.partialorder %v4290_v8, 0.0  ;;  %v4428_v47 = vmul.f32 0.2, %v4290_v8  ;;  %v4183_v11 = vadd.f32 %v4182_v57, %v8389_v43  ;;  %v4295_v44 = vpop.f32.mrf.mxu1  ;;  %v4292_v63 = vadd.f32 %v4291_v51, %v4179_v3  ;;  %5119 = vmatprep.mubr.bf16.mxu1 %v4537_v18  ;;  %6059 = vmatprep.subr.bf16.mxu0 %v6634_v50 }
 0x317   :  { %v4184_v56 = vpop.f32.mrf.mxu0  ;;  %5120 = vmatmul.mubr.bf16.gmra.mxu1 %v4536_v40  ;;  %v4489_v40 = vsel %vm4361_vm14, %v4288_v58, %v4425_v22  ;;  %v4086_v18 = vadd.f32 %v8412_v37, %v3973_v49 }
 0x318   :  { %v4492_v27 = vsel %vm4364_vm13, %v4290_v8, %v4428_v47  ;;  %v4296_v34 = vadd.f32 %v4295_v44, %v4183_v11  ;;  %v4185_v2 = vadd.f32 %v4184_v56, %v8392_v10  ;;  %v4297_v43 = vpop.f32.mrf.mxu1  ;;  %vm4365_vm15 = vcmp.gt.f32.partialorder %v4292_v63, 0.0  ;;  %6125 = vmatpush3.bf16.msra.mxu1 %v6633_v31 }
 0x319   :  { %v4540_v5 = vpack.c.bf16 %v4492_v27, %v4488_v53  ;;  %v4429_v23 = vmul.f32 0.2, %v4292_v63  ;;  %v4186_v30 = vpop.f32.mrf.mxu0  ;;  %6118 = vmatprep.subr.bf16.mxu1 %v6634_v50  ;;  %6060 = vmatpush3.bf16.msra.mxu0 %v6635_v19 }
 0x31a   :  { %v4187_v39 = vadd.f32 %v4186_v30, %v8397_v26  ;;  %v4299_v62 = vpop.f32.mrf.mxu1  ;;  %v4432_v36 = vmul.f32 0.2, %v4296_v34  ;;  %vm4368_vm0 = vcmp.gt.f32.partialorder %v4296_v34, 0.0  ;;  %v4298_v10 = vadd.f32 %v4297_v43, %v4185_v2  ;;  %6061 = vmatprep.subr.bf16.mxu0 %v6636_v33 }
 0x31b   :  { %v4188_v0 = vpop.f32.mrf.mxu0  ;;  %v4493_v15 = vsel %vm4365_vm15, %v4292_v63, %v4429_v23 }
 0x31c   :  { %v4300_v25 = vadd.f32 %v4299_v62, %v4187_v39  ;;  %v4301_v35 = vpop.f32.mrf.mxu1  ;;  %v4189_v29 = vadd.f32 %v4188_v0, %v4076_v41  ;;  %v4541_v4 = vpack.c.bf16 %v4493_v15, %v4489_v40  ;;  %6126 = vmatpush3.bf16.msra.mxu1 %v6635_v19  ;;  %v4496_v13 = vsel %vm4368_vm0, %v4296_v34, %v4432_v36 }
 0x31d   :  { %v4192_v1 = vpop.f32.mrf.mxu0  ;;  %6119 = vmatprep.subr.bf16.mxu1 %v6636_v33  ;;  %v4433_v48 = vmul.f32 0.2, %v4298_v10  ;;  %vm4369_vm2 = vcmp.gt.f32.partialorder %v4298_v10, 0.0 }
 0x31e   :  { %vm4372_vm1 = vcmp.gt.f32.partialorder %v4300_v25, 0.0  ;;  %v4436_v26 = vmul.f32 0.2, %v4300_v25  ;;  %v4193_v60 = vadd.f32 %v4192_v1, %v8402_v61  ;;  %v4305_v38 = vpop.f32.mrf.mxu1  ;;  %v4302_v54 = vadd.f32 %v4301_v35, %v4189_v29  ;;  %5129 = vmatprep.mubr.bf16.mxu1 %v4541_v4 }
 0x31f   :  { %v4194_v42 = vpop.f32.mrf.mxu0  ;;  %5130 = vmatmul.mubr.bf16.gmra.mxu1 %v4540_v5  ;;  %v4497_v53 = vsel %vm4369_vm2, %v4298_v10, %v4433_v48 }
 0x320   :  { %v4500_v21 = vsel %vm4372_vm1, %v4300_v25, %v4436_v26  ;;  %v4306_v58 = vadd.f32 %v4305_v38, %v4193_v60  ;;  %v4195_v8 = vadd.f32 %v4194_v42, %v8405_v14  ;;  %v4307_v51 = vpop.f32.mrf.mxu1  ;;  %vm4373_vm3 = vcmp.gt.f32.partialorder %v4302_v54, 0.0 }
 0x321   :  { %v4544_v61 = vpack.c.bf16 %v4500_v21, %v4496_v13  ;;  %v4437_v16 = vmul.f32 0.2, %v4302_v54  ;;  %v4196_v3 = vpop.f32.mrf.mxu0 }
 0x322   :  { %v4197_v24 = vadd.f32 %v4196_v3, %v8410_v59  ;;  %v4309_v57 = vpop.f32.mrf.mxu1  ;;  %v4440_v31 = vmul.f32 0.2, %v4306_v58  ;;  %vm4376_vm4 = vcmp.gt.f32.partialorder %v4306_v58, 0.0  ;;  %v4308_v44 = vadd.f32 %v4307_v51, %v4195_v8 }
 0x323   :  { %v4198_v47 = vpop.f32.mrf.mxu0  ;;  %v4501_v11 = vsel %vm4373_vm3, %v4302_v54, %v4437_v16  ;;  %v3983_v59 = vadd.f32 %v8421_v7, %v8334_v20 }
 0x324   :  { %v4310_v50 = vadd.f32 %v4309_v57, %v4197_v24  ;;  %v4311_v45 = vpop.f32.mrf.mxu1  ;;  %v4199_v14 = vadd.f32 %v4198_v47, %v4086_v18  ;;  %v4545_v56 = vpack.c.bf16 %v4501_v11, %v4497_v53  ;;  %v4504_v37 = vsel %vm4376_vm4, %v4306_v58, %v4440_v31 }
 0x325   :  { %v4202_v63 = vpop.f32.mrf.mxu0  ;;  %v4441_v5 = vmul.f32 0.2, %v4308_v44  ;;  %vm4377_vm6 = vcmp.gt.f32.partialorder %v4308_v44, 0.0  ;;  %v4096_v7 = vadd.f32 %v8425_v28, %v3983_v59  ;;  %v6639_v59 = vld [vmem:[#allocation11] sm:$0xff]  }
 0x326   :  { %vm4380_vm5 = vcmp.gt.f32.partialorder %v4310_v50, 0.0  ;;  %v4444_v22 = vmul.f32 0.2, %v4310_v50  ;;  %v4203_v27 = vadd.f32 %v4202_v63, %v8415_v46  ;;  %v4315_v34 = vpop.f32.mrf.mxu1  ;;  %v4312_v2 = vadd.f32 %v4311_v45, %v4199_v14  ;;  %5139 = vmatprep.mubr.bf16.mxu1 %v4545_v56 }
 0x327   :  { %v4204_v43 = vpop.f32.mrf.mxu0  ;;  %5140 = vmatmul.mubr.bf16.gmra.mxu1 %v4544_v61  ;;  %v4505_v29 = vsel %vm4377_vm6, %v4308_v44, %v4441_v5 }
 0x328   :  { %v4508_v23 = vsel %vm4380_vm5, %v4310_v50, %v4444_v22  ;;  %v4316_v30 = vadd.f32 %v4315_v34, %v4203_v27  ;;  %v4205_v19 = vadd.f32 %v4204_v43, %v8418_v52  ;;  %v4317_v39 = vpop.f32.mrf.mxu1  ;;  %vm4381_vm7 = vcmp.gt.f32.partialorder %v4312_v2, 0.0  ;;  %v6637_v27 = vld [vmem:[#allocation11 + $0x8] sm:$0xff]   ;;  %v6638_v34 = vld [vmem:[#allocation11 + $0x40] sm:$0xff]  }
 0x329   :  { %v4548_v62 = vpack.c.bf16 %v4508_v23, %v4504_v37  ;;  %v4445_v33 = vmul.f32 0.2, %v4312_v2  ;;  %v4206_v46 = vpop.f32.mrf.mxu0  ;;  %6062 = vmatpush3.bf16.msra.mxu0 %v6637_v27  ;;  %6127 = vmatpush3.bf16.msra.mxu1 %v6637_v27 }
 0x32a   :  { %v4207_v41 = vadd.f32 %v4206_v46, %v8423_v17  ;;  %v4319_v36 = vpop.f32.mrf.mxu1  ;;  %v4448_v0 = vmul.f32 0.2, %v4316_v30  ;;  %vm4384_vm8 = vcmp.gt.f32.partialorder %v4316_v30, 0.0  ;;  %v4318_v25 = vadd.f32 %v4317_v39, %v4205_v19  ;;  %6063 = vmatprep.subr.bf16.mxu0 %v6638_v34  ;;  %6120 = vmatprep.subr.bf16.mxu1 %v6638_v34 }
 0x32b   :  { %v4208_v15 = vpop.f32.mrf.mxu0  ;;  %v4509_v10 = vsel %vm4381_vm7, %v4312_v2, %v4445_v33  ;;  %v3993_v17 = vadd.f32 %v8434_v12, %v8334_v20 }
 0x32c   :  { %v4320_v35 = vadd.f32 %v4319_v36, %v4207_v41  ;;  %v4321_v40 = vpop.f32.mrf.mxu1  ;;  %v4209_v52 = vadd.f32 %v4208_v15, %v4096_v7  ;;  %v4549_v4 = vpack.c.bf16 %v4509_v10, %v4505_v29  ;;  %v4512_v28 = vsel %vm4384_vm8, %v4316_v30, %v4448_v0  ;;  %v4622_v10 = vld [vmem:[%s8614_s6] sm:$0x3] }
 0x32d   :  { %v4212_v1 = vpop.f32.mrf.mxu0  ;;  %v4449_v54 = vmul.f32 0.2, %v4318_v25  ;;  %vm4385_vm10 = vcmp.gt.f32.partialorder %v4318_v25, 0.0  ;;  %v4106_v20 = vadd.f32 %v8438_v6, %v3993_v17  ;;  %6064 = vmatpush3.bf16.msra.mxu0 %v6639_v59  ;;  %6128 = vmatpush3.bf16.msra.mxu1 %v6639_v59 }
 0x32e   :  { %vm4388_vm9 = vcmp.gt.f32.partialorder %v4320_v35, 0.0  ;;  %v4452_v26 = vmul.f32 0.2, %v4320_v35  ;;  %v4213_v60 = vadd.f32 %v4212_v1, %v8428_v32  ;;  %v4325_v38 = vpop.f32.mrf.mxu1  ;;  %v4322_v49 = vadd.f32 %v4321_v40, %v4209_v52  ;;  %5149 = vmatprep.mubr.bf16.mxu1 %v4549_v4  ;;  %v8729_v40 = vld [vmem:[#allocation20_spill] sm:$0xff] }
 0x32f   :  { %v4214_v13 = vpop.f32.mrf.mxu0  ;;  %5150 = vmatmul.mubr.bf16.gmra.mxu1 %v4548_v62  ;;  %v4513_v31 = vsel %vm4385_vm10, %v4318_v25, %v4449_v54  ;;  %v8728_v25 = vld [vmem:[#allocation21_spill] sm:$0xff]  ;;  %v8516_v29 = vrot.slane %v4622_v10, %v8729_v40 }
 0x330   :  { %v4516_v42 = vsel %vm4388_vm9, %v4320_v35, %v4452_v26  ;;  %v4326_v48 = vadd.f32 %v4325_v38, %v4213_v60  ;;  %v4215_v21 = vadd.f32 %v4214_v13, %v8431_v55  ;;  %v4327_v58 = vpop.f32.mrf.mxu1  ;;  %vm4389_vm11 = vcmp.gt.f32.partialorder %v4322_v49, 0.0 }
 0x331   :  { %v4552_v8 = vpack.c.bf16 %v4516_v42, %v4512_v28  ;;  %v4453_v51 = vmul.f32 0.2, %v4322_v49  ;;  %v4216_v32 = vpop.f32.mrf.mxu0  ;;  %v8513_v35 = vrot.slane %v4622_v10, %v8728_v25 }
 0x332   :  { %v4217_v61 = vadd.f32 %v4216_v32, %v8436_v9  ;;  %v4329_v16 = vpop.f32.mrf.mxu1  ;;  %v4328_v12 = vadd.f32 %v4327_v58, %v4215_v21  ;;  %v4456_v57 = vmul.f32 0.2, %v4326_v48  ;;  %vm4392_vm12 = vcmp.gt.f32.partialorder %v4326_v48, 0.0 }
 0x333   :  { %v4218_v3 = vpop.f32.mrf.mxu0  ;;  %v4517_v24 = vsel %vm4389_vm11, %v4322_v49, %v4453_v51 }
 0x334   :  { %v4330_v18 = vadd.f32 %v4329_v16, %v4217_v61  ;;  %v4219_v47 = vadd.f32 %v4218_v3, %v4106_v20  ;;  %v4553_v55 = vpack.c.bf16 %v4517_v24, %v4513_v31  ;;  %v4331_v44 = vpop.f32.mrf.mxu1  ;;  %v4457_v50 = vmul.f32 0.2, %v4328_v12 }
 0x335   :  { %v4520_v53 = vsel %vm4392_vm12, %v4326_v48, %v4456_v57  ;;  %vm4393_vm14 = vcmp.gt.f32.partialorder %v4328_v12, 0.0 }
 0x336   :  { %vm4396_vm13 = vcmp.gt.f32.partialorder %v4330_v18, 0.0  ;;  %v4460_v11 = vmul.f32 0.2, %v4330_v18  ;;  %v4332_v45 = vadd.f32 %v4331_v44, %v4219_v47  ;;  %5159 = vmatprep.mubr.bf16.mxu1 %v4553_v55  ;;  %v4521_v63 = vsel %vm4393_vm14, %v4328_v12, %v4457_v50 }
 0x337   :  { %5160 = vmatmul.mubr.bf16.gmra.mxu1 %v4552_v8 }
 0x338   :  { %v4524_v9 = vsel %vm4396_vm13, %v4330_v18, %v4460_v11  ;;  %vm4397_vm15 = vcmp.gt.f32.partialorder %v4332_v45, 0.0  ;;  %v4461_v14 = vmul.f32 0.2, %v4332_v45 }
 0x339   :  { %v4556_v6 = vpack.c.bf16 %v4524_v9, %v4520_v53 }
 0x33a   :  { %v4525_v56 = vsel %vm4397_vm15, %v4332_v45, %v4461_v14 }
 0x33b   :  { %v4557_v22 = vpack.c.bf16 %v4525_v56, %v4521_v63 }
 0x33d   :  { %5169 = vmatprep.mubr.bf16.mxu1 %v4557_v22  ;;  %v4988_v37 = vpop.f32.mrf.mxu0 }
 0x33e   :  { %v4989_v26 = vadd.f32 %v4988_v37, %v8516_v29 }
 0x33f   :  { %5170 = vmatmul.mubr.bf16.gmra.mxu1 %v4556_v6  ;;  %v4990_v2 = vpop.f32.mrf.mxu0 }
 0x340   :  { %v4991_v4 = vadd.f32 %v4990_v2, %v8513_v35 }
 0x341   :  { %v4992_v43 = vpop.f32.mrf.mxu0 }
 0x342   :  { %v4993_v17 = vadd.f32 %v4992_v43, %v8516_v29 }
 0x343   :  { %v4994_v5 = vpop.f32.mrf.mxu0 }
 0x344   :  { %v4995_v54 = vadd.f32 %v4994_v5, %v8513_v35 }
 0x345   :  { %v4998_v23 = vpop.f32.mrf.mxu0 }
 0x346   :  { %v4999_v12 = vadd.f32 %v4998_v23, %v8516_v29 }
 0x347   :  { %v5000_v30 = vpop.f32.mrf.mxu0 }
 0x348   :  { %v5001_v16 = vadd.f32 %v5000_v30, %v8513_v35 }
 0x349   :  { %v5002_v19 = vpop.f32.mrf.mxu0 }
 0x34a   :  { %v5003_v18 = vadd.f32 %v5002_v19, %v8516_v29 }
 0x34b   :  { %v5004_v39 = vpop.f32.mrf.mxu0 }
 0x34c   :  { %v5005_v53 = vadd.f32 %v5004_v39, %v8513_v35 }
 0x34f   :  { %v8495_v62 = vpop.f32.mrf.mxu0 }
 0x350   :  { %v5009_v43 = vadd.f32 %v8495_v62, %v8516_v29 }
 0x351   :  { %v5010_v33 = vpop.f32.mrf.mxu0 }
 0x352   :  { %v5011_v37 = vadd.f32 %v5010_v33, %v8513_v35 }
 0x353   :  { %v8497_v46 = vpop.f32.mrf.mxu0 }
 0x354   :  { %v5013_v19 = vadd.f32 %v8497_v46, %v8516_v29 }
 0x355   :  { %v8499_v41 = vpop.f32.mrf.mxu0 }
 0x359   :  { %v8501_v36 = vpop.f32.mrf.mxu0 }
 0x35b   :  { %v8503_v7 = vpop.f32.mrf.mxu0 }
 0x35d   :  { %v8505_v0 = vpop.f32.mrf.mxu0 }
 0x35f   :  { %v8507_v15 = vpop.f32.mrf.mxu0 }
 0x362   :  { %v8518_v52 = vpop.f32.mrf.mxu0 }
 0x364   :  { %v8522_v60 = vpop.f32.mrf.mxu0 }
 0x366   :  { %v8526_v48 = vpop.f32.mrf.mxu0 }
 0x368   :  { %v8530_v3 = vpop.f32.mrf.mxu0 }
 0x36c   :  { %v8534_v14 = vpop.f32.mrf.mxu0 }
 0x36e   :  { %v8539_v5 = vpop.f32.mrf.mxu0 }
 0x370   :  { %v8545_v62 = vpop.f32.mrf.mxu0 }
 0x3c7   :  { %v5101_v1 = vpop.f32.mrf.mxu1 }
 0x3c8   :  { %v5102_v49 = vadd.f32 %v5101_v1, %v4989_v26  ;;  %v5015_v26 = vadd.f32 %v8499_v41, %v8513_v35 }
 0x3c9   :  { %v5103_v38 = vpop.f32.mrf.mxu1 }
 0x3ca   :  { %v5104_v28 = vadd.f32 %v5103_v38, %v4991_v4  ;;  %v5212_v32 = vmul.f32 0.2, %v5102_v49  ;;  %vm5180_vm2 = vcmp.gt.f32.partialorder %v5102_v49, 0.0 }
 0x3cb   :  { %v5105_v13 = vpop.f32.mrf.mxu1 }
 0x3cc   :  { %v5106_v42 = vadd.f32 %v5105_v13, %v4993_v17  ;;  %v5213_v58 = vmul.f32 0.2, %v5104_v28  ;;  %vm5181_vm1 = vcmp.gt.f32.partialorder %v5104_v28, 0.0  ;;  %v5244_v11 = vsel %vm5180_vm2, %v5102_v49, %v5212_v32 }
 0x3cd   :  { %v5107_v21 = vpop.f32.mrf.mxu1 }
 0x3ce   :  { %vm5182_vm0 = vcmp.gt.f32.partialorder %v5106_v42, 0.0  ;;  %v5214_v8 = vmul.f32 0.2, %v5106_v42  ;;  %v5108_v51 = vadd.f32 %v5107_v21, %v4995_v54  ;;  %v5245_v47 = vsel %vm5181_vm1, %v5104_v28, %v5213_v58 }
 0x3cf   :  { %v5111_v61 = vpop.f32.mrf.mxu1  ;;  %v5021_v21 = vadd.f32 %v8503_v7, %v8513_v35  ;;  %v5019_v58 = vadd.f32 %v8501_v36, %v8516_v29 }
 0x3d0   :  { %vm5183_vm3 = vcmp.gt.f32.partialorder %v5108_v51, 0.0  ;;  %v5215_v20 = vmul.f32 0.2, %v5108_v51  ;;  %v5246_v24 = vsel %vm5182_vm0, %v5106_v42, %v5214_v8  ;;  %v5112_v44 = vadd.f32 %v5111_v61, %v4999_v12  ;;  %v8551_v8 = vpop.f32.mrf.mxu0 }
 0x3d1   :  { %v5113_v57 = vpop.f32.mrf.mxu1  ;;  %v5276_v9 = vpack.c.bf16 %v5246_v24, %v5244_v11  ;;  %v5023_v61 = vadd.f32 %v8505_v0, %v8516_v29 }
 0x3d2   :  { %v5114_v31 = vadd.f32 %v5113_v57, %v5001_v16  ;;  %v5247_v55 = vsel %vm5183_vm3, %v5108_v51, %v5215_v20  ;;  %v5216_v34 = vmul.f32 0.2, %v5112_v44  ;;  %vm5184_vm6 = vcmp.gt.f32.partialorder %v5112_v44, 0.0  ;;  %v8557_v36 = vpop.f32.mrf.mxu0 }
 0x3d3   :  { %v5115_v50 = vpop.f32.mrf.mxu1  ;;  %v5277_v45 = vpack.c.bf16 %v5247_v55, %v5245_v47 }
 0x3d4   :  { %v5116_v6 = vadd.f32 %v5115_v50, %v5003_v18  ;;  %v5217_v56 = vmul.f32 0.2, %v5114_v31  ;;  %vm5185_vm5 = vcmp.gt.f32.partialorder %v5114_v31, 0.0  ;;  %v5248_v40 = vsel %vm5184_vm6, %v5112_v44, %v5216_v34 }
 0x3d5   :  { %v5117_v63 = vpop.f32.mrf.mxu1  ;;  %5459 = vmatprep.mubr.bf16.mxu0 %v5277_v45 }
 0x3d6   :  { %vm5186_vm4 = vcmp.gt.f32.partialorder %v5116_v6, 0.0  ;;  %v5218_v22 = vmul.f32 0.2, %v5116_v6  ;;  %v5118_v27 = vadd.f32 %v5117_v63, %v5005_v53  ;;  %5460 = vmatmul.mubr.bf16.vlgmr.msra.gmra.mxu0 %v5276_v9  ;;  %v5249_v10 = vsel %vm5185_vm5, %v5114_v31, %v5217_v56  ;;  %v5050_v63 = vpop.f32.mrf.mxu0 }
 0x3d7   :  { %v5121_v59 = vpop.f32.mrf.mxu1  ;;  %v5025_v31 = vadd.f32 %v8507_v15, %v8513_v35  ;;  %v5031_v9 = vadd.f32 %v8522_v60, %v8513_v35  ;;  %v5035_v60 = vadd.f32 %v8530_v3, %v8513_v35  ;;  %v5039_v3 = vadd.f32 %v8534_v14, %v8516_v29 }
 0x3d8   :  { %vm5187_vm7 = vcmp.gt.f32.partialorder %v5118_v27, 0.0  ;;  %v5219_v2 = vmul.f32 0.2, %v5118_v27  ;;  %v5250_v23 = vsel %vm5186_vm4, %v5116_v6, %v5218_v22  ;;  %v5122_v1 = vadd.f32 %v5121_v59, %v5009_v43 }
 0x3d9   :  { %v5123_v30 = vpop.f32.mrf.mxu1  ;;  %v5278_v38 = vpack.c.bf16 %v5250_v23, %v5248_v40  ;;  %v5029_v6 = vadd.f32 %v8518_v52, %v8516_v29 }
 0x3da   :  { %v5124_v39 = vadd.f32 %v5123_v30, %v5011_v37  ;;  %v5251_v25 = vsel %vm5187_vm7, %v5118_v27, %v5219_v2  ;;  %v5220_v54 = vmul.f32 0.2, %v5122_v1  ;;  %vm5188_vm10 = vcmp.gt.f32.partialorder %v5122_v1, 0.0 }
 0x3db   :  { %v5125_v4 = vpop.f32.mrf.mxu1  ;;  %v5279_v33 = vpack.c.bf16 %v5251_v25, %v5249_v10  ;;  %v5033_v27 = vadd.f32 %v8526_v48, %v8516_v29  ;;  %v5052_v10 = vpop.f32.mrf.mxu0 }
 0x3dc   :  { %v5126_v17 = vadd.f32 %v5125_v4, %v5013_v19  ;;  %v5221_v49 = vmul.f32 0.2, %v5124_v39  ;;  %vm5189_vm9 = vcmp.gt.f32.partialorder %v5124_v39, 0.0  ;;  %v5252_v24 = vsel %vm5188_vm10, %v5122_v1, %v5220_v54 }
 0x3dd   :  { %v5127_v28 = vpop.f32.mrf.mxu1  ;;  %5467 = vmatprep.mubr.bf16.mxu0 %v5279_v33  ;;  %v5041_v33 = vadd.f32 %v8539_v5, %v8513_v35  ;;  %v5045_v5 = vadd.f32 %v8551_v8, %v8513_v35  ;;  %v5049_v8 = vadd.f32 %v8557_v36, %v8516_v29 }
 0x3de   :  { %vm5190_vm8 = vcmp.gt.f32.partialorder %v5126_v17, 0.0  ;;  %v5222_v13 = vmul.f32 0.2, %v5126_v17  ;;  %v5128_v46 = vadd.f32 %v5127_v28, %v5015_v26  ;;  %5468 = vmatmul.mubr.bf16.gmra.mxu0 %v5278_v38  ;;  %v5253_v20 = vsel %vm5189_vm9, %v5124_v39, %v5221_v49  ;;  %v5054_v38 = vpop.f32.mrf.mxu0 }
 0x3df   :  { %v5131_v42 = vpop.f32.mrf.mxu1  ;;  %v5043_v49 = vadd.f32 %v8545_v62, %v8516_v29 }
 0x3e0   :  { %vm5191_vm11 = vcmp.gt.f32.partialorder %v5128_v46, 0.0  ;;  %v5223_v41 = vmul.f32 0.2, %v5128_v46  ;;  %v5254_v51 = vsel %vm5190_vm8, %v5126_v17, %v5222_v13  ;;  %v5132_v57 = vadd.f32 %v5131_v42, %v5019_v58 }
 0x3e1   :  { %v5133_v32 = vpop.f32.mrf.mxu1  ;;  %v5280_v47 = vpack.c.bf16 %v5254_v51, %v5252_v24 }
 0x3e2   :  { %v5134_v16 = vadd.f32 %v5133_v32, %v5021_v21  ;;  %v5255_v12 = vsel %vm5191_vm11, %v5128_v46, %v5223_v41  ;;  %v5224_v45 = vmul.f32 0.2, %v5132_v57  ;;  %vm5192_vm14 = vcmp.gt.f32.partialorder %v5132_v57, 0.0 }
 0x3e3   :  { %v5135_v18 = vpop.f32.mrf.mxu1  ;;  %v5281_v7 = vpack.c.bf16 %v5255_v12, %v5253_v20 }
 0x3e4   :  { %v5136_v55 = vadd.f32 %v5135_v18, %v5023_v61  ;;  %v5225_v44 = vmul.f32 0.2, %v5134_v16  ;;  %vm5193_vm13 = vcmp.gt.f32.partialorder %v5134_v16, 0.0  ;;  %v5256_v2 = vsel %vm5192_vm14, %v5132_v57, %v5224_v45  ;;  %v5058_v61 = vpop.f32.mrf.mxu0 }
 0x3e5   :  { %v5137_v11 = vpop.f32.mrf.mxu1  ;;  %5475 = vmatprep.mubr.bf16.mxu0 %v5281_v7  ;;  %v5051_v57 = vadd.f32 %v5050_v63, %v8513_v35 }
 0x3e6   :  { %vm5194_vm12 = vcmp.gt.f32.partialorder %v5136_v55, 0.0  ;;  %v5226_v50 = vmul.f32 0.2, %v5136_v55  ;;  %v5138_v0 = vadd.f32 %v5137_v11, %v5025_v31  ;;  %5476 = vmatmul.mubr.bf16.gmra.mxu0 %v5280_v47  ;;  %v5257_v59 = vsel %vm5193_vm13, %v5134_v16, %v5225_v44  ;;  %v5060_v7 = vpop.f32.mrf.mxu0 }
 0x3e7   :  { %v5141_v53 = vpop.f32.mrf.mxu1 }
 0x3e8   :  { %vm5195_vm15 = vcmp.gt.f32.partialorder %v5138_v0, 0.0  ;;  %v5227_v15 = vmul.f32 0.2, %v5138_v0  ;;  %v5258_v56 = vsel %vm5194_vm12, %v5136_v55, %v5226_v50  ;;  %v5142_v43 = vadd.f32 %v5141_v53, %v5029_v6 }
 0x3e9   :  { %v5143_v22 = vpop.f32.mrf.mxu1  ;;  %v5282_v19 = vpack.c.bf16 %v5258_v56, %v5256_v2  ;;  %v5053_v55 = vadd.f32 %v5052_v10, %v8516_v29  ;;  %v5062_v56 = vpop.f32.mrf.mxu0  ;;  %v5061_v2 = vadd.f32 %v5060_v7, %v8513_v35 }
 0x3ea   :  { %v5144_v34 = vadd.f32 %v5143_v22, %v5031_v9  ;;  %v5259_v37 = vsel %vm5195_vm15, %v5138_v0, %v5227_v15  ;;  %v5228_v48 = vmul.f32 0.2, %v5142_v43  ;;  %vm5196_vm2 = vcmp.gt.f32.partialorder %v5142_v43, 0.0 }
 0x3eb   :  { %v5145_v23 = vpop.f32.mrf.mxu1  ;;  %v5283_v30 = vpack.c.bf16 %v5259_v37, %v5257_v59  ;;  %v5055_v15 = vadd.f32 %v5054_v38, %v8513_v35 }
 0x3ec   :  { %v5146_v39 = vadd.f32 %v5145_v23, %v5033_v27  ;;  %v5229_v25 = vmul.f32 0.2, %v5144_v34  ;;  %vm5197_vm1 = vcmp.gt.f32.partialorder %v5144_v34, 0.0  ;;  %v5260_v42 = vsel %vm5196_vm2, %v5142_v43, %v5228_v48 }
 0x3ed   :  { %v5147_v52 = vpop.f32.mrf.mxu1  ;;  %5483 = vmatprep.mubr.bf16.mxu0 %v5283_v30  ;;  %v5059_v23 = vadd.f32 %v5058_v61, %v8516_v29  ;;  %v5064_v30 = vpop.f32.mrf.mxu0 }
 0x3ee   :  { %vm5198_vm0 = vcmp.gt.f32.partialorder %v5146_v39, 0.0  ;;  %v5230_v40 = vmul.f32 0.2, %v5146_v39  ;;  %v5148_v1 = vadd.f32 %v5147_v52, %v5035_v60  ;;  %5484 = vmatmul.mubr.bf16.gmra.mxu0 %v5282_v19  ;;  %v5261_v46 = vsel %vm5197_vm1, %v5144_v34, %v5229_v25 }
 0x3ef   :  { %v5151_v4 = vpop.f32.mrf.mxu1 }
 0x3f0   :  { %vm5199_vm3 = vcmp.gt.f32.partialorder %v5148_v1, 0.0  ;;  %v5231_v26 = vmul.f32 0.2, %v5148_v1  ;;  %v5262_v17 = vsel %vm5198_vm0, %v5146_v39, %v5230_v40  ;;  %v5152_v21 = vadd.f32 %v5151_v4, %v5039_v3 }
 0x3f1   :  { %v5153_v28 = vpop.f32.mrf.mxu1  ;;  %v5284_v51 = vpack.c.bf16 %v5262_v17, %v5260_v42  ;;  %v5063_v39 = vadd.f32 %v5062_v56, %v8516_v29 }
 0x3f2   :  { %v5154_v13 = vadd.f32 %v5153_v28, %v5041_v33  ;;  %v5263_v54 = vsel %vm5199_vm3, %v5148_v1, %v5231_v26  ;;  %v5232_v62 = vmul.f32 0.2, %v5152_v21  ;;  %vm5200_vm6 = vcmp.gt.f32.partialorder %v5152_v21, 0.0 }
 0x3f3   :  { %v5155_v41 = vpop.f32.mrf.mxu1  ;;  %v5285_v58 = vpack.c.bf16 %v5263_v54, %v5261_v46  ;;  %v5065_v33 = vadd.f32 %v5064_v30, %v8513_v35 }
 0x3f4   :  { %v5156_v32 = vadd.f32 %v5155_v41, %v5043_v49  ;;  %v5233_v16 = vmul.f32 0.2, %v5154_v13  ;;  %vm5201_vm5 = vcmp.gt.f32.partialorder %v5154_v13, 0.0  ;;  %v5264_v0 = vsel %vm5200_vm6, %v5152_v21, %v5232_v62 }
 0x3f5   :  { %v5157_v14 = vpop.f32.mrf.mxu1  ;;  %5491 = vmatprep.mubr.bf16.mxu1 %v5285_v58 }
 0x3f6   :  { %vm5202_vm4 = vcmp.gt.f32.partialorder %v5156_v32, 0.0  ;;  %v5234_v20 = vmul.f32 0.2, %v5156_v32  ;;  %v5158_v12 = vadd.f32 %v5157_v14, %v5045_v5  ;;  %5492 = vmatmul.mubr.bf16.vlgmr.msra.gmra.mxu1 %v5284_v51  ;;  %v5265_v44 = vsel %vm5201_vm5, %v5154_v13, %v5233_v16  ;;  %v8587_v51 = vld [vmem:[%s8616_s8] ss:$0 sm:$0xff]  ;;  %s6809_s8 = smov [#allocation13]  }
 0x3f7   :  { %v5161_v24 = vpop.f32.mrf.mxu1  ;;  %s5572_s25 = sshll.u32 %s6809_s8, 4  ;;  %s5573_s25 = int_to_ptr.vmem [resolvable:$true] %s5572_s25 }
 0x3f8   :  { %vm5203_vm7 = vcmp.gt.f32.partialorder %v5158_v12, 0.0  ;;  %v5235_v18 = vmul.f32 0.2, %v5158_v12  ;;  %v5266_v31 = vsel %vm5202_vm4, %v5156_v32, %v5234_v20  ;;  %v5162_v45 = vadd.f32 %v5161_v24, %v5049_v8  ;;  %s6765_s26 = scalar_lea.vmem %s5573_s25, 16  ;;  %s6769_s27 = scalar_lea.vmem %s5573_s25, 32 }
 0x3f9   :  { %v5163_v47 = vpop.f32.mrf.mxu1  ;;  %v5286_v6 = vpack.c.bf16 %v5266_v31, %v5264_v0  ;;  %p6766_p2 = scmp.ne.s32.totalorder %s5573_s25, %s6765_s26  ;;  %p6770_p3 = scmp.lt.s32.totalorder %s5573_s25, %s5573_s25 }
 0x3fa   :  { %v5164_v11 = vadd.f32 %v5163_v47, %v5051_v57  ;;  %v5267_v50 = vsel %vm5203_vm7, %v5158_v12, %v5235_v18  ;;  %v5236_v59 = vmul.f32 0.2, %v5162_v45  ;;  %vm5204_vm10 = vcmp.gt.f32.partialorder %v5162_v45, 0.0  ;;  %p6771_p4 = scmp.lt.s32.totalorder %s6769_s27, %s6765_s26 }
 0x3fb   :  { %v5165_v53 = vpop.f32.mrf.mxu1  ;;  %v5287_v9 = vpack.c.bf16 %v5267_v50, %v5265_v44 }
 0x3fc   :  { %v5166_v63 = vadd.f32 %v5165_v53, %v5053_v55  ;;  %v5237_v36 = vmul.f32 0.2, %v5164_v11  ;;  %vm5205_vm9 = vcmp.gt.f32.partialorder %v5164_v11, 0.0  ;;  %v5268_v40 = vsel %vm5204_vm10, %v5162_v45, %v5236_v59  ;;  %p6772_p5 = por %p6771_p4, %p6770_p3 }
 0x3fd   :  { %v5167_v22 = vpop.f32.mrf.mxu1  ;;  %5499 = vmatprep.mubr.bf16.mxu1 %v5287_v9 }
 0x3fe   :  { %vm5206_vm8 = vcmp.gt.f32.partialorder %v5166_v63, 0.0  ;;  %v5238_v27 = vmul.f32 0.2, %v5166_v63  ;;  %v5168_v34 = vadd.f32 %v5167_v22, %v5055_v15  ;;  %5500 = vmatmul.mubr.bf16.gmra.mxu1 %v5286_v6  ;;  %v5269_v52 = vsel %vm5205_vm9, %v5164_v11, %v5237_v36  ;;  %p6773_p6 = pnand %p6772_p5, %p6766_p2 }
 0x3ff   :  { %v5171_v37 = vpop.f32.mrf.mxu1 }
 0x400   :  { %vm5207_vm11 = vcmp.gt.f32.partialorder %v5168_v34, 0.0  ;;  %v5239_v43 = vmul.f32 0.2, %v5168_v34  ;;  %v5270_v60 = vsel %vm5206_vm8, %v5166_v63, %v5238_v27  ;;  %v5172_v1 = vadd.f32 %v5171_v37, %v5059_v23 }
 0x401   :  { %v5173_v19 = vpop.f32.mrf.mxu1  ;;  %v5288_v26 = vpack.c.bf16 %v5270_v60, %v5268_v40 }
 0x402   :  { %v5174_v10 = vadd.f32 %v5173_v19, %v5061_v2  ;;  %v5271_v25 = vsel %vm5207_vm11, %v5168_v34, %v5239_v43  ;;  %v5240_v13 = vmul.f32 0.2, %v5172_v1  ;;  %vm5208_vm14 = vcmp.gt.f32.partialorder %v5172_v1, 0.0 }
 0x403   :  { %v5175_v48 = vpop.f32.mrf.mxu1  ;;  %v5289_v4 = vpack.c.bf16 %v5271_v25, %v5269_v52 }
 0x404   :  { %v5176_v3 = vadd.f32 %v5175_v48, %v5063_v39  ;;  %v5241_v17 = vmul.f32 0.2, %v5174_v10  ;;  %vm5209_vm13 = vcmp.gt.f32.partialorder %v5174_v10, 0.0  ;;  %v5272_v21 = vsel %vm5208_vm14, %v5172_v1, %v5240_v13 }
 0x405   :  { %v5177_v38 = vpop.f32.mrf.mxu1  ;;  %5507 = vmatprep.mubr.bf16.mxu1 %v5289_v4 }
 0x406   :  { %vm5210_vm12 = vcmp.gt.f32.partialorder %v5176_v3, 0.0  ;;  %v5242_v28 = vmul.f32 0.2, %v5176_v3  ;;  %v5178_v49 = vadd.f32 %v5177_v38, %v5065_v33  ;;  %5508 = vmatmul.mubr.bf16.gmra.mxu1 %v5288_v26  ;;  %v5273_v54 = vsel %vm5209_vm13, %v5174_v10, %v5241_v17 }
 0x408   :  { %vm5211_vm15 = vcmp.gt.f32.partialorder %v5178_v49, 0.0  ;;  %v5243_v29 = vmul.f32 0.2, %v5178_v49  ;;  %v5274_v46 = vsel %vm5210_vm12, %v5176_v3, %v5242_v28 }
 0x409   :  { %v5290_v35 = vpack.c.bf16 %v5274_v46, %v5272_v21 }
 0x40a   :  { %v5275_v42 = vsel %vm5211_vm15, %v5178_v49, %v5243_v29 }
 0x40b   :  { %v5291_v41 = vpack.c.bf16 %v5275_v42, %v5273_v54 }
 0x40d   :  { %5515 = vmatprep.mubr.bf16.mxu1 %v5291_v41 }
 0x40e   :  { %5516 = vmatmul.mubr.bf16.gmra.mxu1 %v5290_v35 }
 0x496   :  { %v6065_v58 = vpop.f32.mrf.mxu0 }
 0x498   :  { %v6066_v5 = vpop.f32.mrf.mxu0 }
 0x499   :  { %v6067_v32 = vadd.f32 %v6066_v5, %v6065_v58 }
 0x49a   :  { %v6068_v61 = vpop.f32.mrf.mxu0 }
 0x49b   :  { %v5462_v14 = vadd.f32 %v6067_v32, %v8587_v51 }
 0x49c   :  { %v6069_v16 = vpop.f32.mrf.mxu0 }
 0x49d   :  { %v6070_v20 = vadd.f32 %v6069_v16, %v6068_v61  ;;  %5524 = vxpose.xlu0.b32.start [1/16] (narrow) %v5462_v14, 8 }
 0x49e   :  { %v6071_v12 = vpop.f32.mrf.mxu0 }
 0x49f   :  { %v5465_v62 = vadd.f32 %v6070_v20, %v8587_v51 }
 0x4a0   :  { %v6072_v24 = vpop.f32.mrf.mxu0 }
 0x4a1   :  { %v6073_v57 = vadd.f32 %v6072_v24, %v6071_v12  ;;  %5525 = vxpose.xlu0.b32.cont [2/16] (narrow) %v5465_v62, 8 }
 0x4a2   :  { %v6074_v18 = vpop.f32.mrf.mxu0 }
 0x4a3   :  { %v5470_v8 = vadd.f32 %v6073_v57, %v8587_v51 }
 0x4a4   :  { %v6075_v7 = vpop.f32.mrf.mxu0 }
 0x4a5   :  { %v6076_v31 = vadd.f32 %v6075_v7, %v6074_v18  ;;  %5526 = vxpose.xlu0.b32.cont [3/16] (narrow) %v5470_v8, 8 }
 0x4a6   :  { %v6077_v47 = vpop.f32.mrf.mxu0 }
 0x4a7   :  { %v5473_v55 = vadd.f32 %v6076_v31, %v8587_v51 }
 0x4a8   :  { %v6078_v11 = vpop.f32.mrf.mxu0 }
 0x4a9   :  { %v6079_v44 = vadd.f32 %v6078_v11, %v6077_v47  ;;  %5527 = vxpose.xlu0.b32.cont [4/16] (narrow) %v5473_v55, 8 }
 0x4aa   :  { %v6080_v50 = vpop.f32.mrf.mxu0 }
 0x4ab   :  { %v5478_v0 = vadd.f32 %v6079_v44, %v8587_v51 }
 0x4ac   :  { %v6081_v45 = vpop.f32.mrf.mxu0 }
 0x4ad   :  { %v6082_v53 = vadd.f32 %v6081_v45, %v6080_v50  ;;  %5528 = vxpose.xlu0.b32.cont [5/16] (narrow) %v5478_v0, 8 }
 0x4ae   :  { %v6083_v9 = vpop.f32.mrf.mxu0 }
 0x4af   :  { %v5481_v15 = vadd.f32 %v6082_v53, %v8587_v51 }
 0x4b0   :  { %v6084_v6 = vpop.f32.mrf.mxu0 }
 0x4b1   :  { %v6085_v63 = vadd.f32 %v6084_v6, %v6083_v9  ;;  %5529 = vxpose.xlu0.b32.cont [6/16] (narrow) %v5481_v15, 8 }
 0x4b2   :  { %v6086_v56 = vpop.f32.mrf.mxu0 }
 0x4b3   :  { %v5486_v22 = vadd.f32 %v6085_v63, %v8587_v51 }
 0x4b4   :  { %v6087_v36 = vpop.f32.mrf.mxu0 }
 0x4b5   :  { %v6088_v27 = vadd.f32 %v6087_v36, %v6086_v56  ;;  %5530 = vxpose.xlu0.b32.cont [7/16] (narrow) %v5486_v22, 8 }
 0x4b6   :  { %v6089_v34 = vpop.f32.mrf.mxu1 }
 0x4b7   :  { %v5489_v59 = vadd.f32 %v6088_v27, %v8587_v51 }
 0x4b8   :  { %v6090_v37 = vpop.f32.mrf.mxu1 }
 0x4b9   :  { %v6091_v2 = vadd.f32 %v6090_v37, %v6089_v34  ;;  %5531 = vxpose.xlu0.b32.cont [8/16] (narrow) %v5489_v59, 8 }
 0x4ba   :  { %v6092_v43 = vpop.f32.mrf.mxu1 }
 0x4bb   :  { %v5494_v23 = vadd.f32 %v6091_v2, %v8587_v51 }
 0x4bc   :  { %v6093_v30 = vpop.f32.mrf.mxu1 }
 0x4bd   :  { %v6094_v60 = vadd.f32 %v6093_v30, %v6092_v43  ;;  %5532 = vxpose.xlu0.b32.cont [9/16] (narrow) %v5494_v23, 8 }
 0x4be   :  { %v6095_v19 = vpop.f32.mrf.mxu1 }
 0x4bf   :  { %v5497_v39 = vadd.f32 %v6094_v60, %v8587_v51 }
 0x4c0   :  { %v6096_v10 = vpop.f32.mrf.mxu1 }
 0x4c1   :  { %v6097_v52 = vadd.f32 %v6096_v10, %v6095_v19  ;;  %5533 = vxpose.xlu0.b32.cont [10/16] (narrow) %v5497_v39, 8 }
 0x4c2   :  { %v6098_v25 = vpop.f32.mrf.mxu1 }
 0x4c3   :  { %v5502_v40 = vadd.f32 %v6097_v52, %v8587_v51 }
 0x4c4   :  { %v6099_v1 = vpop.f32.mrf.mxu1 }
 0x4c5   :  { %v6100_v48 = vadd.f32 %v6099_v1, %v6098_v25  ;;  %5534 = vxpose.xlu0.b32.cont [11/16] (narrow) %v5502_v40, 8 }
 0x4c6   :  { %v6101_v4 = vpop.f32.mrf.mxu1 }
 0x4c7   :  { %v5505_v33 = vadd.f32 %v6100_v48, %v8587_v51 }
 0x4c8   :  { %v6102_v26 = vpop.f32.mrf.mxu1 }
 0x4c9   :  { %v6103_v3 = vadd.f32 %v6102_v26, %v6101_v4  ;;  %5535 = vxpose.xlu0.b32.cont [12/16] (narrow) %v5505_v33, 8 }
 0x4ca   :  { %v6104_v38 = vpop.f32.mrf.mxu1 }
 0x4cb   :  { %v5510_v17 = vadd.f32 %v6103_v3, %v8587_v51 }
 0x4cc   :  { %v6105_v28 = vpop.f32.mrf.mxu1 }
 0x4cd   :  { %v6106_v49 = vadd.f32 %v6105_v28, %v6104_v38  ;;  %5536 = vxpose.xlu0.b32.cont [13/16] (narrow) %v5510_v17, 8 }
 0x4ce   :  { %v6107_v13 = vpop.f32.mrf.mxu1 }
 0x4cf   :  { %v5513_v29 = vadd.f32 %v6106_v49, %v8587_v51 }
 0x4d0   :  { %v6108_v46 = vpop.f32.mrf.mxu1 }
 0x4d1   :  { %v6109_v54 = vadd.f32 %v6108_v46, %v6107_v13  ;;  %5537 = vxpose.xlu0.b32.cont [14/16] (narrow) %v5513_v29, 8 }
 0x4d2   :  { %v6110_v42 = vpop.f32.mrf.mxu1 }
 0x4d3   :  { %v5518_v21 = vadd.f32 %v6109_v54, %v8587_v51 }
 0x4d4   :  { %v6111_v41 = vpop.f32.mrf.mxu1 }
 0x4d5   :  { %v6112_v35 = vadd.f32 %v6111_v41, %v6110_v42  ;;  %5538 = vxpose.xlu0.b32.cont [15/16] (narrow) %v5518_v21, 8 }
 0x4d7   :  { %v5521_v58 = vadd.f32 %v6112_v35, %v8587_v51 }
 0x4d9   :  { %5539 = vxpose.xlu0.b32.end [16/16] (narrow) %v5521_v58, 8 }
 0x519   :  { %v5540_v5 = vpop.trf.xlu0 }
 0x51a   :  { %v5556_v32 = vand.u32 2147483647, %v5540_v5  ;;  %vm5562_vm0 = vcmp.ge.f32.partialorder %v5540_v5, 0.0 }
 0x51c   :  { %v5557_v61 = vsub.f32 0.0, %v5556_v32 }
 0x51e   :  { %v5558_v14 = vmul.f32 1.442695, %v5557_v61 }
 0x520   :  { %6640 = vpow2.f32 %v5558_v14 }
 0x52d   :  { %v6641_v16 = vpop.eup %6640 }
 0x52e   :  { %v5560_v20 = vadd.f32 1.0, %v6641_v16 }
 0x530   :  { %6642 = vrcp.f32 %v5560_v20 }
 0x53d   :  { %v6643_v12 = vpop.eup %6642 }
 0x53e   :  { %v5563_v62 = vmul.f32 %v6643_v12, %v6641_v16 }
 0x540   :  { %v5564_v24 = vsel %vm5562_vm0, %v6643_v12, %v5563_v62 }
 0x541   :  { %5565 = vst [vmem:[#allocation13] sm:$0x1] %v5564_v24 }
 0x542   :  { %6776 = shalt.err (!%p6773_p6)
}
 0x543   :  { %5575 = dma.vmem_to_hbm [thread:$0]  %s5573_s25, 16, %s8617_s9, [#allocation4]  }
 0x544   :  { %6793 = dma.done.wait [#allocation4], 16  }
 0x545   :  { %6794 = vsyncadd [#allocation4], 4294967280 }
 0x546   :  { %5579 = vsyncpa [#allocation3], 1 }
 0x547   :  { %5580 = vsyncpa [#allocation6], 1 }
 0x548   :  { %5581 = vsyncpa [#allocation9], 1 }
 0x549   :  { %5582 = vsyncpa [#allocation12], 1 }
 0x54a   :  { %5583 = vsyncpa [#allocation4], 1 }

</bundles_post_ra>
